<compile_context>
chip_gen: v7x
topology: tpu7x:2x2x1
jax: 0.10.0
libtpu: 0.0.40
codegen_flags: <defaults>
</compile_context>

<pallas_src>
import functools

import jax
import jax.numpy as jnp
from jax.experimental import pallas as pl
from jax.experimental.pallas import tpu as pltpu


def _round_up(v, m):
    return (v + m - 1) // m * m


# -----------------------------------------------------------------------------
# Fused kernel: im2col-in-VMEM conv + optional InstanceNorm + LeakyReLU
# -----------------------------------------------------------------------------
def _conv_in_lrelu_kernel(x_ref, w_ref, b_ref, mask_ref, o_ref, patch_ref,
                          acc_ref, *, k, ws, cin, mpad, n_valid, alpha,
                          do_norm, eps):
    """Per-sample fused conv layer (channels in sublanes, flat spatial in lanes).

    x_ref:     (Cin, Xlen)    bf16 padded input, spatial flattened into lanes
    w_ref:     (Cout, T*Cin)  bf16 weights (tap-major along K)
    b_ref:     (Cout, 1)      f32 bias
    mask_ref:  (1, Mpad)      f32: 1.0 on valid output positions, else 0.0
    o_ref:     (Cout, Mpad)   output slab (bf16 hidden layers, f32 final layer)
    patch_ref: (T*Cin, Mpad)  bf16 VMEM scratch: im2col patch matrix
    acc_ref:   (Cout, Mpad)   f32 VMEM scratch: conv accumulator
    """
    # --- im2col: k*k whole-slab shifted copies (flat-index shift trick).
    # Output position a = ho*ws + wo (columns wo >= Wo are garbage, masked and
    # cropped later); the source of tap (i, j) is the constant lane shift
    # i*ws + j, so every tap is one contiguous (Cin, Mpad) copy.
    for i in range(k):
        for j in range(k):
            t = i * k + j
            s = i * ws + j
            patch_ref[t * cin:(t + 1) * cin, :] = x_ref[:, s:s + mpad]

    # --- Single MXU matmul, f32 accumulation (tap summation happens on MXU).
    acc_ref[...] = jnp.dot(w_ref[...], patch_ref[...],
                           preferred_element_type=jnp.float32)

    if do_norm:
        # InstanceNorm2d(affine=False): the conv bias is a per-channel constant
        # and is removed exactly by the mean subtraction, so it is skipped.
        maskf = mask_ref[...]                        # (1, Mpad)
        inv_n = 1.0 / n_valid
        s1 = jnp.sum(acc_ref[...] * maskf, axis=1, keepdims=True)
        s2 = jnp.sum(acc_ref[...] * acc_ref[...] * maskf, axis=1, keepdims=True)
        mean = s1 * inv_n
        var = jnp.maximum(s2 * inv_n - mean * mean, 0.0)   # biased variance
        inv_std = jax.lax.rsqrt(var + eps)
        y = (acc_ref[...] - mean) * inv_std
        if alpha is not None:
            y = jnp.where(y >= 0.0, y, alpha * y)
        o_ref[...] = y.astype(o_ref.dtype)
    else:
        y = acc_ref[...] + b_ref[...]
        if alpha is not None:
            y = jnp.where(y >= 0.0, y, alpha * y)
        o_ref[...] = y.astype(o_ref.dtype)


def _vmem_limit_bytes(cin, k_dim, cout, mpad, xlen, out_itemsize):
    """Scoped-VMEM request: actual padded block/scratch footprint + headroom."""
    def tile_bytes(rows, cols, itemsize):
        sub = 8 * (4 // itemsize)            # 8 sublanes (f32) / 16 (bf16)
        return _round_up(rows, sub) * _round_up(cols, 128) * itemsize

    total = 0
    total += 2 * tile_bytes(cin, xlen, 2)               # x block (dbl-buffered)
    total += 2 * tile_bytes(cout, k_dim, 2)             # weights
    total += 2 * tile_bytes(cout, 1, 4)                 # bias
    total += 2 * tile_bytes(1, mpad, 4)                 # mask
    total += 2 * tile_bytes(cout, mpad, out_itemsize)   # output block
    total += tile_bytes(k_dim, mpad, 2)                 # im2col patch scratch
    total += tile_bytes(cout, mpad, 4)                  # f32 accumulator
    limit = max(total * 3 // 2, 32 * 1024 * 1024)       # ~50% headroom
    return int(min(limit, 128 * 1024 * 1024))


def _conv_layer(x, w, b, stride, *, alpha, do_norm, out_dtype, eps=1e-5):
    """x: (N, Cin, H, W).  w: (Cout, Cin, 4, 4).  b: (Cout,).

    Matches PyTorch Conv2d(kernel=4, padding=1, stride) [+ InstanceNorm2d
    (affine=False) + LeakyReLU] on NCHW inputs; returns (N, Cout, Ho, Wo).
    """
    N, Cin, H, W = x.shape
    Cout = w.shape[0]

    # Spatial zero padding (padding=1); XLA fuses this with the following
    # space-to-depth / flatten copy.
    xp = jnp.pad(x, ((0, 0), (0, 0), (1, 1), (1, 1)))

    if stride == 2:
        # Space-to-depth rewrites the k=4/s=2 conv as a k=2/s=1 conv over
        # 4*Cin channels, so the kernel only needs contiguous constant shifts.
        assert H % 2 == 0 and W % 2 == 0, "stride-2 layers require even H, W"
        Hs, Ws = (H + 2) // 2, (W + 2) // 2
        k = 2
        Ceff = 4 * Cin
        xs = xp.reshape(N, Cin, Hs, 2, Ws, 2)
        xs = xs.transpose(0, 3, 5, 1, 2, 4).reshape(N, Ceff, Hs, Ws)
        # W[co, ci, 2i+di, 2j+dj] -> W2[co, (i,j), (di,dj,ci)]
        w_t = w.reshape(Cout, Cin, 2, 2, 2, 2).transpose(0, 2, 4, 3, 5, 1)
        w_t = w_t.reshape(Cout, 4, Ceff)
        Ho, Wo = H // 2, W // 2
    else:
        Hs, Ws = H + 2, W + 2
        k = 4
        Ceff = Cin
        xs = xp
        w_t = w.transpose(0, 2, 3, 1).reshape(Cout, 16, Cin)
        Ho, Wo = H - 1, W - 1

    T = k * k
    Ceff_p = _round_up(Ceff, 8)
    Cout_p = _round_up(Cout, 8)
    if Ceff_p != Ceff:
        xs = jnp.pad(xs, ((0, 0), (0, Ceff_p - Ceff), (0, 0), (0, 0)))
        w_t = jnp.pad(w_t, ((0, 0), (0, 0), (0, Ceff_p - Ceff)))
    if Cout_p != Cout:
        w_t = jnp.pad(w_t, ((0, Cout_p - Cout), (0, 0), (0, 0)))
        b = jnp.pad(b, (0, Cout_p - Cout))
    K = T * Ceff_p

    Mval = Ho * Ws                      # flat output positions (incl. garbage cols)
    Mpad = _round_up(Mval, 128)         # lane-dense output slab width
    shift_max = (k - 1) * (Ws + 1)
    Xlen = _round_up(Mpad + shift_max, 128)

    # bf16 inter-layer activations (no-op cast after the first layer).
    x_flat = xs.reshape(N, Ceff_p, Hs * Ws)
    x_flat = jnp.pad(x_flat, ((0, 0), (0, 0), (0, Xlen - Hs * Ws)))
    x_flat = x_flat.astype(jnp.bfloat16)
    w_mat = w_t.reshape(Cout_p, K).astype(jnp.bfloat16)
    b_col = b.reshape(Cout_p, 1).astype(jnp.float32)

    a = jnp.arange(Mpad, dtype=jnp.int32)
    maskf = (((a % Ws) < Wo) & (a < Mval)).astype(jnp.float32).reshape(1, Mpad)

    kern = functools.partial(
        _conv_in_lrelu_kernel,
        k=k, ws=Ws, cin=Ceff_p, mpad=Mpad, n_valid=float(Ho * Wo),
        alpha=alpha, do_norm=do_norm, eps=eps)

    out = pl.pallas_call(
        kern,
        out_shape=jax.ShapeDtypeStruct((N, Cout_p, Mpad), out_dtype),
        grid_spec=pltpu.PrefetchScalarGridSpec(
            num_scalar_prefetch=0,
            grid=(N,),
            in_specs=[
                pl.BlockSpec((None, Ceff_p, Xlen), lambda n: (n, 0, 0)),
                pl.BlockSpec((Cout_p, K), lambda n: (0, 0)),   # resident weights
                pl.BlockSpec((Cout_p, 1), lambda n: (0, 0)),
                pl.BlockSpec((1, Mpad), lambda n: (0, 0)),
            ],
            out_specs=pl.BlockSpec((None, Cout_p, Mpad), lambda n: (n, 0, 0)),
            scratch_shapes=[
                pltpu.VMEM((K, Mpad), jnp.bfloat16),       # im2col patches
                pltpu.VMEM((Cout_p, Mpad), jnp.float32),   # f32 accumulator
            ],
        ),
        compiler_params=pltpu.CompilerParams(
            dimension_semantics=("parallel",),
            vmem_limit_bytes=_vmem_limit_bytes(
                Ceff_p, K, Cout_p, Mpad, Xlen,
                jnp.dtype(out_dtype).itemsize)),
    )(x_flat, w_mat, b_col, maskf)

    # Drop padded channels and garbage columns (wo >= Wo); XLA fuses this slice
    # with the next layer's pad / space-to-depth copy.
    out = out[:, :Cout, :Mval].reshape(N, Cout, Ho, Ws)[:, :, :, :Wo]
    return out


# -----------------------------------------------------------------------------
# Discriminator: parameter init + forward
# -----------------------------------------------------------------------------
def init_discriminator_params(key, in_channels, out_channels, nb_layers=3):
    # (cin, cout, stride) per conv, mirroring the PyTorch __init__.
    specs = [(in_channels, out_channels, 2)]
    in_f, out_f = 1, 2
    for _ in range(1, nb_layers):
        specs.append((out_channels * in_f, out_channels * out_f, 2))
        in_f = out_f
        out_f *= 2
    out_f = min(2 ** nb_layers, 8)
    specs.append((out_channels * in_f, out_channels * out_f, 1))
    specs.append((out_channels * out_f, 1, 1))

    params = []
    for (cin, cout, s) in specs:
        key, k1, k2 = jax.random.split(key, 3)
        fan_in = cin * 4 * 4
        bound = 1.0 / (fan_in ** 0.5)  # PyTorch default uniform init bound
        wgt = jax.random.uniform(k1, (cout, cin, 4, 4), jnp.float32, -bound, bound)
        bia = jax.random.uniform(k2, (cout,), jnp.float32, -bound, bound)
        params.append((wgt, bia, s))
    return params


def discriminator_forward(x_nchw, params, alpha=0.2):
    # Native NCHW pipeline (no layout transposes at the model boundary).
    x = x_nchw
    n = len(params)
    for idx, (w, b, s) in enumerate(params):
        is_last = idx == n - 1
        do_norm = (idx != 0) and (not is_last)
        act = None if is_last else alpha
        out_dtype = jnp.float32 if is_last else jnp.bfloat16
        x = _conv_layer(x, w, b, stride=s, alpha=act, do_norm=do_norm,
                        out_dtype=out_dtype)
    return x


if __name__ == "__main__":
    key = jax.random.PRNGKey(0)
    k_param, k_input = jax.random.split(key)

    # Small shapes: spatial must be >= 32 so the 5 stacked 4x4 convs stay valid.
    batch, in_channels, out_channels, spatial = 2, 3, 8, 32
    params = init_discriminator_params(k_param, in_channels, out_channels,
                                       nb_layers=3)
    x = jax.random.normal(k_input, (batch, in_channels, spatial, spatial),
                          jnp.float32)

    forward = jax.jit(functools.partial(discriminator_forward, params=params))
    out = forward(x)
    jax.block_until_ready(out)
    assert out.shape == (batch, 1, 2, 2), out.shape
    assert out.dtype == jnp.float32
    print("KERNEL_OK")
</pallas_src>

<mosaic_0001>
module attributes {stable_mosaic.version = 11 : i64} {
  func.func @_conv_in_lrelu_kernel(%arg0: i32, %arg1: memref<1x16x512xbf16, #tpu.memory_space<vmem>>, %arg2: memref<8x64xbf16, #tpu.memory_space<vmem>>, %arg3: memref<8x1xf32, #tpu.memory_space<vmem>>, %arg4: memref<1x384xf32, #tpu.memory_space<vmem>>, %arg5: memref<1x8x384xbf16, #tpu.memory_space<vmem>>, %arg6: memref<64x384xbf16, #tpu.memory_space<vmem>>, %arg7: memref<8x384xf32, #tpu.memory_space<vmem>>) attributes {dimension_semantics = [#tpu.dimension_semantics<parallel>], iteration_bounds = array<i64: 2>, scalar_prefetch = 0 : i64, scratch_operands = 2 : i64, tpu.core_type = #tpu.core_type<tc>, window_params = [{transform_indices = @transform_0, window_bounds = array<i64: 1, 16, 512>}, {pipeline_mode = #tpu.pipeline_mode<synchronous>, transform_indices = @transform_1, window_bounds = array<i64: 8, 64>}, {pipeline_mode = #tpu.pipeline_mode<synchronous>, transform_indices = @transform_2, window_bounds = array<i64: 8, 1>}, {pipeline_mode = #tpu.pipeline_mode<synchronous>, transform_indices = @transform_3, window_bounds = array<i64: 1, 384>}, {transform_indices = @transform_4, window_bounds = array<i64: 1, 8, 384>}]} {
    %c0 = arith.constant 0 : index
    %c0_0 = arith.constant 0 : index
    %c0_1 = arith.constant 0 : index
    %0 = vector.load %arg1[%c0, %c0_0, %c0_1] : memref<1x16x512xbf16, #tpu.memory_space<vmem>>, vector<1x16x384xbf16>
    %1 = vector.shape_cast %0 : vector<1x16x384xbf16> to vector<16x384xbf16>
    %c0_2 = arith.constant 0 : index
    %c0_3 = arith.constant 0 : index
    %2 = vector.load %arg6[%c0_2, %c0_3] : memref<64x384xbf16, #tpu.memory_space<vmem>>, vector<16x384xbf16>
    tpu.vector_store %arg6[%c0_2, %c0_3], %1 {strides = array<i32>} : memref<64x384xbf16, #tpu.memory_space<vmem>>, vector<16x384xbf16>,
    %c0_4 = arith.constant 0 : index
    %c0_5 = arith.constant 0 : index
    %c1 = arith.constant 1 : index
    %3 = vector.load %arg1[%c0_4, %c0_5, %c1] : memref<1x16x512xbf16, #tpu.memory_space<vmem>>, vector<1x16x384xbf16>
    %4 = vector.shape_cast %3 : vector<1x16x384xbf16> to vector<16x384xbf16>
    %c16 = arith.constant 16 : index
    %c0_6 = arith.constant 0 : index
    %5 = vector.load %arg6[%c16, %c0_6] : memref<64x384xbf16, #tpu.memory_space<vmem>>, vector<16x384xbf16>
    tpu.vector_store %arg6[%c16, %c0_6], %4 {strides = array<i32>} : memref<64x384xbf16, #tpu.memory_space<vmem>>, vector<16x384xbf16>,
    %c0_7 = arith.constant 0 : index
    %c0_8 = arith.constant 0 : index
    %c17 = arith.constant 17 : index
    %6 = vector.load %arg1[%c0_7, %c0_8, %c17] : memref<1x16x512xbf16, #tpu.memory_space<vmem>>, vector<1x16x384xbf16>
    %7 = vector.shape_cast %6 : vector<1x16x384xbf16> to vector<16x384xbf16>
    %c32 = arith.constant 32 : index
    %c0_9 = arith.constant 0 : index
    %8 = vector.load %arg6[%c32, %c0_9] : memref<64x384xbf16, #tpu.memory_space<vmem>>, vector<16x384xbf16>
    tpu.vector_store %arg6[%c32, %c0_9], %7 {strides = array<i32>} : memref<64x384xbf16, #tpu.memory_space<vmem>>, vector<16x384xbf16>,
    %c0_10 = arith.constant 0 : index
    %c0_11 = arith.constant 0 : index
    %c18 = arith.constant 18 : index
    %9 = vector.load %arg1[%c0_10, %c0_11, %c18] : memref<1x16x512xbf16, #tpu.memory_space<vmem>>, vector<1x16x384xbf16>
    %10 = vector.shape_cast %9 : vector<1x16x384xbf16> to vector<16x384xbf16>
    %c48 = arith.constant 48 : index
    %c0_12 = arith.constant 0 : index
    %11 = vector.load %arg6[%c48, %c0_12] : memref<64x384xbf16, #tpu.memory_space<vmem>>, vector<16x384xbf16>
    tpu.vector_store %arg6[%c48, %c0_12], %10 {strides = array<i32>} : memref<64x384xbf16, #tpu.memory_space<vmem>>, vector<16x384xbf16>,
    %c0_13 = arith.constant 0 : index
    %c0_14 = arith.constant 0 : index
    %12 = vector.load %arg2[%c0_13, %c0_14] : memref<8x64xbf16, #tpu.memory_space<vmem>>, vector<8x64xbf16>
    %c0_15 = arith.constant 0 : index
    %c0_16 = arith.constant 0 : index
    %13 = vector.load %arg6[%c0_15, %c0_16] : memref<64x384xbf16, #tpu.memory_space<vmem>>, vector<64x384xbf16>
    %cst = arith.constant dense<0.000000e+00> : vector<8x384xf32>
    %14 = tpu.matmul %12, %13, %cst {dimension_numbers = #tpu.dot_dimension_numbers<[1], [0], [0], [1], [0, 0, 1, 1], [], []>} : vector<8x64xbf16>, vector<64x384xbf16>, vector<8x384xf32> -> vector<8x384xf32>
    %c0_17 = arith.constant 0 : index
    %c0_18 = arith.constant 0 : index
    %15 = vector.load %arg7[%c0_17, %c0_18] : memref<8x384xf32, #tpu.memory_space<vmem>>, vector<8x384xf32>
    tpu.vector_store %arg7[%c0_17, %c0_18], %14 {strides = array<i32>} : memref<8x384xf32, #tpu.memory_space<vmem>>, vector<8x384xf32>,
    %c0_19 = arith.constant 0 : index
    %c0_20 = arith.constant 0 : index
    %16 = vector.load %arg7[%c0_19, %c0_20] : memref<8x384xf32, #tpu.memory_space<vmem>>, vector<8x384xf32>
    %c0_21 = arith.constant 0 : index
    %c0_22 = arith.constant 0 : index
    %17 = vector.load %arg3[%c0_21, %c0_22] : memref<8x1xf32, #tpu.memory_space<vmem>>, vector<8x1xf32>
    %18 = vector.broadcast %17 : vector<8x1xf32> to vector<8x384xf32>
    %19 = arith.addf %16, %18 : vector<8x384xf32>
    %cst_23 = arith.constant 0.000000e+00 : f32
    %20 = vector.broadcast %cst_23 : f32 to vector<8x384xf32>
    %21 = arith.cmpf oge, %19, %20 : vector<8x384xf32>
    %cst_24 = arith.constant 2.000000e-01 : f32
    %22 = vector.broadcast %cst_24 : f32 to vector<8x384xf32>
    %23 = arith.mulf %22, %19 : vector<8x384xf32>
    %24 = arith.select %21, %19, %23 : vector<8x384xi1>, vector<8x384xf32>
    %25 = arith.truncf %24 : vector<8x384xf32> to vector<8x384xbf16>
    %c0_25 = arith.constant 0 : index
    %c0_26 = arith.constant 0 : index
    %c0_27 = arith.constant 0 : index
    %26 = vector.load %arg5[%c0_25, %c0_26, %c0_27] : memref<1x8x384xbf16, #tpu.memory_space<vmem>>, vector<1x8x384xbf16>
    %27 = vector.shape_cast %26 : vector<1x8x384xbf16> to vector<8x384xbf16>
    %28 = vector.shape_cast %25 : vector<8x384xbf16> to vector<1x8x384xbf16>
    tpu.vector_store %arg5[%c0_25, %c0_26, %c0_27], %28 {strides = array<i32>} : memref<1x8x384xbf16, #tpu.memory_space<vmem>>, vector<1x8x384xbf16>,
    return
  }
  func.func @transform_0(%arg0: i32) -> (i32, i32, i32) {
    %c0_i32 = arith.constant 0 : i32
    %c0_i32_0 = arith.constant 0 : i32
    %c0_i32_1 = arith.constant 0 : i32
    return %arg0, %c0_i32, %c0_i32_0 : i32, i32, i32
  }
  func.func @transform_1(%arg0: i32) -> (i32, i32) {
    %c0_i32 = arith.constant 0 : i32
    %c0_i32_0 = arith.constant 0 : i32
    %c0_i32_1 = arith.constant 0 : i32
    return %c0_i32, %c0_i32_0 : i32, i32
  }
  func.func @transform_2(%arg0: i32) -> (i32, i32) {
    %c0_i32 = arith.constant 0 : i32
    %c0_i32_0 = arith.constant 0 : i32
    %c0_i32_1 = arith.constant 0 : i32
    return %c0_i32, %c0_i32_0 : i32, i32
  }
  func.func @transform_3(%arg0: i32) -> (i32, i32) {
    %c0_i32 = arith.constant 0 : i32
    %c0_i32_0 = arith.constant 0 : i32
    %c0_i32_1 = arith.constant 0 : i32
    return %c0_i32, %c0_i32_0 : i32, i32
  }
  func.func @transform_4(%arg0: i32) -> (i32, i32, i32) {
    %c0_i32 = arith.constant 0 : i32
    %c0_i32_0 = arith.constant 0 : i32
    %c0_i32_1 = arith.constant 0 : i32
    return %arg0, %c0_i32, %c0_i32_0 : i32, i32, i32
  }
}

module attributes {stable_mosaic.version = 11 : i64} {
  func.func @_conv_in_lrelu_kernel(%arg0: i32, %arg1: memref<1x32x256xbf16, #tpu.memory_space<vmem>>, %arg2: memref<16x128xbf16, #tpu.memory_space<vmem>>, %arg3: memref<16x1xf32, #tpu.memory_space<vmem>>, %arg4: memref<1x128xf32, #tpu.memory_space<vmem>>, %arg5: memref<1x16x128xbf16, #tpu.memory_space<vmem>>, %arg6: memref<128x128xbf16, #tpu.memory_space<vmem>>, %arg7: memref<16x128xf32, #tpu.memory_space<vmem>>) attributes {dimension_semantics = [#tpu.dimension_semantics<parallel>], iteration_bounds = array<i64: 2>, scalar_prefetch = 0 : i64, scratch_operands = 2 : i64, tpu.core_type = #tpu.core_type<tc>, window_params = [{transform_indices = @transform_0, window_bounds = array<i64: 1, 32, 256>}, {pipeline_mode = #tpu.pipeline_mode<synchronous>, transform_indices = @transform_1, window_bounds = array<i64: 16, 128>}, {pipeline_mode = #tpu.pipeline_mode<synchronous>, transform_indices = @transform_2, window_bounds = array<i64: 16, 1>}, {pipeline_mode = #tpu.pipeline_mode<synchronous>, transform_indices = @transform_3, window_bounds = array<i64: 1, 128>}, {transform_indices = @transform_4, window_bounds = array<i64: 1, 16, 128>}]} {
    %c0 = arith.constant 0 : index
    %c0_0 = arith.constant 0 : index
    %c0_1 = arith.constant 0 : index
    %0 = vector.load %arg1[%c0, %c0_0, %c0_1] : memref<1x32x256xbf16, #tpu.memory_space<vmem>>, vector<1x32x128xbf16>
    %1 = vector.shape_cast %0 : vector<1x32x128xbf16> to vector<32x128xbf16>
    %c0_2 = arith.constant 0 : index
    %c0_3 = arith.constant 0 : index
    %2 = vector.load %arg6[%c0_2, %c0_3] : memref<128x128xbf16, #tpu.memory_space<vmem>>, vector<32x128xbf16>
    tpu.vector_store %arg6[%c0_2, %c0_3], %1 {strides = array<i32>} : memref<128x128xbf16, #tpu.memory_space<vmem>>, vector<32x128xbf16>,
    %c0_4 = arith.constant 0 : index
    %c0_5 = arith.constant 0 : index
    %c1 = arith.constant 1 : index
    %3 = vector.load %arg1[%c0_4, %c0_5, %c1] : memref<1x32x256xbf16, #tpu.memory_space<vmem>>, vector<1x32x128xbf16>
    %4 = vector.shape_cast %3 : vector<1x32x128xbf16> to vector<32x128xbf16>
    %c32 = arith.constant 32 : index
    %c0_6 = arith.constant 0 : index
    %5 = vector.load %arg6[%c32, %c0_6] : memref<128x128xbf16, #tpu.memory_space<vmem>>, vector<32x128xbf16>
    tpu.vector_store %arg6[%c32, %c0_6], %4 {strides = array<i32>} : memref<128x128xbf16, #tpu.memory_space<vmem>>, vector<32x128xbf16>,
    %c0_7 = arith.constant 0 : index
    %c0_8 = arith.constant 0 : index
    %c9 = arith.constant 9 : index
    %6 = vector.load %arg1[%c0_7, %c0_8, %c9] : memref<1x32x256xbf16, #tpu.memory_space<vmem>>, vector<1x32x128xbf16>
    %7 = vector.shape_cast %6 : vector<1x32x128xbf16> to vector<32x128xbf16>
    %c64 = arith.constant 64 : index
    %c0_9 = arith.constant 0 : index
    %8 = vector.load %arg6[%c64, %c0_9] : memref<128x128xbf16, #tpu.memory_space<vmem>>, vector<32x128xbf16>
    tpu.vector_store %arg6[%c64, %c0_9], %7 {strides = array<i32>} : memref<128x128xbf16, #tpu.memory_space<vmem>>, vector<32x128xbf16>,
    %c0_10 = arith.constant 0 : index
    %c0_11 = arith.constant 0 : index
    %c10 = arith.constant 10 : index
    %9 = vector.load %arg1[%c0_10, %c0_11, %c10] : memref<1x32x256xbf16, #tpu.memory_space<vmem>>, vector<1x32x128xbf16>
    %10 = vector.shape_cast %9 : vector<1x32x128xbf16> to vector<32x128xbf16>
    %c96 = arith.constant 96 : index
    %c0_12 = arith.constant 0 : index
    %11 = vector.load %arg6[%c96, %c0_12] : memref<128x128xbf16, #tpu.memory_space<vmem>>, vector<32x128xbf16>
    tpu.vector_store %arg6[%c96, %c0_12], %10 {strides = array<i32>} : memref<128x128xbf16, #tpu.memory_space<vmem>>, vector<32x128xbf16>,
    %c0_13 = arith.constant 0 : index
    %c0_14 = arith.constant 0 : index
    %12 = vector.load %arg2[%c0_13, %c0_14] : memref<16x128xbf16, #tpu.memory_space<vmem>>, vector<16x128xbf16>
    %c0_15 = arith.constant 0 : index
    %c0_16 = arith.constant 0 : index
    %13 = vector.load %arg6[%c0_15, %c0_16] : memref<128x128xbf16, #tpu.memory_space<vmem>>, vector<128x128xbf16>
    %cst = arith.constant dense<0.000000e+00> : vector<16x128xf32>
    %14 = tpu.matmul %12, %13, %cst {dimension_numbers = #tpu.dot_dimension_numbers<[1], [0], [0], [1], [0, 0, 1, 1], [], []>} : vector<16x128xbf16>, vector<128x128xbf16>, vector<16x128xf32> -> vector<16x128xf32>
    %c0_17 = arith.constant 0 : index
    %c0_18 = arith.constant 0 : index
    %15 = vector.load %arg7[%c0_17, %c0_18] : memref<16x128xf32, #tpu.memory_space<vmem>>, vector<16x128xf32>
    tpu.vector_store %arg7[%c0_17, %c0_18], %14 {strides = array<i32>} : memref<16x128xf32, #tpu.memory_space<vmem>>, vector<16x128xf32>,
    %c0_19 = arith.constant 0 : index
    %c0_20 = arith.constant 0 : index
    %16 = vector.load %arg4[%c0_19, %c0_20] : memref<1x128xf32, #tpu.memory_space<vmem>>, vector<1x128xf32>
    %c0_21 = arith.constant 0 : index
    %c0_22 = arith.constant 0 : index
    %17 = vector.load %arg7[%c0_21, %c0_22] : memref<16x128xf32, #tpu.memory_space<vmem>>, vector<16x128xf32>
    %18 = vector.broadcast %16 : vector<1x128xf32> to vector<16x128xf32>
    %19 = arith.mulf %17, %18 : vector<16x128xf32>
    %cst_23 = arith.constant dense<0.000000e+00> : vector<16xf32>
    %20 = vector.multi_reduction <add>, %19, %cst_23 [1] : vector<16x128xf32> to vector<16xf32>
    %21 = vector.shape_cast %20 : vector<16xf32> to vector<16x1xf32>
    %c0_24 = arith.constant 0 : index
    %c0_25 = arith.constant 0 : index
    %22 = vector.load %arg7[%c0_24, %c0_25] : memref<16x128xf32, #tpu.memory_space<vmem>>, vector<16x128xf32>
    %c0_26 = arith.constant 0 : index
    %c0_27 = arith.constant 0 : index
    %23 = vector.load %arg7[%c0_26, %c0_27] : memref<16x128xf32, #tpu.memory_space<vmem>>, vector<16x128xf32>
    %24 = arith.mulf %22, %23 : vector<16x128xf32>
    %25 = vector.broadcast %16 : vector<1x128xf32> to vector<16x128xf32>
    %26 = arith.mulf %24, %25 : vector<16x128xf32>
    %cst_28 = arith.constant dense<0.000000e+00> : vector<16xf32>
    %27 = vector.multi_reduction <add>, %26, %cst_28 [1] : vector<16x128xf32> to vector<16xf32>
    %28 = vector.shape_cast %27 : vector<16xf32> to vector<16x1xf32>
    %cst_29 = arith.constant 1.562500e-02 : f32
    %29 = vector.broadcast %cst_29 : f32 to vector<16x1xf32>
    %30 = arith.mulf %21, %29 : vector<16x1xf32>
    %cst_30 = arith.constant 1.562500e-02 : f32
    %31 = vector.broadcast %cst_30 : f32 to vector<16x1xf32>
    %32 = arith.mulf %28, %31 : vector<16x1xf32>
    %33 = arith.mulf %30, %30 : vector<16x1xf32>
    %34 = arith.subf %32, %33 : vector<16x1xf32>
    %cst_31 = arith.constant 0.000000e+00 : f32
    %35 = vector.broadcast %cst_31 : f32 to vector<16x1xf32>
    %36 = arith.maximumf %34, %35 : vector<16x1xf32>
    %cst_32 = arith.constant 9.99999974E-6 : f32
    %37 = vector.broadcast %cst_32 : f32 to vector<16x1xf32>
    %38 = arith.addf %36, %37 : vector<16x1xf32>
    %39 = math.rsqrt %38 : vector<16x1xf32>
    %c0_33 = arith.constant 0 : index
    %c0_34 = arith.constant 0 : index
    %40 = vector.load %arg7[%c0_33, %c0_34] : memref<16x128xf32, #tpu.memory_space<vmem>>, vector<16x128xf32>
    %41 = vector.broadcast %30 : vector<16x1xf32> to vector<16x128xf32>
    %42 = arith.subf %40, %41 : vector<16x128xf32>
    %43 = vector.broadcast %39 : vector<16x1xf32> to vector<16x128xf32>
    %44 = arith.mulf %42, %43 : vector<16x128xf32>
    %cst_35 = arith.constant 0.000000e+00 : f32
    %45 = vector.broadcast %cst_35 : f32 to vector<16x128xf32>
    %46 = arith.cmpf oge, %44, %45 : vector<16x128xf32>
    %cst_36 = arith.constant 2.000000e-01 : f32
    %47 = vector.broadcast %cst_36 : f32 to vector<16x128xf32>
    %48 = arith.mulf %47, %44 : vector<16x128xf32>
    %49 = arith.select %46, %44, %48 : vector<16x128xi1>, vector<16x128xf32>
    %50 = arith.truncf %49 : vector<16x128xf32> to vector<16x128xbf16>
    %c0_37 = arith.constant 0 : index
    %c0_38 = arith.constant 0 : index
    %c0_39 = arith.constant 0 : index
    %51 = vector.load %arg5[%c0_37, %c0_38, %c0_39] : memref<1x16x128xbf16, #tpu.memory_space<vmem>>, vector<1x16x128xbf16>
    %52 = vector.shape_cast %51 : vector<1x16x128xbf16> to vector<16x128xbf16>
    %53 = vector.shape_cast %50 : vector<16x128xbf16> to vector<1x16x128xbf16>
    tpu.vector_store %arg5[%c0_37, %c0_38, %c0_39], %53 {strides = array<i32>} : memref<1x16x128xbf16, #tpu.memory_space<vmem>>, vector<1x16x128xbf16>,
    return
  }
  func.func @transform_0(%arg0: i32) -> (i32, i32, i32) {
    %c0_i32 = arith.constant 0 : i32
    %c0_i32_0 = arith.constant 0 : i32
    %c0_i32_1 = arith.constant 0 : i32
    return %arg0, %c0_i32, %c0_i32_0 : i32, i32, i32
  }
  func.func @transform_1(%arg0: i32) -> (i32, i32) {
    %c0_i32 = arith.constant 0 : i32
    %c0_i32_0 = arith.constant 0 : i32
    %c0_i32_1 = arith.constant 0 : i32
    return %c0_i32, %c0_i32_0 : i32, i32
  }
  func.func @transform_2(%arg0: i32) -> (i32, i32) {
    %c0_i32 = arith.constant 0 : i32
    %c0_i32_0 = arith.constant 0 : i32
    %c0_i32_1 = arith.constant 0 : i32
    return %c0_i32, %c0_i32_0 : i32, i32
  }
  func.func @transform_3(%arg0: i32) -> (i32, i32) {
    %c0_i32 = arith.constant 0 : i32
    %c0_i32_0 = arith.constant 0 : i32
    %c0_i32_1 = arith.constant 0 : i32
    return %c0_i32, %c0_i32_0 : i32, i32
  }
  func.func @transform_4(%arg0: i32) -> (i32, i32, i32) {
    %c0_i32 = arith.constant 0 : i32
    %c0_i32_0 = arith.constant 0 : i32
    %c0_i32_1 = arith.constant 0 : i32
    return %arg0, %c0_i32, %c0_i32_0 : i32, i32, i32
  }
}

module attributes {stable_mosaic.version = 11 : i64} {
  func.func @_conv_in_lrelu_kernel(%arg0: i32, %arg1: memref<1x64x256xbf16, #tpu.memory_space<vmem>>, %arg2: memref<32x256xbf16, #tpu.memory_space<vmem>>, %arg3: memref<32x1xf32, #tpu.memory_space<vmem>>, %arg4: memref<1x128xf32, #tpu.memory_space<vmem>>, %arg5: memref<1x32x128xbf16, #tpu.memory_space<vmem>>, %arg6: memref<256x128xbf16, #tpu.memory_space<vmem>>, %arg7: memref<32x128xf32, #tpu.memory_space<vmem>>) attributes {dimension_semantics = [#tpu.dimension_semantics<parallel>], iteration_bounds = array<i64: 2>, scalar_prefetch = 0 : i64, scratch_operands = 2 : i64, tpu.core_type = #tpu.core_type<tc>, window_params = [{transform_indices = @transform_0, window_bounds = array<i64: 1, 64, 256>}, {pipeline_mode = #tpu.pipeline_mode<synchronous>, transform_indices = @transform_1, window_bounds = array<i64: 32, 256>}, {pipeline_mode = #tpu.pipeline_mode<synchronous>, transform_indices = @transform_2, window_bounds = array<i64: 32, 1>}, {pipeline_mode = #tpu.pipeline_mode<synchronous>, transform_indices = @transform_3, window_bounds = array<i64: 1, 128>}, {transform_indices = @transform_4, window_bounds = array<i64: 1, 32, 128>}]} {
    %c0 = arith.constant 0 : index
    %c0_0 = arith.constant 0 : index
    %c0_1 = arith.constant 0 : index
    %0 = vector.load %arg1[%c0, %c0_0, %c0_1] : memref<1x64x256xbf16, #tpu.memory_space<vmem>>, vector<1x64x128xbf16>
    %1 = vector.shape_cast %0 : vector<1x64x128xbf16> to vector<64x128xbf16>
    %c0_2 = arith.constant 0 : index
    %c0_3 = arith.constant 0 : index
    %2 = vector.load %arg6[%c0_2, %c0_3] : memref<256x128xbf16, #tpu.memory_space<vmem>>, vector<64x128xbf16>
    tpu.vector_store %arg6[%c0_2, %c0_3], %1 {strides = array<i32>} : memref<256x128xbf16, #tpu.memory_space<vmem>>, vector<64x128xbf16>,
    %c0_4 = arith.constant 0 : index
    %c0_5 = arith.constant 0 : index
    %c1 = arith.constant 1 : index
    %3 = vector.load %arg1[%c0_4, %c0_5, %c1] : memref<1x64x256xbf16, #tpu.memory_space<vmem>>, vector<1x64x128xbf16>
    %4 = vector.shape_cast %3 : vector<1x64x128xbf16> to vector<64x128xbf16>
    %c64 = arith.constant 64 : index
    %c0_6 = arith.constant 0 : index
    %5 = vector.load %arg6[%c64, %c0_6] : memref<256x128xbf16, #tpu.memory_space<vmem>>, vector<64x128xbf16>
    tpu.vector_store %arg6[%c64, %c0_6], %4 {strides = array<i32>} : memref<256x128xbf16, #tpu.memory_space<vmem>>, vector<64x128xbf16>,
    %c0_7 = arith.constant 0 : index
    %c0_8 = arith.constant 0 : index
    %c5 = arith.constant 5 : index
    %6 = vector.load %arg1[%c0_7, %c0_8, %c5] : memref<1x64x256xbf16, #tpu.memory_space<vmem>>, vector<1x64x128xbf16>
    %7 = vector.shape_cast %6 : vector<1x64x128xbf16> to vector<64x128xbf16>
    %c128 = arith.constant 128 : index
    %c0_9 = arith.constant 0 : index
    %8 = vector.load %arg6[%c128, %c0_9] : memref<256x128xbf16, #tpu.memory_space<vmem>>, vector<64x128xbf16>
    tpu.vector_store %arg6[%c128, %c0_9], %7 {strides = array<i32>} : memref<256x128xbf16, #tpu.memory_space<vmem>>, vector<64x128xbf16>,
    %c0_10 = arith.constant 0 : index
    %c0_11 = arith.constant 0 : index
    %c6 = arith.constant 6 : index
    %9 = vector.load %arg1[%c0_10, %c0_11, %c6] : memref<1x64x256xbf16, #tpu.memory_space<vmem>>, vector<1x64x128xbf16>
    %10 = vector.shape_cast %9 : vector<1x64x128xbf16> to vector<64x128xbf16>
    %c192 = arith.constant 192 : index
    %c0_12 = arith.constant 0 : index
    %11 = vector.load %arg6[%c192, %c0_12] : memref<256x128xbf16, #tpu.memory_space<vmem>>, vector<64x128xbf16>
    tpu.vector_store %arg6[%c192, %c0_12], %10 {strides = array<i32>} : memref<256x128xbf16, #tpu.memory_space<vmem>>, vector<64x128xbf16>,
    %c0_13 = arith.constant 0 : index
    %c0_14 = arith.constant 0 : index
    %12 = vector.load %arg2[%c0_13, %c0_14] : memref<32x256xbf16, #tpu.memory_space<vmem>>, vector<32x256xbf16>
    %c0_15 = arith.constant 0 : index
    %c0_16 = arith.constant 0 : index
    %13 = vector.load %arg6[%c0_15, %c0_16] : memref<256x128xbf16, #tpu.memory_space<vmem>>, vector<256x128xbf16>
    %cst = arith.constant dense<0.000000e+00> : vector<32x128xf32>
    %14 = tpu.matmul %12, %13, %cst {dimension_numbers = #tpu.dot_dimension_numbers<[1], [0], [0], [1], [0, 0, 1, 1], [], []>} : vector<32x256xbf16>, vector<256x128xbf16>, vector<32x128xf32> -> vector<32x128xf32>
    %c0_17 = arith.constant 0 : index
    %c0_18 = arith.constant 0 : index
    %15 = vector.load %arg7[%c0_17, %c0_18] : memref<32x128xf32, #tpu.memory_space<vmem>>, vector<32x128xf32>
    tpu.vector_store %arg7[%c0_17, %c0_18], %14 {strides = array<i32>} : memref<32x128xf32, #tpu.memory_space<vmem>>, vector<32x128xf32>,
    %c0_19 = arith.constant 0 : index
    %c0_20 = arith.constant 0 : index
    %16 = vector.load %arg4[%c0_19, %c0_20] : memref<1x128xf32, #tpu.memory_space<vmem>>, vector<1x128xf32>
    %c0_21 = arith.constant 0 : index
    %c0_22 = arith.constant 0 : index
    %17 = vector.load %arg7[%c0_21, %c0_22] : memref<32x128xf32, #tpu.memory_space<vmem>>, vector<32x128xf32>
    %18 = vector.broadcast %16 : vector<1x128xf32> to vector<32x128xf32>
    %19 = arith.mulf %17, %18 : vector<32x128xf32>
    %cst_23 = arith.constant dense<0.000000e+00> : vector<32xf32>
    %20 = vector.multi_reduction <add>, %19, %cst_23 [1] : vector<32x128xf32> to vector<32xf32>
    %21 = vector.shape_cast %20 : vector<32xf32> to vector<32x1xf32>
    %c0_24 = arith.constant 0 : index
    %c0_25 = arith.constant 0 : index
    %22 = vector.load %arg7[%c0_24, %c0_25] : memref<32x128xf32, #tpu.memory_space<vmem>>, vector<32x128xf32>
    %c0_26 = arith.constant 0 : index
    %c0_27 = arith.constant 0 : index
    %23 = vector.load %arg7[%c0_26, %c0_27] : memref<32x128xf32, #tpu.memory_space<vmem>>, vector<32x128xf32>
    %24 = arith.mulf %22, %23 : vector<32x128xf32>
    %25 = vector.broadcast %16 : vector<1x128xf32> to vector<32x128xf32>
    %26 = arith.mulf %24, %25 : vector<32x128xf32>
    %cst_28 = arith.constant dense<0.000000e+00> : vector<32xf32>
    %27 = vector.multi_reduction <add>, %26, %cst_28 [1] : vector<32x128xf32> to vector<32xf32>
    %28 = vector.shape_cast %27 : vector<32xf32> to vector<32x1xf32>
    %cst_29 = arith.constant 6.250000e-02 : f32
    %29 = vector.broadcast %cst_29 : f32 to vector<32x1xf32>
    %30 = arith.mulf %21, %29 : vector<32x1xf32>
    %cst_30 = arith.constant 6.250000e-02 : f32
    %31 = vector.broadcast %cst_30 : f32 to vector<32x1xf32>
    %32 = arith.mulf %28, %31 : vector<32x1xf32>
    %33 = arith.mulf %30, %30 : vector<32x1xf32>
    %34 = arith.subf %32, %33 : vector<32x1xf32>
    %cst_31 = arith.constant 0.000000e+00 : f32
    %35 = vector.broadcast %cst_31 : f32 to vector<32x1xf32>
    %36 = arith.maximumf %34, %35 : vector<32x1xf32>
    %cst_32 = arith.constant 9.99999974E-6 : f32
    %37 = vector.broadcast %cst_32 : f32 to vector<32x1xf32>
    %38 = arith.addf %36, %37 : vector<32x1xf32>
    %39 = math.rsqrt %38 : vector<32x1xf32>
    %c0_33 = arith.constant 0 : index
    %c0_34 = arith.constant 0 : index
    %40 = vector.load %arg7[%c0_33, %c0_34] : memref<32x128xf32, #tpu.memory_space<vmem>>, vector<32x128xf32>
    %41 = vector.broadcast %30 : vector<32x1xf32> to vector<32x128xf32>
    %42 = arith.subf %40, %41 : vector<32x128xf32>
    %43 = vector.broadcast %39 : vector<32x1xf32> to vector<32x128xf32>
    %44 = arith.mulf %42, %43 : vector<32x128xf32>
    %cst_35 = arith.constant 0.000000e+00 : f32
    %45 = vector.broadcast %cst_35 : f32 to vector<32x128xf32>
    %46 = arith.cmpf oge, %44, %45 : vector<32x128xf32>
    %cst_36 = arith.constant 2.000000e-01 : f32
    %47 = vector.broadcast %cst_36 : f32 to vector<32x128xf32>
    %48 = arith.mulf %47, %44 : vector<32x128xf32>
    %49 = arith.select %46, %44, %48 : vector<32x128xi1>, vector<32x128xf32>
    %50 = arith.truncf %49 : vector<32x128xf32> to vector<32x128xbf16>
    %c0_37 = arith.constant 0 : index
    %c0_38 = arith.constant 0 : index
    %c0_39 = arith.constant 0 : index
    %51 = vector.load %arg5[%c0_37, %c0_38, %c0_39] : memref<1x32x128xbf16, #tpu.memory_space<vmem>>, vector<1x32x128xbf16>
    %52 = vector.shape_cast %51 : vector<1x32x128xbf16> to vector<32x128xbf16>
    %53 = vector.shape_cast %50 : vector<32x128xbf16> to vector<1x32x128xbf16>
    tpu.vector_store %arg5[%c0_37, %c0_38, %c0_39], %53 {strides = array<i32>} : memref<1x32x128xbf16, #tpu.memory_space<vmem>>, vector<1x32x128xbf16>,
    return
  }
  func.func @transform_0(%arg0: i32) -> (i32, i32, i32) {
    %c0_i32 = arith.constant 0 : i32
    %c0_i32_0 = arith.constant 0 : i32
    %c0_i32_1 = arith.constant 0 : i32
    return %arg0, %c0_i32, %c0_i32_0 : i32, i32, i32
  }
  func.func @transform_1(%arg0: i32) -> (i32, i32) {
    %c0_i32 = arith.constant 0 : i32
    %c0_i32_0 = arith.constant 0 : i32
    %c0_i32_1 = arith.constant 0 : i32
    return %c0_i32, %c0_i32_0 : i32, i32
  }
  func.func @transform_2(%arg0: i32) -> (i32, i32) {
    %c0_i32 = arith.constant 0 : i32
    %c0_i32_0 = arith.constant 0 : i32
    %c0_i32_1 = arith.constant 0 : i32
    return %c0_i32, %c0_i32_0 : i32, i32
  }
  func.func @transform_3(%arg0: i32) -> (i32, i32) {
    %c0_i32 = arith.constant 0 : i32
    %c0_i32_0 = arith.constant 0 : i32
    %c0_i32_1 = arith.constant 0 : i32
    return %c0_i32, %c0_i32_0 : i32, i32
  }
  func.func @transform_4(%arg0: i32) -> (i32, i32, i32) {
    %c0_i32 = arith.constant 0 : i32
    %c0_i32_0 = arith.constant 0 : i32
    %c0_i32_1 = arith.constant 0 : i32
    return %arg0, %c0_i32, %c0_i32_0 : i32, i32, i32
  }
}

module attributes {stable_mosaic.version = 11 : i64} {
  func.func @_conv_in_lrelu_kernel(%arg0: i32, %arg1: memref<1x32x256xbf16, #tpu.memory_space<vmem>>, %arg2: memref<64x512xbf16, #tpu.memory_space<vmem>>, %arg3: memref<64x1xf32, #tpu.memory_space<vmem>>, %arg4: memref<1x128xf32, #tpu.memory_space<vmem>>, %arg5: memref<1x64x128xbf16, #tpu.memory_space<vmem>>, %arg6: memref<512x128xbf16, #tpu.memory_space<vmem>>, %arg7: memref<64x128xf32, #tpu.memory_space<vmem>>) attributes {dimension_semantics = [#tpu.dimension_semantics<parallel>], iteration_bounds = array<i64: 2>, scalar_prefetch = 0 : i64, scratch_operands = 2 : i64, tpu.core_type = #tpu.core_type<tc>, window_params = [{transform_indices = @transform_0, window_bounds = array<i64: 1, 32, 256>}, {pipeline_mode = #tpu.pipeline_mode<synchronous>, transform_indices = @transform_1, window_bounds = array<i64: 64, 512>}, {pipeline_mode = #tpu.pipeline_mode<synchronous>, transform_indices = @transform_2, window_bounds = array<i64: 64, 1>}, {pipeline_mode = #tpu.pipeline_mode<synchronous>, transform_indices = @transform_3, window_bounds = array<i64: 1, 128>}, {transform_indices = @transform_4, window_bounds = array<i64: 1, 64, 128>}]} {
    %c0 = arith.constant 0 : index
    %c0_0 = arith.constant 0 : index
    %c0_1 = arith.constant 0 : index
    %0 = vector.load %arg1[%c0, %c0_0, %c0_1] : memref<1x32x256xbf16, #tpu.memory_space<vmem>>, vector<1x32x128xbf16>
    %1 = vector.shape_cast %0 : vector<1x32x128xbf16> to vector<32x128xbf16>
    %c0_2 = arith.constant 0 : index
    %c0_3 = arith.constant 0 : index
    %2 = vector.load %arg6[%c0_2, %c0_3] : memref<512x128xbf16, #tpu.memory_space<vmem>>, vector<32x128xbf16>
    tpu.vector_store %arg6[%c0_2, %c0_3], %1 {strides = array<i32>} : memref<512x128xbf16, #tpu.memory_space<vmem>>, vector<32x128xbf16>,
    %c0_4 = arith.constant 0 : index
    %c0_5 = arith.constant 0 : index
    %c1 = arith.constant 1 : index
    %3 = vector.load %arg1[%c0_4, %c0_5, %c1] : memref<1x32x256xbf16, #tpu.memory_space<vmem>>, vector<1x32x128xbf16>
    %4 = vector.shape_cast %3 : vector<1x32x128xbf16> to vector<32x128xbf16>
    %c32 = arith.constant 32 : index
    %c0_6 = arith.constant 0 : index
    %5 = vector.load %arg6[%c32, %c0_6] : memref<512x128xbf16, #tpu.memory_space<vmem>>, vector<32x128xbf16>
    tpu.vector_store %arg6[%c32, %c0_6], %4 {strides = array<i32>} : memref<512x128xbf16, #tpu.memory_space<vmem>>, vector<32x128xbf16>,
    %c0_7 = arith.constant 0 : index
    %c0_8 = arith.constant 0 : index
    %c2 = arith.constant 2 : index
    %6 = vector.load %arg1[%c0_7, %c0_8, %c2] : memref<1x32x256xbf16, #tpu.memory_space<vmem>>, vector<1x32x128xbf16>
    %7 = vector.shape_cast %6 : vector<1x32x128xbf16> to vector<32x128xbf16>
    %c64 = arith.constant 64 : index
    %c0_9 = arith.constant 0 : index
    %8 = vector.load %arg6[%c64, %c0_9] : memref<512x128xbf16, #tpu.memory_space<vmem>>, vector<32x128xbf16>
    tpu.vector_store %arg6[%c64, %c0_9], %7 {strides = array<i32>} : memref<512x128xbf16, #tpu.memory_space<vmem>>, vector<32x128xbf16>,
    %c0_10 = arith.constant 0 : index
    %c0_11 = arith.constant 0 : index
    %c3 = arith.constant 3 : index
    %9 = vector.load %arg1[%c0_10, %c0_11, %c3] : memref<1x32x256xbf16, #tpu.memory_space<vmem>>, vector<1x32x128xbf16>
    %10 = vector.shape_cast %9 : vector<1x32x128xbf16> to vector<32x128xbf16>
    %c96 = arith.constant 96 : index
    %c0_12 = arith.constant 0 : index
    %11 = vector.load %arg6[%c96, %c0_12] : memref<512x128xbf16, #tpu.memory_space<vmem>>, vector<32x128xbf16>
    tpu.vector_store %arg6[%c96, %c0_12], %10 {strides = array<i32>} : memref<512x128xbf16, #tpu.memory_space<vmem>>, vector<32x128xbf16>,
    %c0_13 = arith.constant 0 : index
    %c0_14 = arith.constant 0 : index
    %c6 = arith.constant 6 : index
    %12 = vector.load %arg1[%c0_13, %c0_14, %c6] : memref<1x32x256xbf16, #tpu.memory_space<vmem>>, vector<1x32x128xbf16>
    %13 = vector.shape_cast %12 : vector<1x32x128xbf16> to vector<32x128xbf16>
    %c128 = arith.constant 128 : index
    %c0_15 = arith.constant 0 : index
    %14 = vector.load %arg6[%c128, %c0_15] : memref<512x128xbf16, #tpu.memory_space<vmem>>, vector<32x128xbf16>
    tpu.vector_store %arg6[%c128, %c0_15], %13 {strides = array<i32>} : memref<512x128xbf16, #tpu.memory_space<vmem>>, vector<32x128xbf16>,
    %c0_16 = arith.constant 0 : index
    %c0_17 = arith.constant 0 : index
    %c7 = arith.constant 7 : index
    %15 = vector.load %arg1[%c0_16, %c0_17, %c7] : memref<1x32x256xbf16, #tpu.memory_space<vmem>>, vector<1x32x128xbf16>
    %16 = vector.shape_cast %15 : vector<1x32x128xbf16> to vector<32x128xbf16>
    %c160 = arith.constant 160 : index
    %c0_18 = arith.constant 0 : index
    %17 = vector.load %arg6[%c160, %c0_18] : memref<512x128xbf16, #tpu.memory_space<vmem>>, vector<32x128xbf16>
    tpu.vector_store %arg6[%c160, %c0_18], %16 {strides = array<i32>} : memref<512x128xbf16, #tpu.memory_space<vmem>>, vector<32x128xbf16>,
    %c0_19 = arith.constant 0 : index
    %c0_20 = arith.constant 0 : index
    %c8 = arith.constant 8 : index
    %18 = vector.load %arg1[%c0_19, %c0_20, %c8] : memref<1x32x256xbf16, #tpu.memory_space<vmem>>, vector<1x32x128xbf16>
    %19 = vector.shape_cast %18 : vector<1x32x128xbf16> to vector<32x128xbf16>
    %c192 = arith.constant 192 : index
    %c0_21 = arith.constant 0 : index
    %20 = vector.load %arg6[%c192, %c0_21] : memref<512x128xbf16, #tpu.memory_space<vmem>>, vector<32x128xbf16>
    tpu.vector_store %arg6[%c192, %c0_21], %19 {strides = array<i32>} : memref<512x128xbf16, #tpu.memory_space<vmem>>, vector<32x128xbf16>,
    %c0_22 = arith.constant 0 : index
    %c0_23 = arith.constant 0 : index
    %c9 = arith.constant 9 : index
    %21 = vector.load %arg1[%c0_22, %c0_23, %c9] : memref<1x32x256xbf16, #tpu.memory_space<vmem>>, vector<1x32x128xbf16>
    %22 = vector.shape_cast %21 : vector<1x32x128xbf16> to vector<32x128xbf16>
    %c224 = arith.constant 224 : index
    %c0_24 = arith.constant 0 : index
    %23 = vector.load %arg6[%c224, %c0_24] : memref<512x128xbf16, #tpu.memory_space<vmem>>, vector<32x128xbf16>
    tpu.vector_store %arg6[%c224, %c0_24], %22 {strides = array<i32>} : memref<512x128xbf16, #tpu.memory_space<vmem>>, vector<32x128xbf16>,
    %c0_25 = arith.constant 0 : index
    %c0_26 = arith.constant 0 : index
    %c12 = arith.constant 12 : index
    %24 = vector.load %arg1[%c0_25, %c0_26, %c12] : memref<1x32x256xbf16, #tpu.memory_space<vmem>>, vector<1x32x128xbf16>
    %25 = vector.shape_cast %24 : vector<1x32x128xbf16> to vector<32x128xbf16>
    %c256 = arith.constant 256 : index
    %c0_27 = arith.constant 0 : index
    %26 = vector.load %arg6[%c256, %c0_27] : memref<512x128xbf16, #tpu.memory_space<vmem>>, vector<32x128xbf16>
    tpu.vector_store %arg6[%c256, %c0_27], %25 {strides = array<i32>} : memref<512x128xbf16, #tpu.memory_space<vmem>>, vector<32x128xbf16>,
    %c0_28 = arith.constant 0 : index
    %c0_29 = arith.constant 0 : index
    %c13 = arith.constant 13 : index
    %27 = vector.load %arg1[%c0_28, %c0_29, %c13] : memref<1x32x256xbf16, #tpu.memory_space<vmem>>, vector<1x32x128xbf16>
    %28 = vector.shape_cast %27 : vector<1x32x128xbf16> to vector<32x128xbf16>
    %c288 = arith.constant 288 : index
    %c0_30 = arith.constant 0 : index
    %29 = vector.load %arg6[%c288, %c0_30] : memref<512x128xbf16, #tpu.memory_space<vmem>>, vector<32x128xbf16>
    tpu.vector_store %arg6[%c288, %c0_30], %28 {strides = array<i32>} : memref<512x128xbf16, #tpu.memory_space<vmem>>, vector<32x128xbf16>,
    %c0_31 = arith.constant 0 : index
    %c0_32 = arith.constant 0 : index
    %c14 = arith.constant 14 : index
    %30 = vector.load %arg1[%c0_31, %c0_32, %c14] : memref<1x32x256xbf16, #tpu.memory_space<vmem>>, vector<1x32x128xbf16>
    %31 = vector.shape_cast %30 : vector<1x32x128xbf16> to vector<32x128xbf16>
    %c320 = arith.constant 320 : index
    %c0_33 = arith.constant 0 : index
    %32 = vector.load %arg6[%c320, %c0_33] : memref<512x128xbf16, #tpu.memory_space<vmem>>, vector<32x128xbf16>
    tpu.vector_store %arg6[%c320, %c0_33], %31 {strides = array<i32>} : memref<512x128xbf16, #tpu.memory_space<vmem>>, vector<32x128xbf16>,
    %c0_34 = arith.constant 0 : index
    %c0_35 = arith.constant 0 : index
    %c15 = arith.constant 15 : index
    %33 = vector.load %arg1[%c0_34, %c0_35, %c15] : memref<1x32x256xbf16, #tpu.memory_space<vmem>>, vector<1x32x128xbf16>
    %34 = vector.shape_cast %33 : vector<1x32x128xbf16> to vector<32x128xbf16>
    %c352 = arith.constant 352 : index
    %c0_36 = arith.constant 0 : index
    %35 = vector.load %arg6[%c352, %c0_36] : memref<512x128xbf16, #tpu.memory_space<vmem>>, vector<32x128xbf16>
    tpu.vector_store %arg6[%c352, %c0_36], %34 {strides = array<i32>} : memref<512x128xbf16, #tpu.memory_space<vmem>>, vector<32x128xbf16>,
    %c0_37 = arith.constant 0 : index
    %c0_38 = arith.constant 0 : index
    %c18 = arith.constant 18 : index
    %36 = vector.load %arg1[%c0_37, %c0_38, %c18] : memref<1x32x256xbf16, #tpu.memory_space<vmem>>, vector<1x32x128xbf16>
    %37 = vector.shape_cast %36 : vector<1x32x128xbf16> to vector<32x128xbf16>
    %c384 = arith.constant 384 : index
    %c0_39 = arith.constant 0 : index
    %38 = vector.load %arg6[%c384, %c0_39] : memref<512x128xbf16, #tpu.memory_space<vmem>>, vector<32x128xbf16>
    tpu.vector_store %arg6[%c384, %c0_39], %37 {strides = array<i32>} : memref<512x128xbf16, #tpu.memory_space<vmem>>, vector<32x128xbf16>,
    %c0_40 = arith.constant 0 : index
    %c0_41 = arith.constant 0 : index
    %c19 = arith.constant 19 : index
    %39 = vector.load %arg1[%c0_40, %c0_41, %c19] : memref<1x32x256xbf16, #tpu.memory_space<vmem>>, vector<1x32x128xbf16>
    %40 = vector.shape_cast %39 : vector<1x32x128xbf16> to vector<32x128xbf16>
    %c416 = arith.constant 416 : index
    %c0_42 = arith.constant 0 : index
    %41 = vector.load %arg6[%c416, %c0_42] : memref<512x128xbf16, #tpu.memory_space<vmem>>, vector<32x128xbf16>
    tpu.vector_store %arg6[%c416, %c0_42], %40 {strides = array<i32>} : memref<512x128xbf16, #tpu.memory_space<vmem>>, vector<32x128xbf16>,
    %c0_43 = arith.constant 0 : index
    %c0_44 = arith.constant 0 : index
    %c20 = arith.constant 20 : index
    %42 = vector.load %arg1[%c0_43, %c0_44, %c20] : memref<1x32x256xbf16, #tpu.memory_space<vmem>>, vector<1x32x128xbf16>
    %43 = vector.shape_cast %42 : vector<1x32x128xbf16> to vector<32x128xbf16>
    %c448 = arith.constant 448 : index
    %c0_45 = arith.constant 0 : index
    %44 = vector.load %arg6[%c448, %c0_45] : memref<512x128xbf16, #tpu.memory_space<vmem>>, vector<32x128xbf16>
    tpu.vector_store %arg6[%c448, %c0_45], %43 {strides = array<i32>} : memref<512x128xbf16, #tpu.memory_space<vmem>>, vector<32x128xbf16>,
    %c0_46 = arith.constant 0 : index
    %c0_47 = arith.constant 0 : index
    %c21 = arith.constant 21 : index
    %45 = vector.load %arg1[%c0_46, %c0_47, %c21] : memref<1x32x256xbf16, #tpu.memory_space<vmem>>, vector<1x32x128xbf16>
    %46 = vector.shape_cast %45 : vector<1x32x128xbf16> to vector<32x128xbf16>
    %c480 = arith.constant 480 : index
    %c0_48 = arith.constant 0 : index
    %47 = vector.load %arg6[%c480, %c0_48] : memref<512x128xbf16, #tpu.memory_space<vmem>>, vector<32x128xbf16>
    tpu.vector_store %arg6[%c480, %c0_48], %46 {strides = array<i32>} : memref<512x128xbf16, #tpu.memory_space<vmem>>, vector<32x128xbf16>,
    %c0_49 = arith.constant 0 : index
    %c0_50 = arith.constant 0 : index
    %48 = vector.load %arg2[%c0_49, %c0_50] : memref<64x512xbf16, #tpu.memory_space<vmem>>, vector<64x512xbf16>
    %c0_51 = arith.constant 0 : index
    %c0_52 = arith.constant 0 : index
    %49 = vector.load %arg6[%c0_51, %c0_52] : memref<512x128xbf16, #tpu.memory_space<vmem>>, vector<512x128xbf16>
    %cst = arith.constant dense<0.000000e+00> : vector<64x128xf32>
    %50 = tpu.matmul %48, %49, %cst {dimension_numbers = #tpu.dot_dimension_numbers<[1], [0], [0], [1], [0, 0, 1, 1], [], []>} : vector<64x512xbf16>, vector<512x128xbf16>, vector<64x128xf32> -> vector<64x128xf32>
    %c0_53 = arith.constant 0 : index
    %c0_54 = arith.constant 0 : index
    %51 = vector.load %arg7[%c0_53, %c0_54] : memref<64x128xf32, #tpu.memory_space<vmem>>, vector<64x128xf32>
    tpu.vector_store %arg7[%c0_53, %c0_54], %50 {strides = array<i32>} : memref<64x128xf32, #tpu.memory_space<vmem>>, vector<64x128xf32>,
    %c0_55 = arith.constant 0 : index
    %c0_56 = arith.constant 0 : index
    %52 = vector.load %arg4[%c0_55, %c0_56] : memref<1x128xf32, #tpu.memory_space<vmem>>, vector<1x128xf32>
    %c0_57 = arith.constant 0 : index
    %c0_58 = arith.constant 0 : index
    %53 = vector.load %arg7[%c0_57, %c0_58] : memref<64x128xf32, #tpu.memory_space<vmem>>, vector<64x128xf32>
    %54 = vector.broadcast %52 : vector<1x128xf32> to vector<64x128xf32>
    %55 = arith.mulf %53, %54 : vector<64x128xf32>
    %cst_59 = arith.constant dense<0.000000e+00> : vector<64xf32>
    %56 = vector.multi_reduction <add>, %55, %cst_59 [1] : vector<64x128xf32> to vector<64xf32>
    %57 = vector.shape_cast %56 : vector<64xf32> to vector<64x1xf32>
    %c0_60 = arith.constant 0 : index
    %c0_61 = arith.constant 0 : index
    %58 = vector.load %arg7[%c0_60, %c0_61] : memref<64x128xf32, #tpu.memory_space<vmem>>, vector<64x128xf32>
    %c0_62 = arith.constant 0 : index
    %c0_63 = arith.constant 0 : index
    %59 = vector.load %arg7[%c0_62, %c0_63] : memref<64x128xf32, #tpu.memory_space<vmem>>, vector<64x128xf32>
    %60 = arith.mulf %58, %59 : vector<64x128xf32>
    %61 = vector.broadcast %52 : vector<1x128xf32> to vector<64x128xf32>
    %62 = arith.mulf %60, %61 : vector<64x128xf32>
    %cst_64 = arith.constant dense<0.000000e+00> : vector<64xf32>
    %63 = vector.multi_reduction <add>, %62, %cst_64 [1] : vector<64x128xf32> to vector<64xf32>
    %64 = vector.shape_cast %63 : vector<64xf32> to vector<64x1xf32>
    %cst_65 = arith.constant 0.111111112 : f32
    %65 = vector.broadcast %cst_65 : f32 to vector<64x1xf32>
    %66 = arith.mulf %57, %65 : vector<64x1xf32>
    %cst_66 = arith.constant 0.111111112 : f32
    %67 = vector.broadcast %cst_66 : f32 to vector<64x1xf32>
    %68 = arith.mulf %64, %67 : vector<64x1xf32>
    %69 = arith.mulf %66, %66 : vector<64x1xf32>
    %70 = arith.subf %68, %69 : vector<64x1xf32>
    %cst_67 = arith.constant 0.000000e+00 : f32
    %71 = vector.broadcast %cst_67 : f32 to vector<64x1xf32>
    %72 = arith.maximumf %70, %71 : vector<64x1xf32>
    %cst_68 = arith.constant 9.99999974E-6 : f32
    %73 = vector.broadcast %cst_68 : f32 to vector<64x1xf32>
    %74 = arith.addf %72, %73 : vector<64x1xf32>
    %75 = math.rsqrt %74 : vector<64x1xf32>
    %c0_69 = arith.constant 0 : index
    %c0_70 = arith.constant 0 : index
    %76 = vector.load %arg7[%c0_69, %c0_70] : memref<64x128xf32, #tpu.memory_space<vmem>>, vector<64x128xf32>
    %77 = vector.broadcast %66 : vector<64x1xf32> to vector<64x128xf32>
    %78 = arith.subf %76, %77 : vector<64x128xf32>
    %79 = vector.broadcast %75 : vector<64x1xf32> to vector<64x128xf32>
    %80 = arith.mulf %78, %79 : vector<64x128xf32>
    %cst_71 = arith.constant 0.000000e+00 : f32
    %81 = vector.broadcast %cst_71 : f32 to vector<64x128xf32>
    %82 = arith.cmpf oge, %80, %81 : vector<64x128xf32>
    %cst_72 = arith.constant 2.000000e-01 : f32
    %83 = vector.broadcast %cst_72 : f32 to vector<64x128xf32>
    %84 = arith.mulf %83, %80 : vector<64x128xf32>
    %85 = arith.select %82, %80, %84 : vector<64x128xi1>, vector<64x128xf32>
    %86 = arith.truncf %85 : vector<64x128xf32> to vector<64x128xbf16>
    %c0_73 = arith.constant 0 : index
    %c0_74 = arith.constant 0 : index
    %c0_75 = arith.constant 0 : index
    %87 = vector.load %arg5[%c0_73, %c0_74, %c0_75] : memref<1x64x128xbf16, #tpu.memory_space<vmem>>, vector<1x64x128xbf16>
    %88 = vector.shape_cast %87 : vector<1x64x128xbf16> to vector<64x128xbf16>
    %89 = vector.shape_cast %86 : vector<64x128xbf16> to vector<1x64x128xbf16>
    tpu.vector_store %arg5[%c0_73, %c0_74, %c0_75], %89 {strides = array<i32>} : memref<1x64x128xbf16, #tpu.memory_space<vmem>>, vector<1x64x128xbf16>,
    return
  }
  func.func @transform_0(%arg0: i32) -> (i32, i32, i32) {
    %c0_i32 = arith.constant 0 : i32
    %c0_i32_0 = arith.constant 0 : i32
    %c0_i32_1 = arith.constant 0 : i32
    return %arg0, %c0_i32, %c0_i32_0 : i32, i32, i32
  }
  func.func @transform_1(%arg0: i32) -> (i32, i32) {
    %c0_i32 = arith.constant 0 : i32
    %c0_i32_0 = arith.constant 0 : i32
    %c0_i32_1 = arith.constant 0 : i32
    return %c0_i32, %c0_i32_0 : i32, i32
  }
  func.func @transform_2(%arg0: i32) -> (i32, i32) {
    %c0_i32 = arith.constant 0 : i32
    %c0_i32_0 = arith.constant 0 : i32
    %c0_i32_1 = arith.constant 0 : i32
    return %c0_i32, %c0_i32_0 : i32, i32
  }
  func.func @transform_3(%arg0: i32) -> (i32, i32) {
    %c0_i32 = arith.constant 0 : i32
    %c0_i32_0 = arith.constant 0 : i32
    %c0_i32_1 = arith.constant 0 : i32
    return %c0_i32, %c0_i32_0 : i32, i32
  }
  func.func @transform_4(%arg0: i32) -> (i32, i32, i32) {
    %c0_i32 = arith.constant 0 : i32
    %c0_i32_0 = arith.constant 0 : i32
    %c0_i32_1 = arith.constant 0 : i32
    return %arg0, %c0_i32, %c0_i32_0 : i32, i32, i32
  }
}

module attributes {stable_mosaic.version = 11 : i64} {
  func.func @_conv_in_lrelu_kernel(%arg0: i32, %arg1: memref<1x64x256xbf16, #tpu.memory_space<vmem>>, %arg2: memref<8x1024xbf16, #tpu.memory_space<vmem>>, %arg3: memref<8x1xf32, #tpu.memory_space<vmem>>, %arg4: memref<1x128xf32, #tpu.memory_space<vmem>>, %arg5: memref<1x8x128xf32, #tpu.memory_space<vmem>>, %arg6: memref<1024x128xbf16, #tpu.memory_space<vmem>>, %arg7: memref<8x128xf32, #tpu.memory_space<vmem>>) attributes {dimension_semantics = [#tpu.dimension_semantics<parallel>], iteration_bounds = array<i64: 2>, scalar_prefetch = 0 : i64, scratch_operands = 2 : i64, tpu.core_type = #tpu.core_type<tc>, window_params = [{transform_indices = @transform_0, window_bounds = array<i64: 1, 64, 256>}, {pipeline_mode = #tpu.pipeline_mode<synchronous>, transform_indices = @transform_1, window_bounds = array<i64: 8, 1024>}, {pipeline_mode = #tpu.pipeline_mode<synchronous>, transform_indices = @transform_2, window_bounds = array<i64: 8, 1>}, {pipeline_mode = #tpu.pipeline_mode<synchronous>, transform_indices = @transform_3, window_bounds = array<i64: 1, 128>}, {transform_indices = @transform_4, window_bounds = array<i64: 1, 8, 128>}]} {
    %c0 = arith.constant 0 : index
    %c0_0 = arith.constant 0 : index
    %c0_1 = arith.constant 0 : index
    %0 = vector.load %arg1[%c0, %c0_0, %c0_1] : memref<1x64x256xbf16, #tpu.memory_space<vmem>>, vector<1x64x128xbf16>
    %1 = vector.shape_cast %0 : vector<1x64x128xbf16> to vector<64x128xbf16>
    %c0_2 = arith.constant 0 : index
    %c0_3 = arith.constant 0 : index
    %2 = vector.load %arg6[%c0_2, %c0_3] : memref<1024x128xbf16, #tpu.memory_space<vmem>>, vector<64x128xbf16>
    tpu.vector_store %arg6[%c0_2, %c0_3], %1 {strides = array<i32>} : memref<1024x128xbf16, #tpu.memory_space<vmem>>, vector<64x128xbf16>,
    %c0_4 = arith.constant 0 : index
    %c0_5 = arith.constant 0 : index
    %c1 = arith.constant 1 : index
    %3 = vector.load %arg1[%c0_4, %c0_5, %c1] : memref<1x64x256xbf16, #tpu.memory_space<vmem>>, vector<1x64x128xbf16>
    %4 = vector.shape_cast %3 : vector<1x64x128xbf16> to vector<64x128xbf16>
    %c64 = arith.constant 64 : index
    %c0_6 = arith.constant 0 : index
    %5 = vector.load %arg6[%c64, %c0_6] : memref<1024x128xbf16, #tpu.memory_space<vmem>>, vector<64x128xbf16>
    tpu.vector_store %arg6[%c64, %c0_6], %4 {strides = array<i32>} : memref<1024x128xbf16, #tpu.memory_space<vmem>>, vector<64x128xbf16>,
    %c0_7 = arith.constant 0 : index
    %c0_8 = arith.constant 0 : index
    %c2 = arith.constant 2 : index
    %6 = vector.load %arg1[%c0_7, %c0_8, %c2] : memref<1x64x256xbf16, #tpu.memory_space<vmem>>, vector<1x64x128xbf16>
    %7 = vector.shape_cast %6 : vector<1x64x128xbf16> to vector<64x128xbf16>
    %c128 = arith.constant 128 : index
    %c0_9 = arith.constant 0 : index
    %8 = vector.load %arg6[%c128, %c0_9] : memref<1024x128xbf16, #tpu.memory_space<vmem>>, vector<64x128xbf16>
    tpu.vector_store %arg6[%c128, %c0_9], %7 {strides = array<i32>} : memref<1024x128xbf16, #tpu.memory_space<vmem>>, vector<64x128xbf16>,
    %c0_10 = arith.constant 0 : index
    %c0_11 = arith.constant 0 : index
    %c3 = arith.constant 3 : index
    %9 = vector.load %arg1[%c0_10, %c0_11, %c3] : memref<1x64x256xbf16, #tpu.memory_space<vmem>>, vector<1x64x128xbf16>
    %10 = vector.shape_cast %9 : vector<1x64x128xbf16> to vector<64x128xbf16>
    %c192 = arith.constant 192 : index
    %c0_12 = arith.constant 0 : index
    %11 = vector.load %arg6[%c192, %c0_12] : memref<1024x128xbf16, #tpu.memory_space<vmem>>, vector<64x128xbf16>
    tpu.vector_store %arg6[%c192, %c0_12], %10 {strides = array<i32>} : memref<1024x128xbf16, #tpu.memory_space<vmem>>, vector<64x128xbf16>,
    %c0_13 = arith.constant 0 : index
    %c0_14 = arith.constant 0 : index
    %c5 = arith.constant 5 : index
    %12 = vector.load %arg1[%c0_13, %c0_14, %c5] : memref<1x64x256xbf16, #tpu.memory_space<vmem>>, vector<1x64x128xbf16>
    %13 = vector.shape_cast %12 : vector<1x64x128xbf16> to vector<64x128xbf16>
    %c256 = arith.constant 256 : index
    %c0_15 = arith.constant 0 : index
    %14 = vector.load %arg6[%c256, %c0_15] : memref<1024x128xbf16, #tpu.memory_space<vmem>>, vector<64x128xbf16>
    tpu.vector_store %arg6[%c256, %c0_15], %13 {strides = array<i32>} : memref<1024x128xbf16, #tpu.memory_space<vmem>>, vector<64x128xbf16>,
    %c0_16 = arith.constant 0 : index
    %c0_17 = arith.constant 0 : index
    %c6 = arith.constant 6 : index
    %15 = vector.load %arg1[%c0_16, %c0_17, %c6] : memref<1x64x256xbf16, #tpu.memory_space<vmem>>, vector<1x64x128xbf16>
    %16 = vector.shape_cast %15 : vector<1x64x128xbf16> to vector<64x128xbf16>
    %c320 = arith.constant 320 : index
    %c0_18 = arith.constant 0 : index
    %17 = vector.load %arg6[%c320, %c0_18] : memref<1024x128xbf16, #tpu.memory_space<vmem>>, vector<64x128xbf16>
    tpu.vector_store %arg6[%c320, %c0_18], %16 {strides = array<i32>} : memref<1024x128xbf16, #tpu.memory_space<vmem>>, vector<64x128xbf16>,
    %c0_19 = arith.constant 0 : index
    %c0_20 = arith.constant 0 : index
    %c7 = arith.constant 7 : index
    %18 = vector.load %arg1[%c0_19, %c0_20, %c7] : memref<1x64x256xbf16, #tpu.memory_space<vmem>>, vector<1x64x128xbf16>
    %19 = vector.shape_cast %18 : vector<1x64x128xbf16> to vector<64x128xbf16>
    %c384 = arith.constant 384 : index
    %c0_21 = arith.constant 0 : index
    %20 = vector.load %arg6[%c384, %c0_21] : memref<1024x128xbf16, #tpu.memory_space<vmem>>, vector<64x128xbf16>
    tpu.vector_store %arg6[%c384, %c0_21], %19 {strides = array<i32>} : memref<1024x128xbf16, #tpu.memory_space<vmem>>, vector<64x128xbf16>,
    %c0_22 = arith.constant 0 : index
    %c0_23 = arith.constant 0 : index
    %c8 = arith.constant 8 : index
    %21 = vector.load %arg1[%c0_22, %c0_23, %c8] : memref<1x64x256xbf16, #tpu.memory_space<vmem>>, vector<1x64x128xbf16>
    %22 = vector.shape_cast %21 : vector<1x64x128xbf16> to vector<64x128xbf16>
    %c448 = arith.constant 448 : index
    %c0_24 = arith.constant 0 : index
    %23 = vector.load %arg6[%c448, %c0_24] : memref<1024x128xbf16, #tpu.memory_space<vmem>>, vector<64x128xbf16>
    tpu.vector_store %arg6[%c448, %c0_24], %22 {strides = array<i32>} : memref<1024x128xbf16, #tpu.memory_space<vmem>>, vector<64x128xbf16>,
    %c0_25 = arith.constant 0 : index
    %c0_26 = arith.constant 0 : index
    %c10 = arith.constant 10 : index
    %24 = vector.load %arg1[%c0_25, %c0_26, %c10] : memref<1x64x256xbf16, #tpu.memory_space<vmem>>, vector<1x64x128xbf16>
    %25 = vector.shape_cast %24 : vector<1x64x128xbf16> to vector<64x128xbf16>
    %c512 = arith.constant 512 : index
    %c0_27 = arith.constant 0 : index
    %26 = vector.load %arg6[%c512, %c0_27] : memref<1024x128xbf16, #tpu.memory_space<vmem>>, vector<64x128xbf16>
    tpu.vector_store %arg6[%c512, %c0_27], %25 {strides = array<i32>} : memref<1024x128xbf16, #tpu.memory_space<vmem>>, vector<64x128xbf16>,
    %c0_28 = arith.constant 0 : index
    %c0_29 = arith.constant 0 : index
    %c11 = arith.constant 11 : index
    %27 = vector.load %arg1[%c0_28, %c0_29, %c11] : memref<1x64x256xbf16, #tpu.memory_space<vmem>>, vector<1x64x128xbf16>
    %28 = vector.shape_cast %27 : vector<1x64x128xbf16> to vector<64x128xbf16>
    %c576 = arith.constant 576 : index
    %c0_30 = arith.constant 0 : index
    %29 = vector.load %arg6[%c576, %c0_30] : memref<1024x128xbf16, #tpu.memory_space<vmem>>, vector<64x128xbf16>
    tpu.vector_store %arg6[%c576, %c0_30], %28 {strides = array<i32>} : memref<1024x128xbf16, #tpu.memory_space<vmem>>, vector<64x128xbf16>,
    %c0_31 = arith.constant 0 : index
    %c0_32 = arith.constant 0 : index
    %c12 = arith.constant 12 : index
    %30 = vector.load %arg1[%c0_31, %c0_32, %c12] : memref<1x64x256xbf16, #tpu.memory_space<vmem>>, vector<1x64x128xbf16>
    %31 = vector.shape_cast %30 : vector<1x64x128xbf16> to vector<64x128xbf16>
    %c640 = arith.constant 640 : index
    %c0_33 = arith.constant 0 : index
    %32 = vector.load %arg6[%c640, %c0_33] : memref<1024x128xbf16, #tpu.memory_space<vmem>>, vector<64x128xbf16>
    tpu.vector_store %arg6[%c640, %c0_33], %31 {strides = array<i32>} : memref<1024x128xbf16, #tpu.memory_space<vmem>>, vector<64x128xbf16>,
    %c0_34 = arith.constant 0 : index
    %c0_35 = arith.constant 0 : index
    %c13 = arith.constant 13 : index
    %33 = vector.load %arg1[%c0_34, %c0_35, %c13] : memref<1x64x256xbf16, #tpu.memory_space<vmem>>, vector<1x64x128xbf16>
    %34 = vector.shape_cast %33 : vector<1x64x128xbf16> to vector<64x128xbf16>
    %c704 = arith.constant 704 : index
    %c0_36 = arith.constant 0 : index
    %35 = vector.load %arg6[%c704, %c0_36] : memref<1024x128xbf16, #tpu.memory_space<vmem>>, vector<64x128xbf16>
    tpu.vector_store %arg6[%c704, %c0_36], %34 {strides = array<i32>} : memref<1024x128xbf16, #tpu.memory_space<vmem>>, vector<64x128xbf16>,
    %c0_37 = arith.constant 0 : index
    %c0_38 = arith.constant 0 : index
    %c15 = arith.constant 15 : index
    %36 = vector.load %arg1[%c0_37, %c0_38, %c15] : memref<1x64x256xbf16, #tpu.memory_space<vmem>>, vector<1x64x128xbf16>
    %37 = vector.shape_cast %36 : vector<1x64x128xbf16> to vector<64x128xbf16>
    %c768 = arith.constant 768 : index
    %c0_39 = arith.constant 0 : index
    %38 = vector.load %arg6[%c768, %c0_39] : memref<1024x128xbf16, #tpu.memory_space<vmem>>, vector<64x128xbf16>
    tpu.vector_store %arg6[%c768, %c0_39], %37 {strides = array<i32>} : memref<1024x128xbf16, #tpu.memory_space<vmem>>, vector<64x128xbf16>,
    %c0_40 = arith.constant 0 : index
    %c0_41 = arith.constant 0 : index
    %c16 = arith.constant 16 : index
    %39 = vector.load %arg1[%c0_40, %c0_41, %c16] : memref<1x64x256xbf16, #tpu.memory_space<vmem>>, vector<1x64x128xbf16>
    %40 = vector.shape_cast %39 : vector<1x64x128xbf16> to vector<64x128xbf16>
    %c832 = arith.constant 832 : index
    %c0_42 = arith.constant 0 : index
    %41 = vector.load %arg6[%c832, %c0_42] : memref<1024x128xbf16, #tpu.memory_space<vmem>>, vector<64x128xbf16>
    tpu.vector_store %arg6[%c832, %c0_42], %40 {strides = array<i32>} : memref<1024x128xbf16, #tpu.memory_space<vmem>>, vector<64x128xbf16>,
    %c0_43 = arith.constant 0 : index
    %c0_44 = arith.constant 0 : index
    %c17 = arith.constant 17 : index
    %42 = vector.load %arg1[%c0_43, %c0_44, %c17] : memref<1x64x256xbf16, #tpu.memory_space<vmem>>, vector<1x64x128xbf16>
    %43 = vector.shape_cast %42 : vector<1x64x128xbf16> to vector<64x128xbf16>
    %c896 = arith.constant 896 : index
    %c0_45 = arith.constant 0 : index
    %44 = vector.load %arg6[%c896, %c0_45] : memref<1024x128xbf16, #tpu.memory_space<vmem>>, vector<64x128xbf16>
    tpu.vector_store %arg6[%c896, %c0_45], %43 {strides = array<i32>} : memref<1024x128xbf16, #tpu.memory_space<vmem>>, vector<64x128xbf16>,
    %c0_46 = arith.constant 0 : index
    %c0_47 = arith.constant 0 : index
    %c18 = arith.constant 18 : index
    %45 = vector.load %arg1[%c0_46, %c0_47, %c18] : memref<1x64x256xbf16, #tpu.memory_space<vmem>>, vector<1x64x128xbf16>
    %46 = vector.shape_cast %45 : vector<1x64x128xbf16> to vector<64x128xbf16>
    %c960 = arith.constant 960 : index
    %c0_48 = arith.constant 0 : index
    %47 = vector.load %arg6[%c960, %c0_48] : memref<1024x128xbf16, #tpu.memory_space<vmem>>, vector<64x128xbf16>
    tpu.vector_store %arg6[%c960, %c0_48], %46 {strides = array<i32>} : memref<1024x128xbf16, #tpu.memory_space<vmem>>, vector<64x128xbf16>,
    %c0_49 = arith.constant 0 : index
    %c0_50 = arith.constant 0 : index
    %48 = vector.load %arg2[%c0_49, %c0_50] : memref<8x1024xbf16, #tpu.memory_space<vmem>>, vector<8x1024xbf16>
    %c0_51 = arith.constant 0 : index
    %c0_52 = arith.constant 0 : index
    %49 = vector.load %arg6[%c0_51, %c0_52] : memref<1024x128xbf16, #tpu.memory_space<vmem>>, vector<1024x128xbf16>
    %cst = arith.constant dense<0.000000e+00> : vector<8x128xf32>
    %50 = tpu.matmul %48, %49, %cst {dimension_numbers = #tpu.dot_dimension_numbers<[1], [0], [0], [1], [0, 0, 1, 1], [], []>} : vector<8x1024xbf16>, vector<1024x128xbf16>, vector<8x128xf32> -> vector<8x128xf32>
    %c0_53 = arith.constant 0 : index
    %c0_54 = arith.constant 0 : index
    %51 = vector.load %arg7[%c0_53, %c0_54] : memref<8x128xf32, #tpu.memory_space<vmem>>, vector<8x128xf32>
    tpu.vector_store %arg7[%c0_53, %c0_54], %50 {strides = array<i32>} : memref<8x128xf32, #tpu.memory_space<vmem>>, vector<8x128xf32>,
    %c0_55 = arith.constant 0 : index
    %c0_56 = arith.constant 0 : index
    %52 = vector.load %arg7[%c0_55, %c0_56] : memref<8x128xf32, #tpu.memory_space<vmem>>, vector<8x128xf32>
    %c0_57 = arith.constant 0 : index
    %c0_58 = arith.constant 0 : index
    %53 = vector.load %arg3[%c0_57, %c0_58] : memref<8x1xf32, #tpu.memory_space<vmem>>, vector<8x1xf32>
    %54 = vector.broadcast %53 : vector<8x1xf32> to vector<8x128xf32>
    %55 = arith.addf %52, %54 : vector<8x128xf32>
    %c0_59 = arith.constant 0 : index
    %c0_60 = arith.constant 0 : index
    %c0_61 = arith.constant 0 : index
    %56 = vector.load %arg5[%c0_59, %c0_60, %c0_61] : memref<1x8x128xf32, #tpu.memory_space<vmem>>, vector<1x8x128xf32>
    %57 = vector.shape_cast %56 : vector<1x8x128xf32> to vector<8x128xf32>
    %58 = vector.shape_cast %55 : vector<8x128xf32> to vector<1x8x128xf32>
    tpu.vector_store %arg5[%c0_59, %c0_60, %c0_61], %58 {strides = array<i32>} : memref<1x8x128xf32, #tpu.memory_space<vmem>>, vector<1x8x128xf32>,
    return
  }
  func.func @transform_0(%arg0: i32) -> (i32, i32, i32) {
    %c0_i32 = arith.constant 0 : i32
    %c0_i32_0 = arith.constant 0 : i32
    %c0_i32_1 = arith.constant 0 : i32
    return %arg0, %c0_i32, %c0_i32_0 : i32, i32, i32
  }
  func.func @transform_1(%arg0: i32) -> (i32, i32) {
    %c0_i32 = arith.constant 0 : i32
    %c0_i32_0 = arith.constant 0 : i32
    %c0_i32_1 = arith.constant 0 : i32
    return %c0_i32, %c0_i32_0 : i32, i32
  }
  func.func @transform_2(%arg0: i32) -> (i32, i32) {
    %c0_i32 = arith.constant 0 : i32
    %c0_i32_0 = arith.constant 0 : i32
    %c0_i32_1 = arith.constant 0 : i32
    return %c0_i32, %c0_i32_0 : i32, i32
  }
  func.func @transform_3(%arg0: i32) -> (i32, i32) {
    %c0_i32 = arith.constant 0 : i32
    %c0_i32_0 = arith.constant 0 : i32
    %c0_i32_1 = arith.constant 0 : i32
    return %c0_i32, %c0_i32_0 : i32, i32
  }
  func.func @transform_4(%arg0: i32) -> (i32, i32, i32) {
    %c0_i32 = arith.constant 0 : i32
    %c0_i32_0 = arith.constant 0 : i32
    %c0_i32_1 = arith.constant 0 : i32
    return %arg0, %c0_i32, %c0_i32_0 : i32, i32, i32
  }
}

</mosaic_0001>

<bundles_post_ra>
// kernel: discriminator_forward.5
= control target key start
LH: loop header
LB: loop body
LE: loop exit
PB: predicated region body
PF: predicated region fallthrough
CT: control target
= control target key end

     0   :  { %s639_s15 = smov 0   ;;  %s666_s0 = inlined_call_operand.vmem [shape: bf16[2,16,512], index: 0, kind: input, shape index: {}]   ;;  %s667_s1 = inlined_call_operand.vmem [shape: bf16[8,64], index: 1, kind: input, shape index: {}]   ;;  %s668_s2 = inlined_call_operand.vmem [shape: f32[8,1], index: 2, kind: input, shape index: {}]   ;;  %s669_s3 = inlined_call_operand.vmem [shape: f32[1,384], index: 3, kind: input, shape index: {}]   ;;  %s670_s4 = inlined_call_operand.vmem [shape: bf16[2,8,384], index: 4, kind: output, shape index: {}]  }
   0x1 LB: > { %s528_s16 = sadd.s32 4294967295, %s606_s15   ;;  %p532_p0 = scmp.ge.s32.totalorder %s606_s15, 1  ;;  %s606_s15 = sphi %s639_s15, %s14_s15  }
   0x2   : > { %p162_p1 = scmp.lt.s32.totalorder %s606_s15, 3 }
   0x4   : > { %p163_p2 = pnand %p532_p0, %p162_p1 }
   0x5   : > { %p188_p3 = scmp.lt.s32.totalorder (!%p163_p2), %s528_s16, 1  ;;  %v608_v0 = vmov (!%p163_p2), 0.0   ;;  %s609_s20 = smov (!%p163_p2), 127   ;;  %v611_v6 = vmov (!%p163_p2), 0   ;;  %vm612_vm0 = vmmov (!%p163_p2), 0   ;;  %v440_v7 = vld [vmem:[%s668_s2] sm:$0xff] (!%p163_p2) }
   0x6   : > { %166 = sbr.rel (%p163_p2) target bundleno = 377 (0x179), region = 36  ;;  %565 = vmatprep.subr.bf16.mxu1 (!%p163_p2), %v608_v0  ;;  %s610_s21 = smov (!%p163_p2), 111   ;;  %385 = vmatprep.mubr.bf16.mxu0 (!%p163_p2), %v611_v6  ;;  %vm250_vm1 = vcmask (!%p163_p2), 1039360   ;;  %vm288_vm2 = vcmask (!%p163_p2), 908288   ;;  %vm326_vm3 = vcmask (!%p163_p2), 900096   ;;  %vm349_vm4 = vcmask (!%p163_p2), 523264  }
   0x7   : > { %573 = vmatprep.mubr.msk.bf16.mxu1 (!%p163_p2), %vm612_vm0, %v608_v0  ;;  %592 = vset.pattern.permute.xlu0 (!%p163_p2), %v611_v6  ;;  %s613_s22 = smov (!%p163_p2), 110   ;;  %v336_v29 = vld [vmem:[%s667_s1] sm:$0xf] (!%p163_p2) }
   0xd   : > { %s672_s16 = smov (!%p188_p3, %s528_s16), 1 }
   0xe   : > { %s557_s3 = sshll.u32 %s672_s16, 5  ;;  %s577_s27 = smul.u32 12, %s672_s16 }
   0xf   : > { %s192_s19 = scalar_lea.vmem %s666_s0, %s557_s3 }
  0x10   : > { %v593_v1 = vld [vmem:[%s192_s19 + $0x4] ss:$16 sps:$4 sm:$0xff]   ;;  %v595_v2 = vld [vmem:[%s192_s19] ss:$16 sps:$4 sm:$0xff]   ;;  %v596_v3 = vld [vmem:[%s192_s19 + $0x8] ss:$16 sps:$4 sm:$0xff]   ;;  %s197_s30 = scalar_lea.vmem %s670_s4, %s577_s27 }
  0x11   : > { %244 = vrot.lane.b32.xlu0 %v593_v1, %s609_s20  ;;  %353 = vmatprep.subr.bf16.mxu0 %v593_v1  ;;  %v598_v4 = vld [vmem:[%s192_s19 + $0xc] ss:$16 sps:$4 sm:$0xff]   ;;  %v599_v5 = vld [vmem:[%s192_s19 + $0x8] ss:$16 sps:$4 sm:$0xff]  }
  0x12   : > { %242 = vrot.lane.b32.xlu1 %v595_v2, %s609_s20  ;;  %354 = vmatpush1.bf16.msra.mxu0 %v595_v2 }
  0x13   : > { %566 = vmatpush3.bf16.msra.mxu1 %v599_v5 }
  0x14   : > { %567 = vmatprep.subr.bf16.mxu1 %v608_v0 }
  0x15   : > { %246 = vrot.lane.b32.xlu0 %v596_v3, %s609_s20 }
  0x16   : > { %248 = vrot.lane.b32.xlu1 %v598_v4, %s609_s20 }
  0x19   : > { %282 = vrot.lane.b32.xlu0 %v593_v1, %s610_s21 }
  0x1a   : > { %284 = vrot.lane.b32.xlu1 %v596_v3, %s610_s21 }
  0x1d   : > { %280 = vrot.lane.b32.xlu0 %v595_v2, %s610_s21 }
  0x1e   : > { %286 = vrot.lane.b32.xlu1 %v598_v4, %s610_s21 }
  0x21   : > { %320 = vrot.lane.b32.xlu0 %v593_v1, %s613_s22 }
  0x22   : > { %322 = vrot.lane.b32.xlu1 %v596_v3, %s613_s22 }
  0x25   : > { %318 = vrot.lane.b32.xlu0 %v595_v2, %s613_s22 }
  0x26   : > { %324 = vrot.lane.b32.xlu1 %v598_v4, %s613_s22 }
  0x29   : > { %443 = vperm.xlu0 %592, %v440_v7  }
  0x83   : > { %v245_v8 = vpop.permute.xlu0 %244 }
  0x84   : > { %v243_v9 = vpop.permute.xlu1 %242 }
  0x85   : > { %v251_v14 = vsel %vm250_vm1, %v243_v9, %v245_v8 }
  0x87   : > { %v247_v10 = vpop.permute.xlu0 %246 }
  0x88   : > { %v249_v11 = vpop.permute.xlu1 %248  ;;  %v252_v12 = vsel %vm250_vm1, %v245_v8, %v247_v10 }
  0x89   : > { %355 = vmatprep.subr.bf16.mxu0 %v252_v12  ;;  %v253_v13 = vsel %vm250_vm1, %v247_v10, %v249_v11 }
  0x8a   : > { %568 = vmatpush3.bf16.msra.mxu1 %v253_v13  ;;  %356 = vmatpush1.bf16.msra.mxu0 %v251_v14 }
  0x8b   : > { %v283_v15 = vpop.permute.xlu0 %282  ;;  %569 = vmatprep.subr.bf16.mxu1 %v608_v0 }
  0x8c   : > { %v285_v16 = vpop.permute.xlu1 %284 }
  0x8d   : > { %v290_v17 = vsel %vm288_vm2, %v283_v15, %v285_v16 }
  0x8e   : > { %357 = vmatprep.subr.bf16.mxu0 %v290_v17 }
  0x8f   : > { %v281_v18 = vpop.permute.xlu0 %280 }
  0x90   : > { %v287_v19 = vpop.permute.xlu1 %286  ;;  %v289_v20 = vsel %vm288_vm2, %v281_v18, %v283_v15 }
  0x91   : > { %358 = vmatpush1.bf16.msra.mxu0 %v289_v20  ;;  %v291_v21 = vsel %vm288_vm2, %v285_v16, %v287_v19 }
  0x92   : > { %570 = vmatpush3.bf16.msra.mxu1 %v291_v21 }
  0x93   : > { %v321_v22 = vpop.permute.xlu0 %320  ;;  %571 = vmatprep.subr.bf16.mxu1 %v608_v0 }
  0x94   : > { %v323_v23 = vpop.permute.xlu1 %322 }
  0x95   : > { %v328_v24 = vsel %vm326_vm3, %v321_v22, %v323_v23 }
  0x96   : > { %359 = vmatprep.subr.bf16.mxu0 %v328_v24 }
  0x97   : > { %v319_v25 = vpop.permute.xlu0 %318 }
  0x98   : > { %v325_v26 = vpop.permute.xlu1 %324  ;;  %v327_v27 = vsel %vm326_vm3, %v319_v25, %v321_v22 }
  0x99   : > { %360 = vmatpush1.bf16.msra.mxu0 %v327_v27  ;;  %v329_v28 = vsel %vm326_vm3, %v323_v23, %v325_v26 }
  0x9a   : > { %572 = vmatpush3.bf16.msra.mxu1 %v329_v28 }
  0x9c   : > { %551 = vmatmul.mubr.msk.bf16.vlgmr.msra.gmra.mrb[0].mxu0 %vm349_vm4, %v336_v29 }
  0x9d   : > { %574 = vmatmul.mubr.msk.bf16.vlgmr.msra.gmra.mrb[0].mxu1 %vm349_vm4, %v336_v29 }
  0xa8   : > { %v444_v30 = vpop.permute.xlu0 %443 }
 0x16f   : > { %v387_v31 = vpop.f32.mrb[0].mxu0 }
 0x170   : > { %v446_v32 = vadd.f32 %v444_v30, %v387_v31  ;;  %v428_v33 = vpop.f32.mrb[0].mxu1  ;;  %v389_v34 = vpop.f32.mrb[1].mxu0 }
 0x171   : > { %v448_v35 = vadd.f32 %v444_v30, %v428_v33  ;;  %v447_v36 = vadd.f32 %v444_v30, %v389_v34  ;;  %v575_v37 = vpop.f32.mrb[1].mxu1  ;;  %v391_v38 = vpop.f32.mrb[2].mxu0 }
 0x172   : > { %vm449_vm5 = vcmp.ge.f32.partialorder %v446_v32, 0.0  ;;  %v452_v39 = vmul.f32 0.2, %v446_v32  ;;  %v431_v40 = vpop.f32.mrb[2].mxu1  ;;  %v392_v41 = vpop.f32.mrb[3].mxu0 }
 0x173   : > { %vm451_vm6 = vcmp.ge.f32.partialorder %v448_v35, 0.0  ;;  %v454_v42 = vmul.f32 0.2, %v448_v35  ;;  %vm450_vm7 = vcmp.ge.f32.partialorder %v447_v36, 0.0  ;;  %v453_v43 = vmul.f32 0.2, %v447_v36 }
 0x174   : > { %v455_v44 = vsel %vm449_vm5, %v446_v32, %v452_v39  ;;  %v576_v45 = vpop.f32.mrb[3].mxu1 }
 0x175   : > { %v457_v46 = vsel %vm451_vm6, %v448_v35, %v454_v42  ;;  %v456_v47 = vsel %vm450_vm7, %v447_v36, %v453_v43 }
 0x176   : > { %v559_v48 = vpack.c.bf16 %v457_v46, %v457_v46  ;;  %v558_v49 = vpack.c.bf16 %v456_v47, %v455_v44 }
 0x178   : > { %472 = vst [vmem:[%s197_s30 + $0x8] sm:$0xf] %v559_v48  ;;  %471 = vst [vmem:[%s197_s30] sm:$0xff] %v558_v49 }
 0x179 PF: > { %s14_s15 = sadd.s32 1, %s606_s15  }
 0x17a   : > { %p11_p4 = scmp.ge.s32.totalorder %s14_s15, 4  }
 0x17c   :  { %13 = sbr.rel (!%p11_p4) target bundleno = 1 (0x1), region = 66 }

// kernel: discriminator_forward.6
= control target key start
LH: loop header
LB: loop body
LE: loop exit
PB: predicated region body
PF: predicated region fallthrough
CT: control target
= control target key end

     0   :  { %s624_s15 = smov 0   ;;  %s651_s0 = inlined_call_operand.vmem [shape: bf16[2,32,256], index: 0, kind: input, shape index: {}]   ;;  %s652_s1 = inlined_call_operand.vmem [shape: bf16[16,128], index: 1, kind: input, shape index: {}]   ;;  %s653_s2 = inlined_call_operand.vmem [shape: f32[16,1], index: 2, kind: input, shape index: {}]   ;;  %s654_s3 = inlined_call_operand.vmem [shape: f32[1,128], index: 3, kind: input, shape index: {}]   ;;  %s655_s4 = inlined_call_operand.vmem [shape: bf16[2,16,128], index: 4, kind: output, shape index: {}]  }
   0x1 LB: > { %s493_s16 = sadd.s32 4294967295, %s592_s15   ;;  %p497_p0 = scmp.ge.s32.totalorder %s592_s15, 1  ;;  %s592_s15 = sphi %s624_s15, %s14_s15  }
   0x2   : > { %p162_p1 = scmp.lt.s32.totalorder %s592_s15, 3 }
   0x4   : > { %p163_p2 = pnand %p497_p0, %p162_p1 }
   0x5   : > { %p188_p3 = scmp.lt.s32.totalorder (!%p163_p2), %s493_s16, 1  ;;  %v594_v0 = vmov (!%p163_p2), 0.0   ;;  %s595_s20 = smov (!%p163_p2), 127   ;;  %vm597_vm0 = vmmov (!%p163_p2), 0   ;;  %vm245_vm1 = vcmask (!%p163_p2), 1039360   ;;  %vm280_vm2 = vcmask (!%p163_p2), 973824  }
   0x6   : > { %166 = sbr.rel (%p163_p2) target bundleno = 551 (0x227), region = 36  ;;  %540 = vmatprep.subr.bf16.mxu0 (!%p163_p2), %v594_v0  ;;  %s596_s21 = smov (!%p163_p2), 119   ;;  %556 = vmatprep.mubr.msk.bf16.mxu0 (!%p163_p2), %vm597_vm0, %v594_v0  ;;  %vm315_vm3 = vcmask (!%p163_p2), 965632   ;;  %v581_v25 = vld [vmem:[%s652_s1] sm:$0xff] (!%p163_p2)  }
   0x7   : > { %s598_s22 = smov (!%p163_p2), 118   ;;  %v517_v26 = vld [vmem:[%s654_s3] ss:$0 sm:$0xff] (!%p163_p2) }
   0xd   : > { %s657_s16 = smov (!%p188_p3, %s493_s16), 1 }
   0xe   : > { %s522_s2 = sshll.u32 %s657_s16, 5  ;;  %s523_s27 = sshll.u32 %s657_s16, 3 }
   0xf   : > { %s192_s19 = scalar_lea.vmem %s651_s0, %s522_s2  ;;  %s197_s30 = scalar_lea.vmem %s655_s4, %s523_s27 }
  0x10   : > { %v573_v1 = vld [vmem:[%s192_s19 + $0x10] ss:$8 sps:$4 sm:$0xff]   ;;  %v575_v2 = vld [vmem:[%s192_s19 + $0x14] ss:$8 sps:$4 sm:$0xff]   ;;  %v576_v3 = vld [vmem:[%s192_s19] ss:$8 sps:$4 sm:$0xff]  }
  0x11   : > { %241 = vrot.lane.b32.xlu1 %v573_v1, %s595_s20  ;;  %v579_v4 = vld [vmem:[%s192_s19] ss:$8 sps:$4 sm:$0xff]   ;;  %v578_v5 = vld [vmem:[%s192_s19 + $0x4] ss:$8 sps:$4 sm:$0xff]   ;;  %237 = vrot.lane.b32.xlu0 %v576_v3, %s595_s20 }
  0x12   : > { %541 = vmatpush3.bf16.msra.mxu0 %v579_v4  ;;  %v580_v6 = vld [vmem:[%s192_s19 + $0x10] ss:$8 sps:$4 sm:$0xff]  }
  0x13   : > { %542 = vmatprep.subr.bf16.mxu0 %v594_v0 }
  0x15   : > { %243 = vrot.lane.b32.xlu1 %v575_v2, %s595_s20  ;;  %239 = vrot.lane.b32.xlu0 %v578_v5, %s595_s20 }
  0x16   : > { %543 = vmatpush3.bf16.msra.mxu0 %v580_v6 }
  0x17   : > { %544 = vmatprep.subr.bf16.mxu0 %v594_v0 }
  0x19   : > { %274 = vrot.lane.b32.xlu1 %v578_v5, %s596_s21  ;;  %272 = vrot.lane.b32.xlu0 %v576_v3, %s596_s21 }
  0x1d   : > { %278 = vrot.lane.b32.xlu1 %v575_v2, %s596_s21  ;;  %276 = vrot.lane.b32.xlu0 %v573_v1, %s596_s21 }
  0x21   : > { %309 = vrot.lane.b32.xlu1 %v578_v5, %s598_s22  ;;  %307 = vrot.lane.b32.xlu0 %v576_v3, %s598_s22 }
  0x25   : > { %313 = vrot.lane.b32.xlu1 %v575_v2, %s598_s22  ;;  %311 = vrot.lane.b32.xlu0 %v573_v1, %s598_s22 }
  0x83   : > { %v242_v7 = vpop.permute.xlu1 %241  ;;  %v238_v8 = vpop.permute.xlu0 %237 }
  0x87   : > { %v244_v9 = vpop.permute.xlu1 %243  ;;  %v240_v10 = vpop.permute.xlu0 %239 }
  0x88   : > { %v246_v11 = vsel %vm245_vm1, %v238_v8, %v240_v10  ;;  %v247_v14 = vsel %vm245_vm1, %v242_v7, %v244_v9 }
  0x89   : > { %545 = vmatpush3.bf16.msra.mxu0 %v246_v11 }
  0x8a   : > { %546 = vmatprep.subr.bf16.mxu0 %v594_v0 }
  0x8b   : > { %v275_v12 = vpop.permute.xlu1 %274  ;;  %v273_v13 = vpop.permute.xlu0 %272 }
  0x8c   : > { %v281_v16 = vsel %vm280_vm2, %v273_v13, %v275_v12 }
  0x8d   : > { %547 = vmatpush3.bf16.msra.mxu0 %v247_v14 }
  0x8e   : > { %548 = vmatprep.subr.bf16.mxu0 %v594_v0 }
  0x8f   : > { %v279_v15 = vpop.permute.xlu1 %278  ;;  %v277_v17 = vpop.permute.xlu0 %276 }
  0x90   : > { %v282_v19 = vsel %vm280_vm2, %v277_v17, %v279_v15 }
  0x91   : > { %549 = vmatpush3.bf16.msra.mxu0 %v281_v16 }
  0x92   : > { %550 = vmatprep.subr.bf16.mxu0 %v594_v0 }
  0x93   : > { %v310_v18 = vpop.permute.xlu1 %309  ;;  %v308_v20 = vpop.permute.xlu0 %307 }
  0x94   : > { %v316_v21 = vsel %vm315_vm3, %v308_v20, %v310_v18 }
  0x95   : > { %551 = vmatpush3.bf16.msra.mxu0 %v282_v19 }
  0x96   : > { %552 = vmatprep.subr.bf16.mxu0 %v594_v0 }
  0x97   : > { %v314_v22 = vpop.permute.xlu1 %313  ;;  %v312_v23 = vpop.permute.xlu0 %311 }
  0x98   : > { %v317_v24 = vsel %vm315_vm3, %v312_v23, %v314_v22 }
  0x99   : > { %553 = vmatpush3.bf16.msra.mxu0 %v316_v21 }
  0x9a   : > { %554 = vmatprep.subr.bf16.mxu0 %v594_v0 }
  0x9d   : > { %555 = vmatpush3.bf16.msra.mxu0 %v317_v24 }
  0xa0   : > { %557 = vmatmul.mubr.bf16.vlgmr.msra.gmra.mrb[0].mxu0 %v581_v25 }
 0x173   : > { %v372_v27 = vpop.f32.mrb[0].mxu0 }
 0x174   : > { %v558_v28 = vpop.f32.mrb[1].mxu0  ;;  %v390_v29 = vmul.f32 %v517_v26, %v372_v27  ;;  %v396_v30 = vmul.f32 %v372_v27, %v372_v27 }
 0x175   : > { %v375_v31 = vpop.f32.mrb[2].mxu0 }
 0x176   : > { %392 = vadd.xlane.f32.xlu0 %v390_v29  ;;  %v559_v32 = vpop.f32.mrb[3].mxu0  ;;  %v391_v33 = vmul.f32 %v517_v26, %v375_v31  ;;  %v398_v34 = vmul.f32 %v517_v26, %v396_v30  ;;  %v397_v35 = vmul.f32 %v375_v31, %v375_v31 }
 0x178   : > { %394 = vadd.xlane.f32.xlu1 %v391_v33  ;;  %v399_v36 = vmul.f32 %v517_v26, %v397_v35 }
 0x17a   : > { %400 = vadd.xlane.f32.xlu0 %v398_v34 }
 0x17e   : > { %402 = vadd.xlane.f32.xlu0 %v399_v36 }
 0x203   : > { %v393_v37 = vpop.xlane.xlu0 %392 }
 0x204   : > { %v404_v38 = vmul.f32 0.015625, %v393_v37 }
 0x205   : > { %v395_v39 = vpop.xlane.xlu1 %394 }
 0x206   : > { %v408_v41 = vmul.f32 %v404_v38, %v404_v38  ;;  %v405_v42 = vmul.f32 0.015625, %v395_v39  ;;  %v418_v53 = vsub.f32 %v372_v27, %v404_v38 }
 0x207   : > { %v401_v40 = vpop.xlane.xlu0 %400 }
 0x208   : > { %v406_v43 = vmul.f32 0.015625, %v401_v40  ;;  %v409_v46 = vmul.f32 %v405_v42, %v405_v42  ;;  %v419_v56 = vsub.f32 %v375_v31, %v405_v42 }
 0x20a   : > { %v410_v44 = vsub.f32 %v406_v43, %v408_v41 }
 0x20b   : > { %v403_v45 = vpop.xlane.xlu0 %402 }
 0x20c   : > { %v412_v47 = vmax.f32 %v410_v44, 0.0  ;;  %v407_v48 = vmul.f32 0.015625, %v403_v45 }
 0x20e   : > { %v414_v49 = vadd.f32 1e-05, %v412_v47  ;;  %v411_v50 = vsub.f32 %v407_v48, %v409_v46 }
 0x210   : > { %582 = vrsqrt.f32 %v414_v49  ;;  %v413_v51 = vmax.f32 %v411_v50, 0.0 }
 0x212   : > { %v415_v52 = vadd.f32 1e-05, %v413_v51 }
 0x214   : > { %584 = vrsqrt.f32 %v415_v52 }
 0x21a   : > { %v583_v54 = vpop.eup %582 }
 0x21b   : > { %v420_v55 = vmul.f32 %v583_v54, %v418_v53 }
 0x21d   : > { %v424_v58 = vmul.f32 0.2, %v420_v55  ;;  %vm422_vm4 = vcmp.ge.f32.partialorder %v420_v55, 0.0 }
 0x21e   : > { %v585_v57 = vpop.eup %584 }
 0x21f   : > { %v421_v59 = vmul.f32 %v585_v57, %v419_v56  ;;  %v426_v61 = vsel %vm422_vm4, %v420_v55, %v424_v58 }
 0x221   : > { %vm423_vm5 = vcmp.ge.f32.partialorder %v421_v59, 0.0  ;;  %v425_v60 = vmul.f32 0.2, %v421_v59 }
 0x223   : > { %v427_v62 = vsel %vm423_vm5, %v421_v59, %v425_v60 }
 0x224   : > { %v529_v63 = vpack.c.bf16 %v427_v62, %v426_v61 }
 0x226   : > { %530 = vst [vmem:[%s197_s30] sm:$0xff] %v529_v63  }
 0x227 PF: > { %s14_s15 = sadd.s32 1, %s592_s15  }
 0x228   : > { %p11_p4 = scmp.ge.s32.totalorder %s14_s15, 4  }
 0x22a   :  { %13 = sbr.rel (!%p11_p4) target bundleno = 1 (0x1), region = 66 }

// kernel: discriminator_forward.7
= control target key start
LH: loop header
LB: loop body
LE: loop exit
PB: predicated region body
PF: predicated region fallthrough
CT: control target
= control target key end

     0   :  { %s883_s15 = smov 0   ;;  %s969_s0 = inlined_call_operand.vmem [shape: bf16[2,64,256], index: 0, kind: input, shape index: {}]   ;;  %s970_s1 = inlined_call_operand.vmem [shape: bf16[32,256], index: 1, kind: input, shape index: {}]   ;;  %s971_s2 = inlined_call_operand.vmem [shape: f32[32,1], index: 2, kind: input, shape index: {}]   ;;  %s972_s3 = inlined_call_operand.vmem [shape: f32[1,128], index: 3, kind: input, shape index: {}]   ;;  %s973_s4 = inlined_call_operand.vmem [shape: bf16[2,32,128], index: 4, kind: output, shape index: {}]  }
   0x1 LB: > { %s697_s16 = sadd.s32 4294967295, %s853_s15   ;;  %p701_p0 = scmp.ge.s32.totalorder %s853_s15, 1  ;;  %s853_s15 = sphi %s883_s15, %s14_s15  }
   0x2   : > { %p162_p1 = scmp.lt.s32.totalorder %s853_s15, 3 }
   0x4   : > { %p163_p2 = pnand %p701_p0, %p162_p1 }
   0x5   : > { %p188_p3 = scmp.lt.s32.totalorder (!%p163_p2), %s697_s16, 1  ;;  %s855_s20 = smov (!%p163_p2), 123   ;;  %v835_v8 = vld [vmem:[%s970_s1 + $0x4] ss:$8 sps:$4 sm:$0xff] (!%p163_p2)   ;;  %v838_v9 = vld [vmem:[%s970_s1 + $0x14] ss:$8 sps:$4 sm:$0xff] (!%p163_p2)  }
   0x6   : > { %166 = sbr.rel (%p163_p2) target bundleno = 582 (0x246), region = 36  ;;  %s856_s21 = smov (!%p163_p2), 122   ;;  %514 = vmatprep.mubr.bf16.mxu0 (!%p163_p2), %v835_v8  ;;  %522 = vmatprep.mubr.bf16.mxu1 (!%p163_p2), %v838_v9  ;;  %vm360_vm0 = vcmask (!%p163_p2), 1006592   ;;  %vm429_vm1 = vcmask (!%p163_p2), 998400   ;;  %vm291_vm2 = vcmask (!%p163_p2), 1039360  }
   0x7   : > { %s857_s22 = smov (!%p163_p2), 127   ;;  %v833_v50 = vld [vmem:[%s970_s1] ss:$8 sps:$4 sm:$0xff] (!%p163_p2)   ;;  %v836_v51 = vld [vmem:[%s970_s1 + $0x10] ss:$8 sps:$4 sm:$0xff] (!%p163_p2)  }
   0x8   : > { %v738_v56 = vld [vmem:[%s972_s3] ss:$0 sm:$0xff] (!%p163_p2) }
   0xd   : > { %s975_s16 = smov (!%p188_p3, %s697_s16), 1 }
   0xe   : > { %s745_s2 = sshll.u32 %s975_s16, 6  ;;  %s746_s7 = sshll.u32 %s975_s16, 4 }
   0xf   : > { %s897_s19 = scalar_lea.vmem %s969_s0, %s745_s2  ;;  %s197_s10 = scalar_lea.vmem %s973_s4, %s746_s7 }
  0x10   : > { %v817_v0 = vld [vmem:[%s897_s19 + $0x10] ss:$8 sps:$4 sm:$0xff]   ;;  %v819_v1 = vld [vmem:[%s897_s19 + $0x14] ss:$8 sps:$4 sm:$0xff]   ;;  %v820_v2 = vld [vmem:[%s897_s19] ss:$8 sps:$4 sm:$0xff]  }
  0x11   : > { %348 = vrot.lane.b32.xlu1 %v817_v0, %s855_s20  ;;  %v822_v3 = vld [vmem:[%s897_s19 + $0x4] ss:$8 sps:$4 sm:$0xff]   ;;  %344 = vrot.lane.b32.xlu0 %v820_v2, %s855_s20  ;;  %v825_v5 = vld [vmem:[%s897_s19 + $0x20] ss:$8 sps:$4 sm:$0xff]  }
  0x12   : > { %v823_v4 = vld [vmem:[%s897_s19 + $0x24] ss:$8 sps:$4 sm:$0xff]   ;;  %v826_v6 = vld [vmem:[%s897_s19 + $0x34] ss:$8 sps:$4 sm:$0xff]   ;;  %v828_v7 = vld [vmem:[%s897_s19 + $0x30] ss:$8 sps:$4 sm:$0xff]  }
  0x13   : > { %v829_v13 = vld [vmem:[%s897_s19] ss:$8 sps:$4 sm:$0xff]   ;;  %v830_v18 = vld [vmem:[%s897_s19 + $0x10] ss:$8 sps:$4 sm:$0xff]  }
  0x14   : > { %v831_v22 = vld [vmem:[%s897_s19 + $0x20] ss:$8 sps:$4 sm:$0xff]   ;;  %v832_v26 = vld [vmem:[%s897_s19 + $0x30] ss:$8 sps:$4 sm:$0xff]  }
  0x15   : > { %350 = vrot.lane.b32.xlu1 %v819_v1, %s855_s20  ;;  %346 = vrot.lane.b32.xlu0 %v822_v3, %s855_s20 }
  0x19   : > { %354 = vrot.lane.b32.xlu1 %v823_v4, %s855_s20  ;;  %352 = vrot.lane.b32.xlu0 %v825_v5, %s855_s20 }
  0x1d   : > { %358 = vrot.lane.b32.xlu1 %v826_v6, %s855_s20  ;;  %356 = vrot.lane.b32.xlu0 %v828_v7, %s855_s20 }
  0x21   : > { %415 = vrot.lane.b32.xlu1 %v822_v3, %s856_s21  ;;  %413 = vrot.lane.b32.xlu0 %v820_v2, %s856_s21 }
  0x25   : > { %277 = vrot.lane.b32.xlu1 %v822_v3, %s857_s22  ;;  %275 = vrot.lane.b32.xlu0 %v820_v2, %s857_s22 }
  0x29   : > { %419 = vrot.lane.b32.xlu1 %v819_v1, %s856_s21  ;;  %417 = vrot.lane.b32.xlu0 %v817_v0, %s856_s21 }
  0x2d   : > { %281 = vrot.lane.b32.xlu1 %v819_v1, %s857_s22  ;;  %279 = vrot.lane.b32.xlu0 %v817_v0, %s857_s22 }
  0x31   : > { %423 = vrot.lane.b32.xlu1 %v823_v4, %s856_s21  ;;  %421 = vrot.lane.b32.xlu0 %v825_v5, %s856_s21 }
  0x35   : > { %285 = vrot.lane.b32.xlu1 %v823_v4, %s857_s22  ;;  %283 = vrot.lane.b32.xlu0 %v825_v5, %s857_s22 }
  0x39   : > { %427 = vrot.lane.b32.xlu1 %v826_v6, %s856_s21  ;;  %425 = vrot.lane.b32.xlu0 %v828_v7, %s856_s21 }
  0x3d   : > { %289 = vrot.lane.b32.xlu1 %v826_v6, %s857_s22  ;;  %287 = vrot.lane.b32.xlu0 %v828_v7, %s857_s22 }
  0x83   : > { %v349_v10 = vpop.permute.xlu1 %348  ;;  %v345_v11 = vpop.permute.xlu0 %344 }
  0x87   : > { %v351_v12 = vpop.permute.xlu1 %350  ;;  %v347_v14 = vpop.permute.xlu0 %346 }
  0x88   : > { %v361_v15 = vsel %vm360_vm0, %v345_v11, %v347_v14  ;;  %v362_v17 = vsel %vm360_vm0, %v349_v10, %v351_v12 }
  0x89   : > { %762 = vmatprep.subr.bf16.mxu0 %v361_v15  ;;  %790 = vmatprep.subr.bf16.mxu1 %v361_v15 }
  0x8a   : > { %763 = vmatpush3.bf16.msra.mxu0 %v829_v13  ;;  %798 = vmatpush3.bf16.msra.mxu1 %v829_v13 }
  0x8b   : > { %v355_v16 = vpop.permute.xlu1 %354  ;;  %v353_v19 = vpop.permute.xlu0 %352  ;;  %764 = vmatprep.subr.bf16.mxu0 %v362_v17  ;;  %791 = vmatprep.subr.bf16.mxu1 %v362_v17 }
  0x8c   : > { %v363_v21 = vsel %vm360_vm0, %v353_v19, %v355_v16 }
  0x8e   : > { %765 = vmatpush3.bf16.msra.mxu0 %v830_v18  ;;  %799 = vmatpush3.bf16.msra.mxu1 %v830_v18 }
  0x8f   : > { %v359_v20 = vpop.permute.xlu1 %358  ;;  %v357_v23 = vpop.permute.xlu0 %356  ;;  %766 = vmatprep.subr.bf16.mxu0 %v363_v21  ;;  %792 = vmatprep.subr.bf16.mxu1 %v363_v21 }
  0x90   : > { %v364_v25 = vsel %vm360_vm0, %v357_v23, %v359_v20 }
  0x92   : > { %767 = vmatpush3.bf16.msra.mxu0 %v831_v22  ;;  %800 = vmatpush3.bf16.msra.mxu1 %v831_v22 }
  0x93   : > { %v416_v24 = vpop.permute.xlu1 %415  ;;  %v414_v27 = vpop.permute.xlu0 %413  ;;  %768 = vmatprep.subr.bf16.mxu0 %v364_v25  ;;  %793 = vmatprep.subr.bf16.mxu1 %v364_v25 }
  0x94   : > { %v430_v29 = vsel %vm429_vm1, %v414_v27, %v416_v24 }
  0x96   : > { %769 = vmatpush3.bf16.msra.mxu0 %v832_v26  ;;  %801 = vmatpush3.bf16.msra.mxu1 %v832_v26 }
  0x97   : > { %v278_v28 = vpop.permute.xlu1 %277  ;;  %v276_v30 = vpop.permute.xlu0 %275  ;;  %770 = vmatprep.subr.bf16.mxu0 %v430_v29  ;;  %794 = vmatprep.subr.bf16.mxu1 %v430_v29 }
  0x98   : > { %v292_v31 = vsel %vm291_vm2, %v276_v30, %v278_v28 }
  0x9a   : > { %771 = vmatpush3.bf16.msra.mxu0 %v292_v31  ;;  %802 = vmatpush3.bf16.msra.mxu1 %v292_v31 }
  0x9b   : > { %v420_v32 = vpop.permute.xlu1 %419  ;;  %v418_v33 = vpop.permute.xlu0 %417 }
  0x9c   : > { %v431_v34 = vsel %vm429_vm1, %v418_v33, %v420_v32 }
  0x9d   : > { %772 = vmatprep.subr.bf16.mxu0 %v431_v34  ;;  %795 = vmatprep.subr.bf16.mxu1 %v431_v34 }
  0x9f   : > { %v282_v35 = vpop.permute.xlu1 %281  ;;  %v280_v36 = vpop.permute.xlu0 %279 }
  0xa0   : > { %v293_v37 = vsel %vm291_vm2, %v280_v36, %v282_v35 }
  0xa1   : > { %773 = vmatpush3.bf16.msra.mxu0 %v293_v37  ;;  %803 = vmatpush3.bf16.msra.mxu1 %v293_v37 }
  0xa3   : > { %v424_v38 = vpop.permute.xlu1 %423  ;;  %v422_v39 = vpop.permute.xlu0 %421 }
  0xa4   : > { %v432_v40 = vsel %vm429_vm1, %v422_v39, %v424_v38 }
  0xa5   : > { %774 = vmatprep.subr.bf16.mxu0 %v432_v40  ;;  %796 = vmatprep.subr.bf16.mxu1 %v432_v40 }
  0xa7   : > { %v286_v41 = vpop.permute.xlu1 %285  ;;  %v284_v42 = vpop.permute.xlu0 %283 }
  0xa8   : > { %v294_v43 = vsel %vm291_vm2, %v284_v42, %v286_v41 }
  0xa9   : > { %775 = vmatpush3.bf16.msra.mxu0 %v294_v43  ;;  %804 = vmatpush3.bf16.msra.mxu1 %v294_v43 }
  0xab   : > { %v428_v44 = vpop.permute.xlu1 %427  ;;  %v426_v45 = vpop.permute.xlu0 %425 }
  0xac   : > { %v433_v46 = vsel %vm429_vm1, %v426_v45, %v428_v44 }
  0xad   : > { %776 = vmatprep.subr.bf16.mxu0 %v433_v46  ;;  %797 = vmatprep.subr.bf16.mxu1 %v433_v46 }
  0xaf   : > { %v290_v47 = vpop.permute.xlu1 %289  ;;  %v288_v48 = vpop.permute.xlu0 %287 }
  0xb0   : > { %v295_v49 = vsel %vm291_vm2, %v288_v48, %v290_v47 }
  0xb1   : > { %777 = vmatpush3.bf16.msra.mxu0 %v295_v49  ;;  %805 = vmatpush3.bf16.msra.mxu1 %v295_v49 }
  0xb4   : > { %515 = vmatmul.mubr.bf16.vlgmr.msra.gmra.mrb[0].mxu0 %v833_v50  ;;  %523 = vmatmul.mubr.bf16.vlgmr.msra.gmra.mrb[0].mxu1 %v836_v51 }
 0x187   : > { %v778_v52 = vpop.f32.mrb[0].mxu0  ;;  %v784_v53 = vpop.f32.mrb[0].mxu1 }
 0x188   : > { %v779_v54 = vpop.f32.mrb[1].mxu0  ;;  %v785_v55 = vpop.f32.mrb[1].mxu1 }
 0x189   : > { %v938_v57 = vadd.f32 %v779_v54, %v778_v52  ;;  %v781_v58 = vpop.f32.mrb[2].mxu0  ;;  %v940_v59 = vadd.f32 %v785_v55, %v784_v53  ;;  %v787_v60 = vpop.f32.mrb[2].mxu1 }
 0x18a   : > { %v782_v61 = vpop.f32.mrb[3].mxu0  ;;  %v788_v62 = vpop.f32.mrb[3].mxu1 }
 0x18b   : > { %v942_v63 = vadd.f32 %v782_v61, %v781_v58  ;;  %v944_v0 = vadd.f32 %v788_v62, %v787_v60  ;;  %v546_v1 = vmul.f32 %v938_v57, %v738_v56  ;;  %v548_v3 = vmul.f32 %v940_v59, %v738_v56 }
 0x18c   : > { %v558_v4 = vmul.f32 %v938_v57, %v938_v57  ;;  %v560_v6 = vmul.f32 %v940_v59, %v940_v59 }
 0x18d   : > { %550 = vadd.xlane.f32.xlu0 %v546_v1  ;;  %v547_v2 = vmul.f32 %v942_v63, %v738_v56  ;;  %v549_v7 = vmul.f32 %v944_v0, %v738_v56  ;;  %v559_v8 = vmul.f32 %v942_v63, %v942_v63  ;;  %v561_v11 = vmul.f32 %v944_v0, %v944_v0 }
 0x18e   : > { %v562_v5 = vmul.f32 %v738_v56, %v558_v4  ;;  %v564_v9 = vmul.f32 %v738_v56, %v560_v6 }
 0x18f   : > { %552 = vadd.xlane.f32.xlu1 %v547_v2  ;;  %v563_v10 = vmul.f32 %v738_v56, %v559_v8  ;;  %v565_v12 = vmul.f32 %v738_v56, %v561_v11 }
 0x191   : > { %554 = vadd.xlane.f32.xlu0 %v548_v3 }
 0x193   : > { %566 = vadd.xlane.f32.xlu1 %v562_v5 }
 0x195   : > { %556 = vadd.xlane.f32.xlu0 %v549_v7 }
 0x197   : > { %570 = vadd.xlane.f32.xlu1 %v564_v9 }
 0x199   : > { %568 = vadd.xlane.f32.xlu0 %v563_v10 }
 0x19d   : > { %572 = vadd.xlane.f32.xlu0 %v565_v12 }
 0x21a   : > { %v551_v13 = vpop.xlane.xlu0 %550 }
 0x21b   : > { %v574_v15 = vmul.f32 0.0625, %v551_v13 }
 0x21c   : > { %v553_v14 = vpop.xlane.xlu1 %552 }
 0x21d   : > { %v582_v18 = vmul.f32 %v574_v15, %v574_v15  ;;  %v575_v21 = vmul.f32 0.0625, %v553_v14  ;;  %v602_v46 = vsub.f32 %v938_v57, %v574_v15 }
 0x21e   : > { %v555_v16 = vpop.xlane.xlu0 %554 }
 0x21f   : > { %v576_v19 = vmul.f32 0.0625, %v555_v16  ;;  %v583_v28 = vmul.f32 %v575_v21, %v575_v21  ;;  %v603_v49 = vsub.f32 %v942_v63, %v575_v21 }
 0x220   : > { %v567_v17 = vpop.xlane.xlu1 %566 }
 0x221   : > { %v578_v20 = vmul.f32 0.0625, %v567_v17  ;;  %v584_v25 = vmul.f32 %v576_v19, %v576_v19  ;;  %v604_v50 = vsub.f32 %v940_v59, %v576_v19 }
 0x222   : > { %v557_v22 = vpop.xlane.xlu0 %556 }
 0x223   : > { %v586_v23 = vsub.f32 %v578_v20, %v582_v18  ;;  %v577_v31 = vmul.f32 0.0625, %v557_v22 }
 0x224   : > { %v571_v24 = vpop.xlane.xlu1 %570 }
 0x225   : > { %v590_v26 = vmax.f32 %v586_v23, 0.0  ;;  %v580_v27 = vmul.f32 0.0625, %v571_v24  ;;  %v585_v37 = vmul.f32 %v577_v31, %v577_v31  ;;  %v605_v55 = vsub.f32 %v944_v0, %v577_v31 }
 0x226   : > { %v569_v29 = vpop.xlane.xlu0 %568 }
 0x227   : > { %v594_v30 = vadd.f32 1e-05, %v590_v26  ;;  %v588_v32 = vsub.f32 %v580_v27, %v584_v25  ;;  %v579_v33 = vmul.f32 0.0625, %v569_v29 }
 0x229   : > { %839 = vrsqrt.f32 %v594_v30  ;;  %v592_v34 = vmax.f32 %v588_v32, 0.0  ;;  %v587_v35 = vsub.f32 %v579_v33, %v583_v28 }
 0x22a   : > { %v573_v36 = vpop.xlane.xlu0 %572 }
 0x22b   : > { %v596_v38 = vadd.f32 1e-05, %v592_v34  ;;  %v591_v39 = vmax.f32 %v587_v35, 0.0  ;;  %v581_v40 = vmul.f32 0.0625, %v573_v36 }
 0x22d   : > { %841 = vrsqrt.f32 %v596_v38  ;;  %v595_v41 = vadd.f32 1e-05, %v591_v39  ;;  %v589_v42 = vsub.f32 %v581_v40, %v585_v37 }
 0x22f   : > { %843 = vrsqrt.f32 %v595_v41  ;;  %v593_v43 = vmax.f32 %v589_v42, 0.0 }
 0x231   : > { %v597_v44 = vadd.f32 1e-05, %v593_v43 }
 0x233   : > { %v840_v45 = vpop.eup %839  ;;  %845 = vrsqrt.f32 %v597_v44 }
 0x234   : > { %v606_v47 = vmul.f32 %v840_v45, %v602_v46 }
 0x236   : > { %v614_v52 = vmul.f32 0.2, %v606_v47  ;;  %vm610_vm3 = vcmp.ge.f32.partialorder %v606_v47, 0.0 }
 0x237   : > { %v842_v48 = vpop.eup %841 }
 0x238   : > { %v608_v53 = vmul.f32 %v842_v48, %v604_v50  ;;  %v618_v60 = vsel %vm610_vm3, %v606_v47, %v614_v52 }
 0x239   : > { %v844_v51 = vpop.eup %843 }
 0x23a   : > { %v607_v54 = vmul.f32 %v844_v51, %v603_v49  ;;  %v616_v61 = vmul.f32 0.2, %v608_v53  ;;  %vm612_vm5 = vcmp.ge.f32.partialorder %v608_v53, 0.0 }
 0x23c   : > { %vm611_vm4 = vcmp.ge.f32.partialorder %v607_v54, 0.0  ;;  %v615_v56 = vmul.f32 0.2, %v607_v54  ;;  %v620_v1 = vsel %vm612_vm5, %v608_v53, %v616_v61 }
 0x23d   : > { %v846_v58 = vpop.eup %845 }
 0x23e   : > { %v619_v57 = vsel %vm611_vm4, %v607_v54, %v615_v56  ;;  %v609_v62 = vmul.f32 %v846_v58, %v605_v55 }
 0x23f   : > { %v754_v59 = vpack.c.bf16 %v619_v57, %v618_v60 }
 0x240   : > { %vm613_vm6 = vcmp.ge.f32.partialorder %v609_v62, 0.0  ;;  %v617_v63 = vmul.f32 0.2, %v609_v62 }
 0x241   : > { %755 = vst [vmem:[%s197_s10] sm:$0xff] %v754_v59  }
 0x242   : > { %v621_v2 = vsel %vm613_vm6, %v609_v62, %v617_v63 }
 0x243   : > { %v759_v3 = vpack.c.bf16 %v621_v2, %v620_v1 }
 0x245   : > { %761 = vst [vmem:[%s197_s10 + $0x8] sm:$0xff] %v759_v3  }
 0x246 PF: > { %s14_s15 = sadd.s32 1, %s853_s15  }
 0x247   : > { %p11_p4 = scmp.ge.s32.totalorder %s14_s15, 4  }
 0x249   :  { %13 = sbr.rel (!%p11_p4) target bundleno = 1 (0x1), region = 66 }

// kernel: discriminator_forward.8
= control target key start
LH: loop header
LB: loop body
LE: loop exit
PB: predicated region body
PF: predicated region fallthrough
CT: control target
= control target key end

     0   :  { %s1600_s15 = smov 0   ;;  %s1878_s0 = inlined_call_operand.vmem [shape: bf16[2,32,256], index: 0, kind: input, shape index: {}]   ;;  %s1879_s1 = inlined_call_operand.vmem [shape: bf16[64,512], index: 1, kind: input, shape index: {}]   ;;  %s1880_s2 = inlined_call_operand.vmem [shape: f32[64,1], index: 2, kind: input, shape index: {}]   ;;  %s1881_s3 = inlined_call_operand.vmem [shape: f32[1,128], index: 3, kind: input, shape index: {}]   ;;  %s1882_s4 = inlined_call_operand.vmem [shape: bf16[2,64,128], index: 4, kind: output, shape index: {}]  }
   0x1 LB: > { %s1270_s16 = sadd.s32 4294967295, %s1558_s15   ;;  %p1274_p0 = scmp.ge.s32.totalorder %s1558_s15, 1  ;;  %s1558_s15 = sphi %s1600_s15, %s14_s15  }
   0x2   : > { %p162_p1 = scmp.lt.s32.totalorder %s1558_s15, 3 }
   0x4   : > { %p163_p2 = pnand %p1274_p0, %p162_p1 }
   0x5   : > { %p188_p3 = scmp.lt.s32.totalorder (!%p163_p2), %s1270_s16, 1  ;;  %s1560_s20 = smov (!%p163_p2), 110   ;;  %v1514_v4 = vld [vmem:[%s1879_s1 + $0x4] ss:$16 sps:$4 sm:$0xff] (!%p163_p2)   ;;  %v1517_v5 = vld [vmem:[%s1879_s1 + $0xc] ss:$16 sps:$4 sm:$0xff] (!%p163_p2)  }
   0x6   : > { %166 = sbr.rel (%p163_p2) target bundleno = 672 (0x2a0), region = 36  ;;  %s1561_s21 = smov (!%p163_p2), 122   ;;  %902 = vmatprep.mubr.bf16.mxu0 (!%p163_p2), %v1514_v4  ;;  %967 = vmatprep.mubr.bf16.mxu1 (!%p163_p2), %v1517_v5  ;;  %vm350_vm0 = vcmask (!%p163_p2), 998400   ;;  %vm630_vm1 = vcmask (!%p163_p2), 900096   ;;  %vm490_vm2 = vcmask (!%p163_p2), 949248   ;;  %vm385_vm3 = vcmask (!%p163_p2), 990208  }
   0x7   : > { %s1562_s22 = smov (!%p163_p2), 116   ;;  %s1563_s23 = smov (!%p163_p2), 121   ;;  %vm665_vm4 = vcmask (!%p163_p2), 891904   ;;  %vm245_vm5 = vcmask (!%p163_p2), 1039360   ;;  %vm525_vm6 = vcmask (!%p163_p2), 941056   ;;  %vm420_vm7 = vcmask (!%p163_p2), 982016  }
   0x8   : > { %s1564_s24 = smov (!%p163_p2), 109   ;;  %s1565_s25 = smov (!%p163_p2), 127   ;;  %vm700_vm8 = vcmask (!%p163_p2), 883712   ;;  %vm280_vm9 = vcmask (!%p163_p2), 1031168   ;;  %vm560_vm10 = vcmask (!%p163_p2), 932864   ;;  %vm455_vm11 = vcmask (!%p163_p2), 973824  }
   0x9   : > { %s1566_s26 = smov (!%p163_p2), 115   ;;  %s1567_s27 = smov (!%p163_p2), 120   ;;  %vm735_vm12 = vcmask (!%p163_p2), 875520   ;;  %vm315_vm13 = vcmask (!%p163_p2), 1022976   ;;  %vm595_vm14 = vcmask (!%p163_p2), 924672  }
   0xa   : > { %s1568_s28 = smov (!%p163_p2), 108   ;;  %s1569_s29 = smov (!%p163_p2), 126  }
   0xb   : > { %s1570_s30 = smov (!%p163_p2), 114   ;;  %s1571_s5 = smov (!%p163_p2), 119  }
   0xc   : > { %s1572_s6 = smov (!%p163_p2), 107   ;;  %s1573_s7 = smov (!%p163_p2), 125  }
   0xd   : > { %s1884_s16 = smov (!%p188_p3, %s1270_s16), 1  ;;  %s1574_s8 = smov 113  }
   0xe   : > { %s1368_s2 = sshll.u32 %s1884_s16, 5 }
   0xf   : > { %s1616_s19 = scalar_lea.vmem %s1878_s0, %s1368_s2 }
  0x10   : > { %v1619_v0 = vld [vmem:[%s1616_s19] ss:$8 sps:$4 sm:$0xff]   ;;  %v1622_v1 = vld [vmem:[%s1616_s19 + $0x4] ss:$8 sps:$4 sm:$0xff]   ;;  %v1631_v2 = vld [vmem:[%s1616_s19 + $0x14] ss:$8 sps:$4 sm:$0xff]  }
  0x11   : > { %622 = vrot.lane.b32.xlu1 %v1619_v0, %s1560_s20  ;;  %342 = vrot.lane.b32.xlu0 %v1619_v0, %s1561_s21  ;;  %v1634_v3 = vld [vmem:[%s1616_s19 + $0x10] ss:$8 sps:$4 sm:$0xff]   ;;  %v1510_v8 = vld [vmem:[%s1616_s19] ss:$8 sps:$4 sm:$0xff]  }
  0x12   : > { %v1511_v16 = vld [vmem:[%s1616_s19 + $0x10] ss:$8 sps:$4 sm:$0xff]  }
  0x15   : > { %624 = vrot.lane.b32.xlu1 %v1622_v1, %s1560_s20  ;;  %344 = vrot.lane.b32.xlu0 %v1622_v1, %s1561_s21 }
  0x19   : > { %484 = vrot.lane.b32.xlu1 %v1622_v1, %s1562_s22  ;;  %482 = vrot.lane.b32.xlu0 %v1619_v0, %s1562_s22 }
  0x1d   : > { %348 = vrot.lane.b32.xlu1 %v1631_v2, %s1561_s21  ;;  %346 = vrot.lane.b32.xlu0 %v1634_v3, %s1561_s21 }
  0x21   : > { %628 = vrot.lane.b32.xlu1 %v1631_v2, %s1560_s20  ;;  %626 = vrot.lane.b32.xlu0 %v1634_v3, %s1560_s20 }
  0x25   : > { %488 = vrot.lane.b32.xlu1 %v1631_v2, %s1562_s22  ;;  %486 = vrot.lane.b32.xlu0 %v1634_v3, %s1562_s22 }
  0x29   : > { %379 = vrot.lane.b32.xlu1 %v1622_v1, %s1563_s23  ;;  %377 = vrot.lane.b32.xlu0 %v1619_v0, %s1563_s23 }
  0x2d   : > { %659 = vrot.lane.b32.xlu1 %v1622_v1, %s1564_s24  ;;  %657 = vrot.lane.b32.xlu0 %v1619_v0, %s1564_s24 }
  0x31   : > { %239 = vrot.lane.b32.xlu1 %v1622_v1, %s1565_s25  ;;  %237 = vrot.lane.b32.xlu0 %v1619_v0, %s1565_s25 }
  0x35   : > { %519 = vrot.lane.b32.xlu1 %v1622_v1, %s1566_s26  ;;  %517 = vrot.lane.b32.xlu0 %v1619_v0, %s1566_s26 }
  0x39   : > { %383 = vrot.lane.b32.xlu1 %v1631_v2, %s1563_s23  ;;  %381 = vrot.lane.b32.xlu0 %v1634_v3, %s1563_s23  ;;  %s1858_s23 = scalar_lea.vmem %s1882_s4, %s1368_s2 }
  0x3d   : > { %663 = vrot.lane.b32.xlu1 %v1631_v2, %s1564_s24  ;;  %661 = vrot.lane.b32.xlu0 %v1634_v3, %s1564_s24 }
  0x41   : > { %243 = vrot.lane.b32.xlu1 %v1631_v2, %s1565_s25  ;;  %241 = vrot.lane.b32.xlu0 %v1634_v3, %s1565_s25 }
  0x45   : > { %523 = vrot.lane.b32.xlu1 %v1631_v2, %s1566_s26  ;;  %521 = vrot.lane.b32.xlu0 %v1634_v3, %s1566_s26 }
  0x49   : > { %414 = vrot.lane.b32.xlu1 %v1622_v1, %s1567_s27  ;;  %412 = vrot.lane.b32.xlu0 %v1619_v0, %s1567_s27 }
  0x4d   : > { %694 = vrot.lane.b32.xlu1 %v1622_v1, %s1568_s28  ;;  %692 = vrot.lane.b32.xlu0 %v1619_v0, %s1568_s28 }
  0x51   : > { %274 = vrot.lane.b32.xlu1 %v1622_v1, %s1569_s29  ;;  %272 = vrot.lane.b32.xlu0 %v1619_v0, %s1569_s29 }
  0x55   : > { %554 = vrot.lane.b32.xlu1 %v1622_v1, %s1570_s30  ;;  %552 = vrot.lane.b32.xlu0 %v1619_v0, %s1570_s30 }
  0x59   : > { %418 = vrot.lane.b32.xlu1 %v1631_v2, %s1567_s27  ;;  %416 = vrot.lane.b32.xlu0 %v1634_v3, %s1567_s27 }
  0x5d   : > { %698 = vrot.lane.b32.xlu1 %v1631_v2, %s1568_s28  ;;  %696 = vrot.lane.b32.xlu0 %v1634_v3, %s1568_s28 }
  0x61   : > { %278 = vrot.lane.b32.xlu1 %v1631_v2, %s1569_s29  ;;  %276 = vrot.lane.b32.xlu0 %v1634_v3, %s1569_s29 }
  0x65   : > { %558 = vrot.lane.b32.xlu1 %v1631_v2, %s1570_s30  ;;  %556 = vrot.lane.b32.xlu0 %v1634_v3, %s1570_s30 }
  0x69   : > { %449 = vrot.lane.b32.xlu1 %v1622_v1, %s1571_s5  ;;  %447 = vrot.lane.b32.xlu0 %v1619_v0, %s1571_s5 }
  0x6d   : > { %729 = vrot.lane.b32.xlu1 %v1622_v1, %s1572_s6  ;;  %727 = vrot.lane.b32.xlu0 %v1619_v0, %s1572_s6 }
  0x71   : > { %309 = vrot.lane.b32.xlu1 %v1622_v1, %s1573_s7  ;;  %307 = vrot.lane.b32.xlu0 %v1619_v0, %s1573_s7 }
  0x75   : > { %589 = vrot.lane.b32.xlu1 %v1622_v1, %s1574_s8  ;;  %587 = vrot.lane.b32.xlu0 %v1619_v0, %s1574_s8 }
  0x79   : > { %453 = vrot.lane.b32.xlu1 %v1631_v2, %s1571_s5  ;;  %451 = vrot.lane.b32.xlu0 %v1634_v3, %s1571_s5 }
  0x7d   : > { %733 = vrot.lane.b32.xlu1 %v1631_v2, %s1572_s6  ;;  %731 = vrot.lane.b32.xlu0 %v1634_v3, %s1572_s6 }
  0x81   : > { %313 = vrot.lane.b32.xlu1 %v1631_v2, %s1573_s7  ;;  %311 = vrot.lane.b32.xlu0 %v1634_v3, %s1573_s7 }
  0x83   : > { %v623_v6 = vpop.permute.xlu1 %622  ;;  %v343_v7 = vpop.permute.xlu0 %342 }
  0x85   : > { %593 = vrot.lane.b32.xlu1 %v1631_v2, %s1574_s8  ;;  %591 = vrot.lane.b32.xlu0 %v1634_v3, %s1574_s8 }
  0x87   : > { %v625_v9 = vpop.permute.xlu1 %624  ;;  %v345_v10 = vpop.permute.xlu0 %344 }
  0x88   : > { %v351_v11 = vsel %vm350_vm0, %v343_v7, %v345_v10  ;;  %v631_v12 = vsel %vm630_vm1, %v623_v6, %v625_v9 }
  0x89   : > { %1401 = vmatprep.subr.bf16.mxu0 %v351_v11  ;;  %1441 = vmatprep.subr.bf16.mxu1 %v631_v12 }
  0x8a   : > { %1402 = vmatpush3.bf16.msra.mxu0 %v1510_v8 }
  0x8b   : > { %v485_v13 = vpop.permute.xlu1 %484  ;;  %v483_v14 = vpop.permute.xlu0 %482 }
  0x8c   : > { %v491_v15 = vsel %vm490_vm2, %v483_v14, %v485_v13 }
  0x8d   : > { %1442 = vmatpush3.bf16.msra.mxu1 %v491_v15 }
  0x8f   : > { %v349_v17 = vpop.permute.xlu1 %348  ;;  %v347_v18 = vpop.permute.xlu0 %346 }
  0x90   : > { %v352_v19 = vsel %vm350_vm0, %v347_v18, %v349_v17 }
  0x91   : > { %1403 = vmatprep.subr.bf16.mxu0 %v352_v19 }
  0x92   : > { %1404 = vmatpush3.bf16.msra.mxu0 %v1511_v16 }
  0x93   : > { %v629_v20 = vpop.permute.xlu1 %628  ;;  %v627_v21 = vpop.permute.xlu0 %626 }
  0x94   : > { %v632_v22 = vsel %vm630_vm1, %v627_v21, %v629_v20 }
  0x95   : > { %1443 = vmatprep.subr.bf16.mxu1 %v632_v22 }
  0x97   : > { %v489_v23 = vpop.permute.xlu1 %488  ;;  %v487_v24 = vpop.permute.xlu0 %486 }
  0x98   : > { %v492_v25 = vsel %vm490_vm2, %v487_v24, %v489_v23 }
  0x99   : > { %1444 = vmatpush3.bf16.msra.mxu1 %v492_v25 }
  0x9b   : > { %v380_v26 = vpop.permute.xlu1 %379  ;;  %v378_v27 = vpop.permute.xlu0 %377 }
  0x9c   : > { %v386_v28 = vsel %vm385_vm3, %v378_v27, %v380_v26 }
  0x9d   : > { %1405 = vmatprep.subr.bf16.mxu0 %v386_v28 }
  0x9f   : > { %v660_v29 = vpop.permute.xlu1 %659  ;;  %v658_v30 = vpop.permute.xlu0 %657 }
  0xa0   : > { %v666_v31 = vsel %vm665_vm4, %v658_v30, %v660_v29 }
  0xa1   : > { %1445 = vmatprep.subr.bf16.mxu1 %v666_v31  ;;  %v1512_v31 = vld [vmem:[%s1879_s1] ss:$16 sps:$4 sm:$0xff]  }
  0xa3   : > { %v240_v32 = vpop.permute.xlu1 %239  ;;  %v238_v33 = vpop.permute.xlu0 %237 }
  0xa4   : > { %v246_v34 = vsel %vm245_vm5, %v238_v33, %v240_v32  ;;  %v1518_v32 = vld [vmem:[%s1879_s1 + $0x24] ss:$16 sps:$4 sm:$0xff]  }
  0xa5   : > { %1406 = vmatpush3.bf16.msra.mxu0 %v246_v34 }
  0xa7   : > { %v520_v35 = vpop.permute.xlu1 %519  ;;  %v518_v36 = vpop.permute.xlu0 %517 }
  0xa8   : > { %v526_v37 = vsel %vm525_vm6, %v518_v36, %v520_v35  ;;  %v1515_v36 = vld [vmem:[%s1879_s1 + $0x8] ss:$16 sps:$4 sm:$0xff]  }
  0xa9   : > { %1446 = vmatpush3.bf16.msra.mxu1 %v526_v37  ;;  %v1521_v37 = vld [vmem:[%s1879_s1 + $0x2c] ss:$16 sps:$4 sm:$0xff]  }
  0xab   : > { %v384_v38 = vpop.permute.xlu1 %383  ;;  %v382_v39 = vpop.permute.xlu0 %381 }
  0xac   : > { %v387_v40 = vsel %vm385_vm3, %v382_v39, %v384_v38  ;;  %v1520_v38 = vld [vmem:[%s1879_s1 + $0x20] ss:$16 sps:$4 sm:$0xff]   ;;  %v1524_v39 = vld [vmem:[%s1879_s1 + $0x44] ss:$16 sps:$4 sm:$0xff]  }
  0xad   : > { %1407 = vmatprep.subr.bf16.mxu0 %v387_v40  ;;  %v1523_v40 = vld [vmem:[%s1879_s1 + $0x28] ss:$16 sps:$4 sm:$0xff]  }
  0xaf   : > { %v664_v41 = vpop.permute.xlu1 %663  ;;  %v662_v42 = vpop.permute.xlu0 %661 }
  0xb0   : > { %v667_v43 = vsel %vm665_vm4, %v662_v42, %v664_v41  ;;  %v1527_v41 = vld [vmem:[%s1879_s1 + $0x4c] ss:$16 sps:$4 sm:$0xff]   ;;  %v1526_v42 = vld [vmem:[%s1879_s1 + $0x40] ss:$16 sps:$4 sm:$0xff]  }
  0xb1   : > { %1447 = vmatprep.subr.bf16.mxu1 %v667_v43  ;;  %v1530_v43 = vld [vmem:[%s1879_s1 + $0x64] ss:$16 sps:$4 sm:$0xff]  }
  0xb3   : > { %v244_v44 = vpop.permute.xlu1 %243  ;;  %v242_v45 = vpop.permute.xlu0 %241 }
  0xb4   : > { %v247_v46 = vsel %vm245_vm5, %v242_v45, %v244_v44  ;;  %v1529_v44 = vld [vmem:[%s1879_s1 + $0x48] ss:$16 sps:$4 sm:$0xff]   ;;  %v1533_v45 = vld [vmem:[%s1879_s1 + $0x6c] ss:$16 sps:$4 sm:$0xff]  }
  0xb5   : > { %1408 = vmatpush3.bf16.msra.mxu0 %v247_v46  ;;  %v1532_v46 = vld [vmem:[%s1879_s1 + $0x60] ss:$16 sps:$4 sm:$0xff]  }
  0xb7   : > { %v524_v47 = vpop.permute.xlu1 %523  ;;  %v522_v48 = vpop.permute.xlu0 %521 }
  0xb8   : > { %v527_v49 = vsel %vm525_vm6, %v522_v48, %v524_v47  ;;  %v1535_v47 = vld [vmem:[%s1879_s1 + $0x68] ss:$16 sps:$4 sm:$0xff]  }
  0xb9   : > { %1448 = vmatpush3.bf16.msra.mxu1 %v527_v49 }
  0xbb   : > { %v415_v50 = vpop.permute.xlu1 %414  ;;  %v413_v51 = vpop.permute.xlu0 %412 }
  0xbc   : > { %v421_v52 = vsel %vm420_vm7, %v413_v51, %v415_v50 }
  0xbd   : > { %1409 = vmatprep.subr.bf16.mxu0 %v421_v52 }
  0xbf   : > { %v695_v53 = vpop.permute.xlu1 %694  ;;  %v693_v54 = vpop.permute.xlu0 %692 }
  0xc0   : > { %v701_v55 = vsel %vm700_vm8, %v693_v54, %v695_v53 }
  0xc1   : > { %1449 = vmatprep.subr.bf16.mxu1 %v701_v55 }
  0xc3   : > { %v275_v56 = vpop.permute.xlu1 %274  ;;  %v273_v57 = vpop.permute.xlu0 %272 }
  0xc4   : > { %v281_v58 = vsel %vm280_vm9, %v273_v57, %v275_v56 }
  0xc5   : > { %1410 = vmatpush3.bf16.msra.mxu0 %v281_v58 }
  0xc7   : > { %v555_v59 = vpop.permute.xlu1 %554  ;;  %v553_v60 = vpop.permute.xlu0 %552 }
  0xc8   : > { %v561_v61 = vsel %vm560_vm10, %v553_v60, %v555_v59  ;;  %v1773_v59 = vld [vmem:[%s1881_s3] ss:$0 sm:$0xff] }
  0xc9   : > { %1450 = vmatpush3.bf16.msra.mxu1 %v561_v61 }
  0xcb   : > { %v419_v62 = vpop.permute.xlu1 %418  ;;  %v417_v63 = vpop.permute.xlu0 %416 }
  0xcc   : > { %v422_v0 = vsel %vm420_vm7, %v417_v63, %v419_v62 }
  0xcd   : > { %1411 = vmatprep.subr.bf16.mxu0 %v422_v0 }
  0xcf   : > { %v699_v1 = vpop.permute.xlu1 %698  ;;  %v697_v2 = vpop.permute.xlu0 %696 }
  0xd0   : > { %v702_v3 = vsel %vm700_vm8, %v697_v2, %v699_v1 }
  0xd1   : > { %1451 = vmatprep.subr.bf16.mxu1 %v702_v3 }
  0xd3   : > { %v279_v4 = vpop.permute.xlu1 %278  ;;  %v277_v5 = vpop.permute.xlu0 %276 }
  0xd4   : > { %v282_v6 = vsel %vm280_vm9, %v277_v5, %v279_v4 }
  0xd5   : > { %1412 = vmatpush3.bf16.msra.mxu0 %v282_v6 }
  0xd7   : > { %v559_v7 = vpop.permute.xlu1 %558  ;;  %v557_v8 = vpop.permute.xlu0 %556 }
  0xd8   : > { %v562_v9 = vsel %vm560_vm10, %v557_v8, %v559_v7 }
  0xd9   : > { %1452 = vmatpush3.bf16.msra.mxu1 %v562_v9 }
  0xdb   : > { %v450_v10 = vpop.permute.xlu1 %449  ;;  %v448_v11 = vpop.permute.xlu0 %447 }
  0xdc   : > { %v456_v12 = vsel %vm455_vm11, %v448_v11, %v450_v10 }
  0xdd   : > { %1413 = vmatprep.subr.bf16.mxu0 %v456_v12 }
  0xdf   : > { %v730_v13 = vpop.permute.xlu1 %729  ;;  %v728_v14 = vpop.permute.xlu0 %727 }
  0xe0   : > { %v736_v15 = vsel %vm735_vm12, %v728_v14, %v730_v13 }
  0xe1   : > { %1453 = vmatprep.subr.bf16.mxu1 %v736_v15 }
  0xe3   : > { %v310_v16 = vpop.permute.xlu1 %309  ;;  %v308_v17 = vpop.permute.xlu0 %307 }
  0xe4   : > { %v316_v18 = vsel %vm315_vm13, %v308_v17, %v310_v16 }
  0xe5   : > { %1414 = vmatpush3.bf16.msra.mxu0 %v316_v18 }
  0xe7   : > { %v590_v19 = vpop.permute.xlu1 %589  ;;  %v588_v20 = vpop.permute.xlu0 %587 }
  0xe8   : > { %v596_v21 = vsel %vm595_vm14, %v588_v20, %v590_v19 }
  0xe9   : > { %1454 = vmatpush3.bf16.msra.mxu1 %v596_v21 }
  0xeb   : > { %v454_v22 = vpop.permute.xlu1 %453  ;;  %v452_v23 = vpop.permute.xlu0 %451 }
  0xec   : > { %v457_v24 = vsel %vm455_vm11, %v452_v23, %v454_v22 }
  0xed   : > { %1415 = vmatprep.subr.bf16.mxu0 %v457_v24 }
  0xef   : > { %v734_v25 = vpop.permute.xlu1 %733  ;;  %v732_v26 = vpop.permute.xlu0 %731 }
  0xf0   : > { %v737_v27 = vsel %vm735_vm12, %v732_v26, %v734_v25 }
  0xf1   : > { %1455 = vmatprep.subr.bf16.mxu1 %v737_v27 }
  0xf3   : > { %v314_v28 = vpop.permute.xlu1 %313  ;;  %v312_v29 = vpop.permute.xlu0 %311 }
  0xf4   : > { %v317_v30 = vsel %vm315_vm13, %v312_v29, %v314_v28 }
  0xf5   : > { %1416 = vmatpush3.bf16.msra.mxu0 %v317_v30 }
  0xf7   : > { %v594_v33 = vpop.permute.xlu1 %593  ;;  %v592_v34 = vpop.permute.xlu0 %591 }
  0xf8   : > { %903 = vmatmul.mubr.bf16.vlgmr.msra.gmra.mrb[0].mxu0 %v1512_v31  ;;  %v597_v35 = vsel %vm595_vm14, %v592_v34, %v594_v33 }
  0xf9   : > { %1456 = vmatpush3.bf16.msra.mxu1 %v597_v35  ;;  %910 = vmatprep.mubr.bf16.mxu0 %v1518_v32 }
  0xfc   : > { %968 = vmatmul.mubr.bf16.vlgmr.msra.gmra.mrb[0].mxu1 %v1515_v36 }
  0xfd   : > { %975 = vmatprep.mubr.bf16.mxu1 %v1521_v37 }
 0x100   : > { %911 = vmatmul.mubr.bf16.gmra.mrb[4].mxu0 %v1520_v38 }
 0x101   : > { %918 = vmatprep.mubr.bf16.mxu0 %v1524_v39 }
 0x104   : > { %976 = vmatmul.mubr.bf16.gmra.mrb[4].mxu1 %v1523_v40 }
 0x105   : > { %983 = vmatprep.mubr.bf16.mxu1 %v1527_v41 }
 0x108   : > { %919 = vmatmul.mubr.bf16.gmra.mrb[8].mxu0 %v1526_v42 }
 0x109   : > { %926 = vmatprep.mubr.bf16.mxu0 %v1530_v43 }
 0x10c   : > { %984 = vmatmul.mubr.bf16.gmra.mrb[8].mxu1 %v1529_v44 }
 0x10d   : > { %991 = vmatprep.mubr.bf16.mxu1 %v1533_v45 }
 0x110   : > { %927 = vmatmul.mubr.bf16.gmra.mrb[12].mxu0 %v1532_v46 }
 0x114   : > { %992 = vmatmul.mubr.bf16.gmra.mrb[12].mxu1 %v1535_v47 }
 0x1cb   : > { %v1417_v48 = vpop.f32.mrb[0].mxu0 }
 0x1cc   : > { %v1418_v49 = vpop.f32.mrb[1].mxu0 }
 0x1cd   : > { %v1419_v50 = vadd.f32 %v1418_v49, %v1417_v48  ;;  %v1420_v51 = vpop.f32.mrb[2].mxu0 }
 0x1ce   : > { %v1421_v52 = vpop.f32.mrb[3].mxu0 }
 0x1cf   : > { %v1422_v53 = vadd.f32 %v1421_v52, %v1420_v51  ;;  %v1457_v54 = vpop.f32.mrb[0].mxu1 }
 0x1d0   : > { %v1458_v55 = vpop.f32.mrb[1].mxu1 }
 0x1d1   : > { %v1459_v56 = vadd.f32 %v1458_v55, %v1457_v54  ;;  %v1460_v57 = vpop.f32.mrb[2].mxu1 }
 0x1d2   : > { %v1461_v58 = vpop.f32.mrb[3].mxu1 }
 0x1d3   : > { %v1775_v60 = vadd.f32 %v1459_v56, %v1419_v50  ;;  %v1462_v61 = vadd.f32 %v1461_v58, %v1460_v57  ;;  %v1423_v62 = vpop.f32.mrb[4].mxu0 }
 0x1d4   : > { %v1424_v63 = vpop.f32.mrb[5].mxu0 }
 0x1d5   : > { %v1777_v0 = vadd.f32 %v1462_v61, %v1422_v53  ;;  %v1425_v1 = vadd.f32 %v1424_v63, %v1423_v62  ;;  %v1426_v2 = vpop.f32.mrb[6].mxu0  ;;  %v1023_v3 = vmul.f32 %v1773_v59, %v1775_v60  ;;  %v1047_v9 = vmul.f32 %v1775_v60, %v1775_v60 }
 0x1d6   : > { %v1427_v4 = vpop.f32.mrb[7].mxu0 }
 0x1d7   : > { %v1428_v5 = vadd.f32 %v1427_v4, %v1426_v2  ;;  %v1463_v6 = vpop.f32.mrb[4].mxu1  ;;  %1031 = vadd.xlane.f32.xlu0 %v1023_v3  ;;  %v1024_v7 = vmul.f32 %v1773_v59, %v1777_v0  ;;  %v1048_v8 = vmul.f32 %v1777_v0, %v1777_v0  ;;  %v1055_v17 = vmul.f32 %v1773_v59, %v1047_v9 }
 0x1d8   : > { %v1464_v10 = vpop.f32.mrb[5].mxu1 }
 0x1d9   : > { %v1465_v11 = vadd.f32 %v1464_v10, %v1463_v6  ;;  %v1466_v12 = vpop.f32.mrb[6].mxu1  ;;  %1033 = vadd.xlane.f32.xlu1 %v1024_v7  ;;  %v1056_v13 = vmul.f32 %v1773_v59, %v1048_v8 }
 0x1da   : > { %v1467_v14 = vpop.f32.mrb[7].mxu1 }
 0x1db   : > { %v1788_v15 = vadd.f32 %v1465_v11, %v1425_v1  ;;  %v1468_v16 = vadd.f32 %v1467_v14, %v1466_v12  ;;  %1065 = vadd.xlane.f32.xlu0 %v1056_v13  ;;  %v1429_v18 = vpop.f32.mrb[8].mxu0 }
 0x1dc   : > { %v1430_v19 = vpop.f32.mrb[9].mxu0 }
 0x1dd   : > { %v1791_v20 = vadd.f32 %v1468_v16, %v1428_v5  ;;  %1063 = vadd.xlane.f32.xlu1 %v1055_v17  ;;  %v1431_v21 = vadd.f32 %v1430_v19, %v1429_v18  ;;  %v1025_v22 = vmul.f32 %v1773_v59, %v1788_v15  ;;  %v1432_v23 = vpop.f32.mrb[10].mxu0  ;;  %v1049_v24 = vmul.f32 %v1788_v15, %v1788_v15 }
 0x1de   : > { %v1433_v25 = vpop.f32.mrb[11].mxu0 }
 0x1df   : > { %v1469_v26 = vpop.f32.mrb[8].mxu1  ;;  %1035 = vadd.xlane.f32.xlu0 %v1025_v22  ;;  %v1434_v27 = vadd.f32 %v1433_v25, %v1432_v23  ;;  %v1057_v28 = vmul.f32 %v1773_v59, %v1049_v24  ;;  %v1050_v30 = vmul.f32 %v1791_v20, %v1791_v20  ;;  %v1026_v33 = vmul.f32 %v1773_v59, %v1791_v20 }
 0x1e0   : > { %v1470_v29 = vpop.f32.mrb[9].mxu1 }
 0x1e1   : > { %v1471_v31 = vadd.f32 %v1470_v29, %v1469_v26  ;;  %v1472_v32 = vpop.f32.mrb[10].mxu1  ;;  %1067 = vadd.xlane.f32.xlu1 %v1057_v28  ;;  %v1058_v39 = vmul.f32 %v1773_v59, %v1050_v30 }
 0x1e2   : > { %v1473_v34 = vpop.f32.mrb[11].mxu1 }
 0x1e3   : > { %v1802_v35 = vadd.f32 %v1471_v31, %v1431_v21  ;;  %v1474_v36 = vadd.f32 %v1473_v34, %v1472_v32  ;;  %1037 = vadd.xlane.f32.xlu0 %v1026_v33  ;;  %v1435_v37 = vpop.f32.mrb[12].mxu0 }
 0x1e4   : > { %v1436_v38 = vpop.f32.mrb[13].mxu0 }
 0x1e5   : > { %v1805_v40 = vadd.f32 %v1474_v36, %v1434_v27  ;;  %v1437_v41 = vadd.f32 %v1436_v38, %v1435_v37  ;;  %v1027_v42 = vmul.f32 %v1773_v59, %v1802_v35  ;;  %v1438_v43 = vpop.f32.mrb[14].mxu0  ;;  %v1051_v44 = vmul.f32 %v1802_v35, %v1802_v35 }
 0x1e6   : > { %v1439_v45 = vpop.f32.mrb[15].mxu0 }
 0x1e7   : > { %v1475_v46 = vpop.f32.mrb[12].mxu1  ;;  %1039 = vadd.xlane.f32.xlu1 %v1027_v42  ;;  %1069 = vadd.xlane.f32.xlu0 %v1058_v39  ;;  %v1440_v47 = vadd.f32 %v1439_v45, %v1438_v43  ;;  %v1059_v48 = vmul.f32 %v1773_v59, %v1051_v44  ;;  %v1028_v52 = vmul.f32 %v1773_v59, %v1805_v40 }
 0x1e8   : > { %v1476_v49 = vpop.f32.mrb[13].mxu1  ;;  %v1052_v53 = vmul.f32 %v1805_v40, %v1805_v40 }
 0x1e9   : > { %v1477_v50 = vadd.f32 %v1476_v49, %v1475_v46  ;;  %v1478_v51 = vpop.f32.mrb[14].mxu1 }
 0x1ea   : > { %v1479_v54 = vpop.f32.mrb[15].mxu1  ;;  %v1060_v61 = vmul.f32 %v1773_v59, %v1052_v53 }
 0x1eb   : > { %v1816_v55 = vadd.f32 %v1477_v50, %v1437_v41  ;;  %v1480_v56 = vadd.f32 %v1479_v54, %v1478_v51  ;;  %1071 = vadd.xlane.f32.xlu1 %v1059_v48  ;;  %1041 = vadd.xlane.f32.xlu0 %v1028_v52 }
 0x1ed   : > { %v1818_v57 = vadd.f32 %v1480_v56, %v1440_v47  ;;  %v1029_v58 = vmul.f32 %v1773_v59, %v1816_v55  ;;  %v1053_v62 = vmul.f32 %v1816_v55, %v1816_v55 }
 0x1ef   : > { %1043 = vadd.xlane.f32.xlu1 %v1029_v58  ;;  %1073 = vadd.xlane.f32.xlu0 %v1060_v61  ;;  %v1061_v63 = vmul.f32 %v1773_v59, %v1053_v62  ;;  %v1030_v1 = vmul.f32 %v1773_v59, %v1818_v57  ;;  %v1054_v2 = vmul.f32 %v1818_v57, %v1818_v57 }
 0x1f1   : > { %v1062_v3 = vmul.f32 %v1773_v59, %v1054_v2 }
 0x1f3   : > { %1075 = vadd.xlane.f32.xlu1 %v1061_v63  ;;  %1045 = vadd.xlane.f32.xlu0 %v1030_v1 }
 0x1f7   : > { %1077 = vadd.xlane.f32.xlu0 %v1062_v3 }
 0x264   : > { %v1032_v4 = vpop.xlane.xlu0 %1031 }
 0x265   : > { %v1079_v6 = vmul.f32 0.11111111, %v1032_v4 }
 0x266   : > { %v1034_v5 = vpop.xlane.xlu1 %1033 }
 0x267   : > { %v1080_v7 = vmul.f32 0.11111111, %v1034_v5  ;;  %v1095_v12 = vmul.f32 %v1079_v6, %v1079_v6  ;;  %v1135_v49 = vsub.f32 %v1775_v60, %v1079_v6 }
 0x268   : > { %v1066_v8 = vpop.xlane.xlu0 %1065 }
 0x269   : > { %v1096_v9 = vmul.f32 %v1080_v7, %v1080_v7  ;;  %v1088_v10 = vmul.f32 0.11111111, %v1066_v8  ;;  %v1136_v45 = vsub.f32 %v1777_v0, %v1080_v7 }
 0x26a   : > { %v1064_v11 = vpop.xlane.xlu1 %1063 }
 0x26b   : > { %v1104_v13 = vsub.f32 %v1088_v10, %v1096_v9  ;;  %v1087_v14 = vmul.f32 0.11111111, %v1064_v11 }
 0x26c   : > { %v1036_v16 = vpop.xlane.xlu0 %1035 }
 0x26d   : > { %v1112_v17 = vmax.f32 %v1104_v13, 0.0  ;;  %v1103_v18 = vsub.f32 %v1087_v14, %v1095_v12  ;;  %v1831_v19 = vmul.f32 0.11111111, %v1036_v16 }
 0x26e   : > { %v1068_v21 = vpop.xlane.xlu1 %1067 }
 0x26f   : > { %v1120_v22 = vadd.f32 1e-05, %v1112_v17  ;;  %v1111_v59 = vmax.f32 %v1103_v18, 0.0  ;;  %v1097_v23 = vmul.f32 %v1831_v19, %v1831_v19  ;;  %v1089_v24 = vmul.f32 0.11111111, %v1068_v21 }
 0x270   : > { %v1038_v25 = vpop.xlane.xlu0 %1037  ;;  %v1137_v10 = vsub.f32 %v1788_v15, %v1831_v19 }
 0x271   : > { %1536 = vrsqrt.f32 %v1120_v22  ;;  %v1119_v26 = vadd.f32 1e-05, %v1111_v59  ;;  %v1835_v27 = vmul.f32 0.11111111, %v1038_v25  ;;  %v1105_v28 = vsub.f32 %v1089_v24, %v1097_v23 }
 0x273   : > { %1538 = vrsqrt.f32 %v1119_v26  ;;  %v1113_v29 = vmax.f32 %v1105_v28, 0.0  ;;  %v1098_v32 = vmul.f32 %v1835_v27, %v1835_v27  ;;  %v1138_v21 = vsub.f32 %v1791_v20, %v1835_v27 }
 0x274   : > { %v1040_v30 = vpop.xlane.xlu1 %1039  ;;  %v1070_v31 = vpop.xlane.xlu0 %1069 }
 0x275   : > { %v1839_v33 = vmul.f32 0.11111111, %v1040_v30  ;;  %v1090_v34 = vmul.f32 0.11111111, %v1070_v31  ;;  %v1121_v36 = vadd.f32 1e-05, %v1113_v29 }
 0x277   : > { %v1099_v37 = vmul.f32 %v1839_v33, %v1839_v33  ;;  %v1106_v38 = vsub.f32 %v1090_v34, %v1098_v32  ;;  %1540 = vrsqrt.f32 %v1121_v36  ;;  %v1139_v15 = vsub.f32 %v1802_v35, %v1839_v33 }
 0x278   : > { %v1072_v39 = vpop.xlane.xlu1 %1071  ;;  %v1042_v41 = vpop.xlane.xlu0 %1041 }
 0x279   : > { %v1114_v42 = vmax.f32 %v1106_v38, 0.0  ;;  %v1091_v43 = vmul.f32 0.11111111, %v1072_v39  ;;  %v1843_v44 = vmul.f32 0.11111111, %v1042_v41 }
 0x27b   : > { %v1537_v46 = vpop.eup %1536  ;;  %v1122_v47 = vadd.f32 1e-05, %v1114_v42  ;;  %v1107_v48 = vsub.f32 %v1091_v43, %v1099_v37  ;;  %v1100_v51 = vmul.f32 %v1843_v44, %v1843_v44  ;;  %v1140_v36 = vsub.f32 %v1805_v40, %v1843_v44 }
 0x27c   : > { %v1144_v50 = vmul.f32 %v1537_v46, %v1136_v45  ;;  %v1044_v52 = vpop.xlane.xlu1 %1043  ;;  %v1074_v53 = vpop.xlane.xlu0 %1073 }
 0x27d   : > { %v1539_v54 = vpop.eup %1538  ;;  %1542 = vrsqrt.f32 %v1122_v47  ;;  %v1115_v56 = vmax.f32 %v1107_v48, 0.0  ;;  %v1849_v58 = vmul.f32 0.11111111, %v1044_v52  ;;  %v1092_v61 = vmul.f32 0.11111111, %v1074_v53 }
 0x27e   : > { %v1160_v62 = vmul.f32 0.2, %v1144_v50  ;;  %v1143_v0 = vmul.f32 %v1539_v54, %v1135_v49  ;;  %vm1152_vm15 = vcmp.ge.f32.partialorder %v1144_v50, 0.0 }
 0x27f   : > { %v1123_v63 = vadd.f32 1e-05, %v1115_v56  ;;  %v1101_v60 = vmul.f32 %v1849_v58, %v1849_v58  ;;  %v1108_v1 = vsub.f32 %v1092_v61, %v1100_v51  ;;  %v1141_v41 = vsub.f32 %v1816_v55, %v1849_v58 }
 0x280   : > { %vm1151_vm0 = vcmp.ge.f32.partialorder %v1143_v0, 0.0  ;;  %v1159_v2 = vmul.f32 0.2, %v1143_v0  ;;  %v1076_v3 = vpop.xlane.xlu1 %1075  ;;  %v1046_v4 = vpop.xlane.xlu0 %1045  ;;  %v1168_v8 = vsel %vm1152_vm15, %v1144_v50, %v1160_v62 }
 0x281   : > { %1544 = vrsqrt.f32 %v1123_v63  ;;  %v1116_v5 = vmax.f32 %v1108_v1, 0.0  ;;  %v1093_v6 = vmul.f32 0.11111111, %v1076_v3  ;;  %v1541_v7 = vpop.eup %1540  ;;  %v1086_v11 = vmul.f32 0.11111111, %v1046_v4 }
 0x282   : > { %v1167_v9 = vsel %vm1151_vm0, %v1143_v0, %v1159_v2  ;;  %v1145_v16 = vmul.f32 %v1541_v7, %v1137_v10 }
 0x283   : > { %v1381_v12 = vpack.c.bf16 %v1168_v8, %v1167_v9  ;;  %v1124_v13 = vadd.f32 1e-05, %v1116_v5  ;;  %v1109_v14 = vsub.f32 %v1093_v6, %v1101_v60  ;;  %v1102_v22 = vmul.f32 %v1086_v11, %v1086_v11 }
 0x284   : > { %v1078_v17 = vpop.xlane.xlu0 %1077  ;;  %v1161_v25 = vmul.f32 0.2, %v1145_v16  ;;  %vm1153_vm1 = vcmp.ge.f32.partialorder %v1145_v16, 0.0  ;;  %v1142_v40 = vsub.f32 %v1818_v57, %v1086_v11 }
 0x285   : > { %1382 = vst [vmem:[%s1858_s23] sm:$0xff] %v1381_v12   ;;  %1546 = vrsqrt.f32 %v1124_v13  ;;  %v1117_v18 = vmax.f32 %v1109_v14, 0.0  ;;  %v1094_v59 = vmul.f32 0.11111111, %v1078_v17 }
 0x286   : > { %v1169_v31 = vsel %vm1153_vm1, %v1145_v16, %v1161_v25 }
 0x287   : > { %v1543_v23 = vpop.eup %1542  ;;  %v1125_v24 = vadd.f32 1e-05, %v1117_v18  ;;  %v1110_v28 = vsub.f32 %v1094_v59, %v1102_v22 }
 0x288   : > { %v1146_v26 = vmul.f32 %v1543_v23, %v1138_v21 }
 0x289   : > { %1548 = vrsqrt.f32 %v1125_v24  ;;  %v1118_v29 = vmax.f32 %v1110_v28, 0.0 }
 0x28a   : > { %vm1154_vm2 = vcmp.ge.f32.partialorder %v1146_v26, 0.0  ;;  %v1162_v19 = vmul.f32 0.2, %v1146_v26 }
 0x28b   : > { %v1545_v30 = vpop.eup %1544  ;;  %v1126_v27 = vadd.f32 1e-05, %v1118_v29 }
 0x28c   : > { %v1170_v32 = vsel %vm1154_vm2, %v1146_v26, %v1162_v19  ;;  %v1147_v20 = vmul.f32 %v1545_v30, %v1139_v15 }
 0x28d   : > { %v1386_v34 = vpack.c.bf16 %v1170_v32, %v1169_v31  ;;  %1550 = vrsqrt.f32 %v1126_v27 }
 0x28e   : > { %v1163_v38 = vmul.f32 0.2, %v1147_v20  ;;  %vm1155_vm3 = vcmp.ge.f32.partialorder %v1147_v20, 0.0 }
 0x28f   : > { %v1547_v37 = vpop.eup %1546  ;;  %1398 = vst [vmem:[%s1858_s23 + $0x8] sm:$0xff] %v1386_v34  }
 0x290   : > { %v1148_v39 = vmul.f32 %v1547_v37, %v1140_v36  ;;  %v1171_v42 = vsel %vm1155_vm3, %v1147_v20, %v1163_v38 }
 0x292   : > { %vm1156_vm4 = vcmp.ge.f32.partialorder %v1148_v39, 0.0  ;;  %v1164_v35 = vmul.f32 0.2, %v1148_v39 }
 0x293   : > { %v1549_v33 = vpop.eup %1548 }
 0x294   : > { %v1172_v43 = vsel %vm1156_vm4, %v1148_v39, %v1164_v35  ;;  %v1149_v46 = vmul.f32 %v1549_v33, %v1141_v41 }
 0x295   : > { %v1391_v45 = vpack.c.bf16 %v1172_v43, %v1171_v42 }
 0x296   : > { %v1165_v47 = vmul.f32 0.2, %v1149_v46  ;;  %vm1157_vm5 = vcmp.ge.f32.partialorder %v1149_v46, 0.0 }
 0x297   : > { %1399 = vst [vmem:[%s1858_s23 + $0x10] sm:$0xff] %v1391_v45   ;;  %v1551_v44 = vpop.eup %1550 }
 0x298   : > { %v1150_v48 = vmul.f32 %v1551_v44, %v1142_v40  ;;  %v1173_v50 = vsel %vm1157_vm5, %v1149_v46, %v1165_v47 }
 0x29a   : > { %vm1158_vm6 = vcmp.ge.f32.partialorder %v1150_v48, 0.0  ;;  %v1166_v49 = vmul.f32 0.2, %v1150_v48 }
 0x29c   : > { %v1174_v51 = vsel %vm1158_vm6, %v1150_v48, %v1166_v49 }
 0x29d   : > { %v1396_v52 = vpack.c.bf16 %v1174_v51, %v1173_v50 }
 0x29f   : > { %1400 = vst [vmem:[%s1858_s23 + $0x18] sm:$0xff] %v1396_v52  }
 0x2a0 PF: > { %s14_s15 = sadd.s32 1, %s1558_s15  }
 0x2a1   : > { %p11_p4 = scmp.ge.s32.totalorder %s14_s15, 4  }
 0x2a3   :  { %13 = sbr.rel (!%p11_p4) target bundleno = 1 (0x1), region = 66 }

// kernel: discriminator_forward.9
= control target key start
LH: loop header
LB: loop body
LE: loop exit
PB: predicated region body
PF: predicated region fallthrough
CT: control target
= control target key end

     0   :  { %s1916_s15 = smov 0   ;;  %s2250_s0 = inlined_call_operand.vmem [shape: bf16[2,64,256], index: 0, kind: input, shape index: {}]   ;;  %s2251_s1 = inlined_call_operand.vmem [shape: bf16[8,1024], index: 1, kind: input, shape index: {}]   ;;  %s2252_s2 = inlined_call_operand.vmem [shape: f32[8,1], index: 2, kind: input, shape index: {}]   ;;  %s2253_s3 = inlined_call_operand.vmem [shape: f32[1,128], index: 3, kind: input, shape index: {}]   ;;  %s2254_s4 = inlined_call_operand.vmem [shape: f32[2,8,128], index: 4, kind: output, shape index: {}]  }
   0x1 LB: > { %s1587_s16 = sadd.s32 4294967295, %s1873_s15   ;;  %p1591_p0 = scmp.ge.s32.totalorder %s1873_s15, 1  ;;  %s1873_s15 = sphi %s1916_s15, %s14_s15  }
   0x2   : > { %p162_p1 = scmp.lt.s32.totalorder %s1873_s15, 3 }
   0x4   : > { %p163_p2 = pnand %p1591_p0, %p162_p1 }
   0x5   : > { %p187_p3 = scmp.lt.s32.totalorder (!%p163_p2), %s1587_s16, 1  ;;  %s1875_s20 = smov (!%p163_p2), 121   ;;  %v2011_v8 = vld [vmem:[%s2251_s1] sm:$0xff] (!%p163_p2)  ;;  %v2022_v10 = vld [vmem:[%s2251_s1 + $0x8] sm:$0xff] (!%p163_p2)  ;;  %vm358_vm0 = vcmask (!%p163_p2), 1031168   ;;  %vm634_vm1 = vcmask (!%p163_p2), 990208  }
   0x6   : > { %166 = sbr.rel (%p163_p2) target bundleno = 593 (0x251), region = 36  ;;  %s1876_s21 = smov (!%p163_p2), 126   ;;  %v1720_v9 = vcombine.high (!%p163_p2), %v2011_v8, %v2011_v8  ;;  %v1722_v11 = vcombine.high (!%p163_p2), %v2022_v10, %v2022_v10  ;;  %vm496_vm2 = vcmask (!%p163_p2), 1006592   ;;  %vm427_vm3 = vcmask (!%p163_p2), 1022976  }
   0x7   : > { %s1877_s22 = smov (!%p163_p2), 123   ;;  %s1878_s23 = smov (!%p163_p2), 125   ;;  %vm289_vm4 = vcmask (!%p163_p2), 1039360   ;;  %vm703_vm5 = vcmask (!%p163_p2), 982016   ;;  %vm565_vm6 = vcmask (!%p163_p2), 998400   ;;  %vm910_vm7 = vcmask (!%p163_p2), 949248  }
   0x8   : > { %s1879_s24 = smov (!%p163_p2), 127   ;;  %s1880_s25 = smov (!%p163_p2), 120   ;;  %1396 = vmatprep.mubr.bf16.mxu0 (!%p163_p2), %v1720_v9  ;;  %1436 = vmatprep.mubr.bf16.mxu1 (!%p163_p2), %v1722_v11  ;;  %vm772_vm8 = vcmask (!%p163_p2), 965632   ;;  %vm1186_vm9 = vcmask (!%p163_p2), 908288   ;;  %vm1048_vm10 = vcmask (!%p163_p2), 924672   ;;  %vm979_vm11 = vcmask (!%p163_p2), 941056  }
   0x9   : > { %s1881_s26 = smov (!%p163_p2), 122   ;;  %s1882_s5 = smov (!%p163_p2), 116   ;;  %vm841_vm12 = vcmask (!%p163_p2), 957440   ;;  %vm1255_vm13 = vcmask (!%p163_p2), 900096   ;;  %vm1117_vm14 = vcmask (!%p163_p2), 916480  }
   0xa   : > { %s1883_s6 = smov (!%p163_p2), 118   ;;  %s1884_s7 = smov (!%p163_p2), 111  }
   0xb   : > { %s1885_s8 = smov (!%p163_p2), 113   ;;  %s1886_s9 = smov (!%p163_p2), 115  }
   0xc   : > { %s1887_s10 = smov (!%p163_p2), 117   ;;  %s1888_s11 = smov (!%p163_p2), 110  }
   0xd   : > { %s2256_s16 = smov (!%p187_p3, %s1587_s16), 1  ;;  %s1889_s12 = smov 112  }
   0xe   : > { %s1729_s3 = sshll.u32 %s2256_s16, 6 }
   0xf   : > { %s1930_s19 = scalar_lea.vmem %s2250_s0, %s1729_s3 }
  0x10   : > { %v1933_v0 = vld [vmem:[%s1930_s19] ss:$8 sps:$4 sm:$0xff]   ;;  %v1936_v1 = vld [vmem:[%s1930_s19 + $0x4] ss:$8 sps:$4 sm:$0xff]   ;;  %v1945_v2 = vld [vmem:[%s1930_s19 + $0x14] ss:$8 sps:$4 sm:$0xff]  }
  0x11   : > { %618 = vrot.lane.b32.xlu1 %v1933_v0, %s1875_s20  ;;  %342 = vrot.lane.b32.xlu0 %v1933_v0, %s1876_s21  ;;  %v1948_v3 = vld [vmem:[%s1930_s19 + $0x10] ss:$8 sps:$4 sm:$0xff]   ;;  %v1957_v4 = vld [vmem:[%s1930_s19 + $0x24] ss:$8 sps:$4 sm:$0xff]  }
  0x12   : > { %v1960_v5 = vld [vmem:[%s1930_s19 + $0x20] ss:$8 sps:$4 sm:$0xff]   ;;  %v1969_v6 = vld [vmem:[%s1930_s19 + $0x34] ss:$8 sps:$4 sm:$0xff]   ;;  %v1972_v7 = vld [vmem:[%s1930_s19 + $0x30] ss:$8 sps:$4 sm:$0xff]  }
  0x13   : > { %v1855_v16 = vld [vmem:[%s1930_s19] ss:$8 sps:$4 sm:$0xff]   ;;  %v1856_v24 = vld [vmem:[%s1930_s19 + $0x10] ss:$8 sps:$4 sm:$0xff]  }
  0x14   : > { %v1857_v34 = vld [vmem:[%s1930_s19 + $0x20] ss:$8 sps:$4 sm:$0xff]   ;;  %v1858_v44 = vld [vmem:[%s1930_s19 + $0x30] ss:$8 sps:$4 sm:$0xff]  }
  0x15   : > { %620 = vrot.lane.b32.xlu1 %v1936_v1, %s1875_s20  ;;  %344 = vrot.lane.b32.xlu0 %v1936_v1, %s1876_s21 }
  0x19   : > { %482 = vrot.lane.b32.xlu1 %v1936_v1, %s1877_s22  ;;  %480 = vrot.lane.b32.xlu0 %v1933_v0, %s1877_s22 }
  0x1d   : > { %348 = vrot.lane.b32.xlu1 %v1945_v2, %s1876_s21  ;;  %346 = vrot.lane.b32.xlu0 %v1948_v3, %s1876_s21 }
  0x21   : > { %624 = vrot.lane.b32.xlu1 %v1945_v2, %s1875_s20  ;;  %622 = vrot.lane.b32.xlu0 %v1948_v3, %s1875_s20 }
  0x25   : > { %486 = vrot.lane.b32.xlu1 %v1945_v2, %s1877_s22  ;;  %484 = vrot.lane.b32.xlu0 %v1948_v3, %s1877_s22 }
  0x29   : > { %352 = vrot.lane.b32.xlu1 %v1957_v4, %s1876_s21  ;;  %350 = vrot.lane.b32.xlu0 %v1960_v5, %s1876_s21 }
  0x2d   : > { %628 = vrot.lane.b32.xlu1 %v1957_v4, %s1875_s20  ;;  %626 = vrot.lane.b32.xlu0 %v1960_v5, %s1875_s20 }
  0x31   : > { %490 = vrot.lane.b32.xlu1 %v1957_v4, %s1877_s22  ;;  %488 = vrot.lane.b32.xlu0 %v1960_v5, %s1877_s22 }
  0x35   : > { %356 = vrot.lane.b32.xlu1 %v1969_v6, %s1876_s21  ;;  %354 = vrot.lane.b32.xlu0 %v1972_v7, %s1876_s21 }
  0x39   : > { %632 = vrot.lane.b32.xlu1 %v1969_v6, %s1875_s20  ;;  %630 = vrot.lane.b32.xlu0 %v1972_v7, %s1875_s20  ;;  %s1594_s20 = sshll.u32 %s2256_s16, 3 }
  0x3d   : > { %494 = vrot.lane.b32.xlu1 %v1969_v6, %s1877_s22  ;;  %492 = vrot.lane.b32.xlu0 %v1972_v7, %s1877_s22 }
  0x41   : > { %413 = vrot.lane.b32.xlu1 %v1936_v1, %s1878_s23  ;;  %411 = vrot.lane.b32.xlu0 %v1933_v0, %s1878_s23 }
  0x45   : > { %275 = vrot.lane.b32.xlu1 %v1936_v1, %s1879_s24  ;;  %273 = vrot.lane.b32.xlu0 %v1933_v0, %s1879_s24 }
  0x49   : > { %689 = vrot.lane.b32.xlu1 %v1936_v1, %s1880_s25  ;;  %687 = vrot.lane.b32.xlu0 %v1933_v0, %s1880_s25 }
  0x4d   : > { %551 = vrot.lane.b32.xlu1 %v1936_v1, %s1881_s26  ;;  %549 = vrot.lane.b32.xlu0 %v1933_v0, %s1881_s26 }
  0x51   : > { %417 = vrot.lane.b32.xlu1 %v1945_v2, %s1878_s23  ;;  %415 = vrot.lane.b32.xlu0 %v1948_v3, %s1878_s23 }
  0x55   : > { %279 = vrot.lane.b32.xlu1 %v1945_v2, %s1879_s24  ;;  %277 = vrot.lane.b32.xlu0 %v1948_v3, %s1879_s24 }
  0x59   : > { %693 = vrot.lane.b32.xlu1 %v1945_v2, %s1880_s25  ;;  %691 = vrot.lane.b32.xlu0 %v1948_v3, %s1880_s25 }
  0x5d   : > { %555 = vrot.lane.b32.xlu1 %v1945_v2, %s1881_s26  ;;  %553 = vrot.lane.b32.xlu0 %v1948_v3, %s1881_s26 }
  0x61   : > { %421 = vrot.lane.b32.xlu1 %v1957_v4, %s1878_s23  ;;  %419 = vrot.lane.b32.xlu0 %v1960_v5, %s1878_s23 }
  0x65   : > { %283 = vrot.lane.b32.xlu1 %v1957_v4, %s1879_s24  ;;  %281 = vrot.lane.b32.xlu0 %v1960_v5, %s1879_s24 }
  0x69   : > { %697 = vrot.lane.b32.xlu1 %v1957_v4, %s1880_s25  ;;  %695 = vrot.lane.b32.xlu0 %v1960_v5, %s1880_s25 }
  0x6d   : > { %559 = vrot.lane.b32.xlu1 %v1957_v4, %s1881_s26  ;;  %557 = vrot.lane.b32.xlu0 %v1960_v5, %s1881_s26 }
  0x71   : > { %425 = vrot.lane.b32.xlu1 %v1969_v6, %s1878_s23  ;;  %423 = vrot.lane.b32.xlu0 %v1972_v7, %s1878_s23  ;;  %s195_s23 = scalar_lea.vmem %s2254_s4, %s1594_s20 }
  0x75   : > { %287 = vrot.lane.b32.xlu1 %v1969_v6, %s1879_s24  ;;  %285 = vrot.lane.b32.xlu0 %v1972_v7, %s1879_s24 }
  0x79   : > { %701 = vrot.lane.b32.xlu1 %v1969_v6, %s1880_s25  ;;  %699 = vrot.lane.b32.xlu0 %v1972_v7, %s1880_s25 }
  0x7d   : > { %563 = vrot.lane.b32.xlu1 %v1969_v6, %s1881_s26  ;;  %561 = vrot.lane.b32.xlu0 %v1972_v7, %s1881_s26 }
  0x81   : > { %896 = vrot.lane.b32.xlu1 %v1936_v1, %s1882_s5  ;;  %894 = vrot.lane.b32.xlu0 %v1933_v0, %s1882_s5 }
  0x83   : > { %v619_v12 = vpop.permute.xlu1 %618  ;;  %v343_v13 = vpop.permute.xlu0 %342 }
  0x85   : > { %758 = vrot.lane.b32.xlu1 %v1936_v1, %s1883_s6  ;;  %756 = vrot.lane.b32.xlu0 %v1933_v0, %s1883_s6 }
  0x87   : > { %v621_v14 = vpop.permute.xlu1 %620  ;;  %v345_v15 = vpop.permute.xlu0 %344 }
  0x88   : > { %v359_v17 = vsel %vm358_vm0, %v343_v13, %v345_v15  ;;  %v635_v18 = vsel %vm634_vm1, %v619_v12, %v621_v14 }
  0x89   : > { %1730 = vmatprep.subr.bf16.mxu0 %v359_v17  ;;  %1752 = vmatprep.subr.bf16.mxu1 %v635_v18 }
  0x8a   : > { %1172 = vrot.lane.b32.xlu1 %v1936_v1, %s1884_s7  ;;  %1170 = vrot.lane.b32.xlu0 %v1933_v0, %s1884_s7 }
  0x8b   : > { %v483_v19 = vpop.permute.xlu1 %482  ;;  %v481_v20 = vpop.permute.xlu0 %480  ;;  %1731 = vmatpush3.bf16.msra.mxu0 %v1855_v16 }
  0x8c   : > { %v497_v21 = vsel %vm496_vm2, %v481_v20, %v483_v19 }
  0x8d   : > { %1753 = vmatpush3.bf16.msra.mxu1 %v497_v21 }
  0x8e   : > { %1034 = vrot.lane.b32.xlu1 %v1936_v1, %s1885_s8  ;;  %1032 = vrot.lane.b32.xlu0 %v1933_v0, %s1885_s8 }
  0x8f   : > { %v349_v22 = vpop.permute.xlu1 %348  ;;  %v347_v23 = vpop.permute.xlu0 %346 }
  0x90   : > { %v360_v25 = vsel %vm358_vm0, %v347_v23, %v349_v22 }
  0x91   : > { %1732 = vmatprep.subr.bf16.mxu0 %v360_v25 }
  0x92   : > { %900 = vrot.lane.b32.xlu1 %v1945_v2, %s1882_s5  ;;  %898 = vrot.lane.b32.xlu0 %v1948_v3, %s1882_s5 }
  0x93   : > { %v625_v26 = vpop.permute.xlu1 %624  ;;  %v623_v27 = vpop.permute.xlu0 %622  ;;  %1733 = vmatpush3.bf16.msra.mxu0 %v1856_v24 }
  0x94   : > { %v636_v28 = vsel %vm634_vm1, %v623_v27, %v625_v26 }
  0x95   : > { %1754 = vmatprep.subr.bf16.mxu1 %v636_v28 }
  0x96   : > { %762 = vrot.lane.b32.xlu1 %v1945_v2, %s1883_s6  ;;  %760 = vrot.lane.b32.xlu0 %v1948_v3, %s1883_s6 }
  0x97   : > { %v487_v29 = vpop.permute.xlu1 %486  ;;  %v485_v30 = vpop.permute.xlu0 %484 }
  0x98   : > { %v498_v31 = vsel %vm496_vm2, %v485_v30, %v487_v29 }
  0x99   : > { %1755 = vmatpush3.bf16.msra.mxu1 %v498_v31 }
  0x9a   : > { %1176 = vrot.lane.b32.xlu1 %v1945_v2, %s1884_s7  ;;  %1174 = vrot.lane.b32.xlu0 %v1948_v3, %s1884_s7 }
  0x9b   : > { %v353_v32 = vpop.permute.xlu1 %352  ;;  %v351_v33 = vpop.permute.xlu0 %350 }
  0x9c   : > { %v361_v35 = vsel %vm358_vm0, %v351_v33, %v353_v32 }
  0x9d   : > { %1734 = vmatprep.subr.bf16.mxu0 %v361_v35 }
  0x9e   : > { %1038 = vrot.lane.b32.xlu1 %v1945_v2, %s1885_s8  ;;  %1036 = vrot.lane.b32.xlu0 %v1948_v3, %s1885_s8 }
  0x9f   : > { %v629_v36 = vpop.permute.xlu1 %628  ;;  %v627_v37 = vpop.permute.xlu0 %626  ;;  %1735 = vmatpush3.bf16.msra.mxu0 %v1857_v34 }
  0xa0   : > { %v637_v38 = vsel %vm634_vm1, %v627_v37, %v629_v36  ;;  %v1719_v36 = vcombine.low %v2011_v8, %v2011_v8  ;;  %v2169_v37 = vld [vmem:[%s2251_s1 + $0x10] sm:$0xff] }
  0xa1   : > { %1756 = vmatprep.subr.bf16.mxu1 %v637_v38 }
  0xa2   : > { %904 = vrot.lane.b32.xlu1 %v1957_v4, %s1882_s5  ;;  %902 = vrot.lane.b32.xlu0 %v1960_v5, %s1882_s5 }
  0xa3   : > { %v491_v39 = vpop.permute.xlu1 %490  ;;  %v489_v40 = vpop.permute.xlu0 %488 }
  0xa4   : > { %v499_v41 = vsel %vm496_vm2, %v489_v40, %v491_v39  ;;  %v1724_v40 = vcombine.high %v2169_v37, %v2169_v37 }
  0xa5   : > { %1757 = vmatpush3.bf16.msra.mxu1 %v499_v41 }
  0xa6   : > { %766 = vrot.lane.b32.xlu1 %v1957_v4, %s1883_s6  ;;  %764 = vrot.lane.b32.xlu0 %v1960_v5, %s1883_s6 }
  0xa7   : > { %v357_v42 = vpop.permute.xlu1 %356  ;;  %v355_v43 = vpop.permute.xlu0 %354 }
  0xa8   : > { %v362_v45 = vsel %vm358_vm0, %v355_v43, %v357_v42 }
  0xa9   : > { %1736 = vmatprep.subr.bf16.mxu0 %v362_v45 }
  0xaa   : > { %1180 = vrot.lane.b32.xlu1 %v1957_v4, %s1884_s7  ;;  %1178 = vrot.lane.b32.xlu0 %v1960_v5, %s1884_s7 }
  0xab   : > { %v633_v46 = vpop.permute.xlu1 %632  ;;  %v631_v47 = vpop.permute.xlu0 %630  ;;  %1737 = vmatpush3.bf16.msra.mxu0 %v1858_v44  ;;  %v1721_v44 = vcombine.low %v2022_v10, %v2022_v10 }
  0xac   : > { %v638_v48 = vsel %vm634_vm1, %v631_v47, %v633_v46 }
  0xad   : > { %1758 = vmatprep.subr.bf16.mxu1 %v638_v48 }
  0xae   : > { %1042 = vrot.lane.b32.xlu1 %v1957_v4, %s1885_s8  ;;  %1040 = vrot.lane.b32.xlu0 %v1960_v5, %s1885_s8 }
  0xaf   : > { %v495_v49 = vpop.permute.xlu1 %494  ;;  %v493_v50 = vpop.permute.xlu0 %492 }
  0xb0   : > { %v500_v51 = vsel %vm496_vm2, %v493_v50, %v495_v49  ;;  %v1890_v49 = vmov 0  }
  0xb1   : > { %1759 = vmatpush3.bf16.msra.mxu1 %v500_v51  ;;  %1842 = vset.pattern.permute.xlu0 %v1890_v49 }
  0xb2   : > { %908 = vrot.lane.b32.xlu1 %v1969_v6, %s1882_s5  ;;  %906 = vrot.lane.b32.xlu0 %v1972_v7, %s1882_s5 }
  0xb3   : > { %v414_v52 = vpop.permute.xlu1 %413  ;;  %v412_v53 = vpop.permute.xlu0 %411 }
  0xb4   : > { %v428_v54 = vsel %vm427_vm3, %v412_v53, %v414_v52 }
  0xb5   : > { %1738 = vmatprep.subr.bf16.mxu0 %v428_v54  ;;  %v1526_v54 = vld [vmem:[%s2252_s2] sm:$0xff] }
  0xb6   : > { %770 = vrot.lane.b32.xlu1 %v1969_v6, %s1883_s6  ;;  %768 = vrot.lane.b32.xlu0 %v1972_v7, %s1883_s6 }
  0xb7   : > { %v276_v55 = vpop.permute.xlu1 %275  ;;  %v274_v56 = vpop.permute.xlu0 %273 }
  0xb8   : > { %v290_v57 = vsel %vm289_vm4, %v274_v56, %v276_v55 }
  0xb9   : > { %1739 = vmatpush3.bf16.msra.mxu0 %v290_v57 }
  0xba   : > { %1184 = vrot.lane.b32.xlu1 %v1969_v6, %s1884_s7  ;;  %1182 = vrot.lane.b32.xlu0 %v1972_v7, %s1884_s7 }
  0xbb   : > { %v690_v58 = vpop.permute.xlu1 %689  ;;  %v688_v59 = vpop.permute.xlu0 %687 }
  0xbc   : > { %v704_v60 = vsel %vm703_vm5, %v688_v59, %v690_v58 }
  0xbd   : > { %1760 = vmatprep.subr.bf16.mxu1 %v704_v60 }
  0xbe   : > { %1046 = vrot.lane.b32.xlu1 %v1969_v6, %s1885_s8  ;;  %1044 = vrot.lane.b32.xlu0 %v1972_v7, %s1885_s8 }
  0xbf   : > { %v552_v61 = vpop.permute.xlu1 %551  ;;  %v550_v62 = vpop.permute.xlu0 %549 }
  0xc0   : > { %v566_v63 = vsel %vm565_vm6, %v550_v62, %v552_v61 }
  0xc1   : > { %1761 = vmatpush3.bf16.msra.mxu1 %v566_v63 }
  0xc2   : > { %965 = vrot.lane.b32.xlu1 %v1936_v1, %s1886_s9  ;;  %963 = vrot.lane.b32.xlu0 %v1933_v0, %s1886_s9 }
  0xc3   : > { %v418_v9 = vpop.permute.xlu1 %417  ;;  %v416_v11 = vpop.permute.xlu0 %415 }
  0xc4   : > { %v429_v12 = vsel %vm427_vm3, %v416_v11, %v418_v9 }
  0xc5   : > { %1740 = vmatprep.subr.bf16.mxu0 %v429_v12 }
  0xc6   : > { %827 = vrot.lane.b32.xlu1 %v1936_v1, %s1887_s10  ;;  %825 = vrot.lane.b32.xlu0 %v1933_v0, %s1887_s10 }
  0xc7   : > { %v280_v13 = vpop.permute.xlu1 %279  ;;  %v278_v14 = vpop.permute.xlu0 %277 }
  0xc8   : > { %v291_v15 = vsel %vm289_vm4, %v278_v14, %v280_v13 }
  0xc9   : > { %1741 = vmatpush3.bf16.msra.mxu0 %v291_v15 }
  0xca   : > { %1241 = vrot.lane.b32.xlu1 %v1936_v1, %s1888_s11  ;;  %1239 = vrot.lane.b32.xlu0 %v1933_v0, %s1888_s11 }
  0xcb   : > { %v694_v16 = vpop.permute.xlu1 %693  ;;  %v692_v17 = vpop.permute.xlu0 %691 }
  0xcc   : > { %v705_v18 = vsel %vm703_vm5, %v692_v17, %v694_v16 }
  0xcd   : > { %1762 = vmatprep.subr.bf16.mxu1 %v705_v18 }
  0xce   : > { %1103 = vrot.lane.b32.xlu1 %v1936_v1, %s1889_s12  ;;  %1101 = vrot.lane.b32.xlu0 %v1933_v0, %s1889_s12 }
  0xcf   : > { %v556_v19 = vpop.permute.xlu1 %555  ;;  %v554_v20 = vpop.permute.xlu0 %553 }
  0xd0   : > { %v567_v21 = vsel %vm565_vm6, %v554_v20, %v556_v19 }
  0xd1   : > { %1763 = vmatpush3.bf16.msra.mxu1 %v567_v21 }
  0xd2   : > { %969 = vrot.lane.b32.xlu1 %v1945_v2, %s1886_s9  ;;  %967 = vrot.lane.b32.xlu0 %v1948_v3, %s1886_s9 }
  0xd3   : > { %v422_v22 = vpop.permute.xlu1 %421  ;;  %v420_v23 = vpop.permute.xlu0 %419 }
  0xd4   : > { %v430_v24 = vsel %vm427_vm3, %v420_v23, %v422_v22 }
  0xd5   : > { %1742 = vmatprep.subr.bf16.mxu0 %v430_v24 }
  0xd6   : > { %831 = vrot.lane.b32.xlu1 %v1945_v2, %s1887_s10  ;;  %829 = vrot.lane.b32.xlu0 %v1948_v3, %s1887_s10 }
  0xd7   : > { %v284_v0 = vpop.permute.xlu1 %283  ;;  %v282_v1 = vpop.permute.xlu0 %281 }
  0xd8   : > { %v292_v25 = vsel %vm289_vm4, %v282_v1, %v284_v0 }
  0xd9   : > { %1743 = vmatpush3.bf16.msra.mxu0 %v292_v25 }
  0xda   : > { %1245 = vrot.lane.b32.xlu1 %v1945_v2, %s1888_s11  ;;  %1243 = vrot.lane.b32.xlu0 %v1948_v3, %s1888_s11 }
  0xdb   : > { %v698_v26 = vpop.permute.xlu1 %697  ;;  %v696_v27 = vpop.permute.xlu0 %695 }
  0xdc   : > { %v706_v28 = vsel %vm703_vm5, %v696_v27, %v698_v26 }
  0xdd   : > { %1764 = vmatprep.subr.bf16.mxu1 %v706_v28 }
  0xde   : > { %1107 = vrot.lane.b32.xlu1 %v1945_v2, %s1889_s12  ;;  %1105 = vrot.lane.b32.xlu0 %v1948_v3, %s1889_s12 }
  0xdf   : > { %v560_v29 = vpop.permute.xlu1 %559  ;;  %v558_v30 = vpop.permute.xlu0 %557 }
  0xe0   : > { %v568_v31 = vsel %vm565_vm6, %v558_v30, %v560_v29 }
  0xe1   : > { %1765 = vmatpush3.bf16.msra.mxu1 %v568_v31 }
  0xe2   : > { %973 = vrot.lane.b32.xlu1 %v1957_v4, %s1886_s9  ;;  %971 = vrot.lane.b32.xlu0 %v1960_v5, %s1886_s9 }
  0xe3   : > { %v426_v32 = vpop.permute.xlu1 %425  ;;  %v424_v33 = vpop.permute.xlu0 %423 }
  0xe4   : > { %v431_v34 = vsel %vm427_vm3, %v424_v33, %v426_v32 }
  0xe5   : > { %1744 = vmatprep.subr.bf16.mxu0 %v431_v34 }
  0xe6   : > { %835 = vrot.lane.b32.xlu1 %v1957_v4, %s1887_s10  ;;  %833 = vrot.lane.b32.xlu0 %v1960_v5, %s1887_s10 }
  0xe7   : > { %v288_v2 = vpop.permute.xlu1 %287  ;;  %v286_v3 = vpop.permute.xlu0 %285 }
  0xe8   : > { %v293_v35 = vsel %vm289_vm4, %v286_v3, %v288_v2 }
  0xe9   : > { %1745 = vmatpush3.bf16.msra.mxu0 %v293_v35 }
  0xea   : > { %1249 = vrot.lane.b32.xlu1 %v1957_v4, %s1888_s11  ;;  %1247 = vrot.lane.b32.xlu0 %v1960_v5, %s1888_s11 }
  0xeb   : > { %v702_v38 = vpop.permute.xlu1 %701  ;;  %v700_v39 = vpop.permute.xlu0 %699 }
  0xec   : > { %v707_v41 = vsel %vm703_vm5, %v700_v39, %v702_v38  ;;  %1397 = vmatmul.mubr.bf16.vlgmr.msra.gmra.mrb[0].mxu0 %v1719_v36 }
  0xed   : > { %1766 = vmatprep.subr.bf16.mxu1 %v707_v41  ;;  %1476 = vmatprep.mubr.bf16.mxu0 %v1724_v40 }
  0xee   : > { %1111 = vrot.lane.b32.xlu1 %v1957_v4, %s1889_s12  ;;  %1109 = vrot.lane.b32.xlu0 %v1960_v5, %s1889_s12  ;;  %v2188_v4 = vld [vmem:[%s2251_s1 + $0x18] sm:$0xff] }
  0xef   : > { %v564_v8 = vpop.permute.xlu1 %563  ;;  %v562_v42 = vpop.permute.xlu0 %561  ;;  %v1726_v46 = vcombine.high %v2188_v4, %v2188_v4 }
  0xf0   : > { %v569_v43 = vsel %vm565_vm6, %v562_v42, %v564_v8 }
  0xf1   : > { %1767 = vmatpush3.bf16.msra.mxu1 %v569_v43 }
  0xf2   : > { %977 = vrot.lane.b32.xlu1 %v1969_v6, %s1886_s9  ;;  %975 = vrot.lane.b32.xlu0 %v1972_v7, %s1886_s9 }
  0xf3   : > { %v897_v5 = vpop.permute.xlu1 %896  ;;  %v895_v45 = vpop.permute.xlu0 %894 }
  0xf4   : > { %v911_v10 = vsel %vm910_vm7, %v895_v45, %v897_v5  ;;  %1437 = vmatmul.mubr.bf16.vlgmr.msra.gmra.mrb[0].mxu1 %v1721_v44 }
  0xf5   : > { %1774 = vmatprep.subr.bf16.mxu0 %v911_v10  ;;  %1516 = vmatprep.mubr.bf16.mxu1 %v1726_v46 }
  0xf6   : > { %839 = vrot.lane.b32.xlu1 %v1969_v6, %s1887_s10  ;;  %837 = vrot.lane.b32.xlu0 %v1972_v7, %s1887_s10 }
  0xf7   : > { %v759_v47 = vpop.permute.xlu1 %758  ;;  %v757_v48 = vpop.permute.xlu0 %756 }
  0xf8   : > { %v773_v50 = vsel %vm772_vm8, %v757_v48, %v759_v47 }
  0xf9   : > { %1775 = vmatpush3.bf16.msra.mxu0 %v773_v50 }
  0xfa   : > { %1253 = vrot.lane.b32.xlu1 %v1969_v6, %s1888_s11  ;;  %1251 = vrot.lane.b32.xlu0 %v1972_v7, %s1888_s11 }
  0xfc   : > { %v1173_v51 = vpop.permute.xlu1 %1172  ;;  %v1171_v52 = vpop.permute.xlu0 %1170 }
  0xfd   : > { %v1187_v53 = vsel %vm1186_vm9, %v1171_v52, %v1173_v51 }
  0xfe   : > { %1115 = vrot.lane.b32.xlu1 %v1969_v6, %s1889_s12  ;;  %1113 = vrot.lane.b32.xlu0 %v1972_v7, %s1889_s12 }
  0xff   : > { %1796 = vmatprep.subr.bf16.mxu1 %v1187_v53 }
 0x100   : > { %v1035_v55 = vpop.permute.xlu1 %1034  ;;  %v1033_v56 = vpop.permute.xlu0 %1032 }
 0x101   : > { %v1049_v57 = vsel %vm1048_vm10, %v1033_v56, %v1035_v55 }
 0x102   : > { %1797 = vmatpush3.bf16.msra.mxu1 %v1049_v57  ;;  %1529 = vperm.xlu0 %1842, %v1526_v54  }
 0x104   : > { %v901_v58 = vpop.permute.xlu1 %900  ;;  %v899_v59 = vpop.permute.xlu0 %898 }
 0x105   : > { %v912_v60 = vsel %vm910_vm7, %v899_v59, %v901_v58 }
 0x106   : > { %1776 = vmatprep.subr.bf16.mxu0 %v912_v60 }
 0x108   : > { %v763_v6 = vpop.permute.xlu1 %762  ;;  %v761_v61 = vpop.permute.xlu0 %760 }
 0x109   : > { %v774_v7 = vsel %vm772_vm8, %v761_v61, %v763_v6 }
 0x10a   : > { %1777 = vmatpush3.bf16.msra.mxu0 %v774_v7 }
 0x10c   : > { %v1177_v62 = vpop.permute.xlu1 %1176  ;;  %v1175_v63 = vpop.permute.xlu0 %1174 }
 0x10d   : > { %v1188_v9 = vsel %vm1186_vm9, %v1175_v63, %v1177_v62 }
 0x10e   : > { %1798 = vmatprep.subr.bf16.mxu1 %v1188_v9 }
 0x110   : > { %v1039_v11 = vpop.permute.xlu1 %1038  ;;  %v1037_v12 = vpop.permute.xlu0 %1036 }
 0x111   : > { %v1050_v13 = vsel %vm1048_vm10, %v1037_v12, %v1039_v11 }
 0x112   : > { %1799 = vmatpush3.bf16.msra.mxu1 %v1050_v13 }
 0x114   : > { %v905_v14 = vpop.permute.xlu1 %904  ;;  %v903_v15 = vpop.permute.xlu0 %902 }
 0x115   : > { %v913_v16 = vsel %vm910_vm7, %v903_v15, %v905_v14 }
 0x116   : > { %1778 = vmatprep.subr.bf16.mxu0 %v913_v16 }
 0x118   : > { %v767_v17 = vpop.permute.xlu1 %766  ;;  %v765_v18 = vpop.permute.xlu0 %764 }
 0x119   : > { %v775_v19 = vsel %vm772_vm8, %v765_v18, %v767_v17  ;;  %v1723_v18 = vcombine.low %v2169_v37, %v2169_v37 }
 0x11a   : > { %1779 = vmatpush3.bf16.msra.mxu0 %v775_v19 }
 0x11c   : > { %v1181_v20 = vpop.permute.xlu1 %1180  ;;  %v1179_v21 = vpop.permute.xlu0 %1178 }
 0x11d   : > { %v1189_v22 = vsel %vm1186_vm9, %v1179_v21, %v1181_v20 }
 0x11e   : > { %1800 = vmatprep.subr.bf16.mxu1 %v1189_v22 }
 0x120   : > { %v1043_v23 = vpop.permute.xlu1 %1042  ;;  %v1041_v24 = vpop.permute.xlu0 %1040 }
 0x121   : > { %v1051_v0 = vsel %vm1048_vm10, %v1041_v24, %v1043_v23 }
 0x122   : > { %1801 = vmatpush3.bf16.msra.mxu1 %v1051_v0  ;;  %v1725_v0 = vcombine.low %v2188_v4, %v2188_v4 }
 0x124   : > { %v909_v1 = vpop.permute.xlu1 %908  ;;  %v907_v25 = vpop.permute.xlu0 %906 }
 0x125   : > { %v914_v26 = vsel %vm910_vm7, %v907_v25, %v909_v1 }
 0x126   : > { %1780 = vmatprep.subr.bf16.mxu0 %v914_v26 }
 0x128   : > { %v771_v27 = vpop.permute.xlu1 %770  ;;  %v769_v28 = vpop.permute.xlu0 %768 }
 0x129   : > { %v776_v29 = vsel %vm772_vm8, %v769_v28, %v771_v27 }
 0x12a   : > { %1781 = vmatpush3.bf16.msra.mxu0 %v776_v29 }
 0x12c   : > { %v1185_v30 = vpop.permute.xlu1 %1184  ;;  %v1183_v31 = vpop.permute.xlu0 %1182 }
 0x12d   : > { %v1190_v32 = vsel %vm1186_vm9, %v1183_v31, %v1185_v30 }
 0x12e   : > { %1802 = vmatprep.subr.bf16.mxu1 %v1190_v32 }
 0x130   : > { %v1047_v33 = vpop.permute.xlu1 %1046  ;;  %v1045_v34 = vpop.permute.xlu0 %1044 }
 0x131   : > { %v1052_v2 = vsel %vm1048_vm10, %v1045_v34, %v1047_v33 }
 0x132   : > { %1803 = vmatpush3.bf16.msra.mxu1 %v1052_v2 }
 0x134   : > { %v966_v3 = vpop.permute.xlu1 %965  ;;  %v964_v35 = vpop.permute.xlu0 %963 }
 0x135   : > { %v980_v36 = vsel %vm979_vm11, %v964_v35, %v966_v3 }
 0x136   : > { %1782 = vmatprep.subr.bf16.mxu0 %v980_v36 }
 0x138   : > { %v828_v38 = vpop.permute.xlu1 %827  ;;  %v826_v39 = vpop.permute.xlu0 %825 }
 0x139   : > { %v842_v40 = vsel %vm841_vm12, %v826_v39, %v828_v38 }
 0x13a   : > { %1783 = vmatpush3.bf16.msra.mxu0 %v842_v40 }
 0x13c   : > { %v1242_v41 = vpop.permute.xlu1 %1241  ;;  %v1240_v8 = vpop.permute.xlu0 %1239 }
 0x13d   : > { %v1256_v42 = vsel %vm1255_vm13, %v1240_v8, %v1242_v41 }
 0x13e   : > { %1804 = vmatprep.subr.bf16.mxu1 %v1256_v42 }
 0x140   : > { %v1104_v43 = vpop.permute.xlu1 %1103  ;;  %v1102_v44 = vpop.permute.xlu0 %1101 }
 0x141   : > { %v1118_v5 = vsel %vm1117_vm14, %v1102_v44, %v1104_v43 }
 0x142   : > { %1805 = vmatpush3.bf16.msra.mxu1 %v1118_v5 }
 0x144   : > { %v970_v45 = vpop.permute.xlu1 %969  ;;  %v968_v46 = vpop.permute.xlu0 %967 }
 0x145   : > { %v981_v10 = vsel %vm979_vm11, %v968_v46, %v970_v45 }
 0x146   : > { %1784 = vmatprep.subr.bf16.mxu0 %v981_v10 }
 0x148   : > { %v832_v47 = vpop.permute.xlu1 %831  ;;  %v830_v48 = vpop.permute.xlu0 %829 }
 0x149   : > { %v843_v49 = vsel %vm841_vm12, %v830_v48, %v832_v47 }
 0x14a   : > { %1785 = vmatpush3.bf16.msra.mxu0 %v843_v49 }
 0x14c   : > { %v1246_v50 = vpop.permute.xlu1 %1245  ;;  %v1244_v51 = vpop.permute.xlu0 %1243 }
 0x14d   : > { %v1257_v52 = vsel %vm1255_vm13, %v1244_v51, %v1246_v50 }
 0x14e   : > { %1806 = vmatprep.subr.bf16.mxu1 %v1257_v52 }
 0x150   : > { %v1108_v53 = vpop.permute.xlu1 %1107  ;;  %v1106_v54 = vpop.permute.xlu0 %1105 }
 0x151   : > { %v1119_v55 = vsel %vm1117_vm14, %v1106_v54, %v1108_v53 }
 0x152   : > { %1807 = vmatpush3.bf16.msra.mxu1 %v1119_v55 }
 0x154   : > { %v974_v56 = vpop.permute.xlu1 %973  ;;  %v972_v57 = vpop.permute.xlu0 %971 }
 0x155   : > { %v982_v58 = vsel %vm979_vm11, %v972_v57, %v974_v56 }
 0x156   : > { %1786 = vmatprep.subr.bf16.mxu0 %v982_v58 }
 0x158   : > { %v836_v59 = vpop.permute.xlu1 %835  ;;  %v834_v60 = vpop.permute.xlu0 %833 }
 0x159   : > { %v844_v6 = vsel %vm841_vm12, %v834_v60, %v836_v59 }
 0x15a   : > { %1787 = vmatpush3.bf16.msra.mxu0 %v844_v6 }
 0x15c   : > { %v1250_v61 = vpop.permute.xlu1 %1249  ;;  %v1248_v7 = vpop.permute.xlu0 %1247 }
 0x15d   : > { %v1258_v62 = vsel %vm1255_vm13, %v1248_v7, %v1250_v61 }
 0x15e   : > { %1808 = vmatprep.subr.bf16.mxu1 %v1258_v62 }
 0x160   : > { %v1112_v63 = vpop.permute.xlu1 %1111  ;;  %v1110_v9 = vpop.permute.xlu0 %1109 }
 0x161   : > { %v1120_v11 = vsel %vm1117_vm14, %v1110_v9, %v1112_v63 }
 0x162   : > { %1809 = vmatpush3.bf16.msra.mxu1 %v1120_v11 }
 0x164   : > { %v978_v12 = vpop.permute.xlu1 %977  ;;  %v976_v13 = vpop.permute.xlu0 %975 }
 0x165   : > { %v983_v14 = vsel %vm979_vm11, %v976_v13, %v978_v12 }
 0x166   : > { %1788 = vmatprep.subr.bf16.mxu0 %v983_v14 }
 0x168   : > { %v840_v15 = vpop.permute.xlu1 %839  ;;  %v838_v16 = vpop.permute.xlu0 %837 }
 0x169   : > { %v845_v17 = vsel %vm841_vm12, %v838_v16, %v840_v15 }
 0x16a   : > { %1789 = vmatpush3.bf16.msra.mxu0 %v845_v17 }
 0x16c   : > { %v1254_v19 = vpop.permute.xlu1 %1253  ;;  %v1252_v20 = vpop.permute.xlu0 %1251 }
 0x16d   : > { %1477 = vmatmul.mubr.bf16.vlgmr.msra.gmra.mrb[4].mxu0 %v1723_v18  ;;  %v1259_v21 = vsel %vm1255_vm13, %v1252_v20, %v1254_v19 }
 0x16e   : > { %1810 = vmatprep.subr.bf16.mxu1 %v1259_v21 }
 0x170   : > { %v1116_v22 = vpop.permute.xlu1 %1115  ;;  %v1114_v23 = vpop.permute.xlu0 %1113 }
 0x171   : > { %v1121_v24 = vsel %vm1117_vm14, %v1114_v23, %v1116_v22 }
 0x172   : > { %1811 = vmatpush3.bf16.msra.mxu1 %v1121_v24 }
 0x175   : > { %1517 = vmatmul.mubr.bf16.vlgmr.msra.gmra.mrb[4].mxu1 %v1725_v0 }
 0x181   : > { %v1530_v42 = vpop.permute.xlu0 %1529 }
 0x1bf   : > { %v1746_v1 = vpop.f32.mrb[0].mxu0 }
 0x1c0   : > { %v1747_v25 = vpop.f32.mrb[1].mxu0 }
 0x1c1   : > { %v1748_v26 = vadd.f32 %v1747_v25, %v1746_v1  ;;  %v1749_v37 = vpop.f32.mrb[2].mxu0 }
 0x1c2   : > { %v1750_v27 = vpop.f32.mrb[3].mxu0 }
 0x1c7   : > { %v1768_v28 = vpop.f32.mrb[0].mxu1 }
 0x1c8   : > { %v1769_v29 = vpop.f32.mrb[1].mxu1 }
 0x1c9   : > { %v1770_v30 = vadd.f32 %v1769_v29, %v1768_v28  ;;  %v1771_v31 = vpop.f32.mrb[2].mxu1 }
 0x1ca   : > { %v1772_v32 = vpop.f32.mrb[3].mxu1 }
 0x1cb   : > { %v1439_v33 = vadd.f32 %v1770_v30, %v1748_v26 }
 0x240   : > { %v1790_v34 = vpop.f32.mrb[4].mxu0 }
 0x241   : > { %v1791_v2 = vpop.f32.mrb[5].mxu0 }
 0x242   : > { %v1792_v3 = vadd.f32 %v1791_v2, %v1790_v34  ;;  %v1793_v35 = vpop.f32.mrb[6].mxu0 }
 0x243   : > { %v1794_v36 = vpop.f32.mrb[7].mxu0 }
 0x244   : > { %v1479_v4 = vadd.f32 %v1792_v3, %v1439_v33 }
 0x248   : > { %v1812_v38 = vpop.f32.mrb[4].mxu1 }
 0x249   : > { %v1813_v39 = vpop.f32.mrb[5].mxu1 }
 0x24a   : > { %v1814_v40 = vadd.f32 %v1813_v39, %v1812_v38  ;;  %v1815_v41 = vpop.f32.mrb[6].mxu1 }
 0x24b   : > { %v1816_v8 = vpop.f32.mrb[7].mxu1 }
 0x24c   : > { %v1519_v43 = vadd.f32 %v1814_v40, %v1479_v4 }
 0x24e   : > { %v1532_v44 = vadd.f32 %v1530_v42, %v1519_v43 }
 0x250   : > { %1533 = vst [vmem:[%s195_s23] sm:$0xff] %v1532_v44 }
 0x251 PF: > { %s14_s15 = sadd.s32 1, %s1873_s15  }
 0x252   : > { %p11_p4 = scmp.ge.s32.totalorder %s14_s15, 4  }
 0x254   :  { %13 = sbr.rel (!%p11_p4) target bundleno = 1 (0x1), region = 66 }

</bundles_post_ra>
